<compile_context>
chip_gen: v7x
topology: tpu7x:2x2x1
jax: 0.10.0
libtpu: 0.0.40
codegen_flags: <defaults>
</compile_context>

<pallas_src>
import functools

import jax
import jax.numpy as jnp
from jax.experimental import pallas as pl
from jax.experimental.pallas import tpu as pltpu

NEG_SLOPE = 0.2
KSIZE = 16      # 4 * 4 in the PyTorch module
STRIDE = 2


def _round_up(x, m):
    return (x + m - 1) // m * m


def _cdiv(a, b):
    return (a + b - 1) // b


# ---------------------------------------------------------------------------
# Fused conv(16x16, stride 2, VALID, no bias) [+ LeakyReLU] Pallas kernel.
#
# The wrapper splits the NHWC input by H-parity and unrolls the 16 W-window
# taps so every in-kernel slice is a plain, 8-aligned contiguous slice, then
# hands the kernel one (2, (T+7)*OWp, 16*Cin) row band per grid step.  The
# kernel walks the 16 kh taps (p = kh % 2 parity, dh = kh // 2 row shift) and
# accumulates bf16 MXU matmuls into an f32 scratch, applies LeakyReLU, and
# writes a lane-dense tile.
# ---------------------------------------------------------------------------
def _conv_kernel(xb_ref, w_ref, o_ref, acc_ref, *, T, OWp, Rc, Kc,
                 apply_act, neg_slope):
    K16 = w_ref.shape[1]
    n_mc = T // Rc            # output-row chunks per grid tile
    n_kc = K16 // Kc          # contraction chunks per kh tap
    CM = Rc * OWp             # GEMM M per chunk

    for mc in range(n_mc):
        acc_ref[...] = jnp.zeros_like(acc_ref)
        for kh in range(KSIZE):
            p, dh = kh % 2, kh // 2
            r0 = (mc * Rc + dh) * OWp
            for kc in range(n_kc):
                lhs = xb_ref[p, r0:r0 + CM, kc * Kc:(kc + 1) * Kc]
                rhs = w_ref[kh, kc * Kc:(kc + 1) * Kc, :]
                acc_ref[...] += jnp.dot(lhs, rhs,
                                        preferred_element_type=jnp.float32)
        res = acc_ref[...]
        if apply_act:
            res = jnp.where(res >= 0, res, res * neg_slope)
        o_ref[mc * CM:(mc + 1) * CM, :] = res.astype(o_ref.dtype)


def conv2d_s2_leaky(x, w, *, T, Rc, tn, kc_cap, apply_act, out_dtype):
    """Conv2d(kernel=16, stride=2, VALID, bias=False) [+ LeakyReLU(0.2)].

    x: (N, H, W, Cin) bf16, NHWC.   w: (Cout, Cin, 16, 16) float.
    Returns (N, OH, OW, Cout) in `out_dtype`.
    """
    N, H, W, C = x.shape
    Cout, Cin, KH, KW = w.shape
    assert (C, KH, KW) == (Cin, KSIZE, KSIZE)
    assert H % 2 == 0 and W % 2 == 0
    OH = (H - KSIZE) // STRIDE + 1
    OW = (W - KSIZE) // STRIDE + 1

    K16 = KSIZE * C
    OWp = _round_up(OW, 8)                     # sublane-friendly row width
    T = min(T, _round_up(OH, Rc))              # output rows per grid tile
    I = _cdiv(OH, T)                           # row tiles
    J = _cdiv(Cout, tn)                        # output-channel tiles
    Coutp = J * tn
    Kc = kc_cap if (K16 > kc_cap and K16 % kc_cap == 0) else K16
    BAND = (T + 7) * OWp                       # band rows per tile (per parity)
    TM = T * OWp                               # output rows per tile
    assert T % Rc == 0 and K16 % Kc == 0

    # --- input restructuring (cheap XLA glue, no 64x im2col blow-up) ---------
    Hpad = I * T + 7                           # h2 rows needed per parity
    Wpad = 2 * OWp + KSIZE - 2                 # input cols needed
    xpd = jnp.pad(x, ((0, 0), (0, 2 * Hpad - H), (0, Wpad - W), (0, 0)))
    # H-parity split: xps[n, p, h2, w, c] = x[n, 2*h2 + p, w, c]
    xps = jnp.moveaxis(xpd.reshape(N, Hpad, 2, Wpad, C), 2, 1)
    # 16 W-window taps: xw[n, p, h2, ow, kw, c] = x[n, 2*h2+p, 2*ow+kw, c]
    xw = jnp.stack([xps[:, :, :, kw:kw + 2 * OWp:2, :] for kw in range(KSIZE)],
                   axis=4)
    # per-row-tile bands so the kernel only needs plain blocked tiles
    xb = jnp.stack([xw[:, :, i * T:i * T + T + 7] for i in range(I)], axis=1)
    xb = xb.reshape(N, I, 2, BAND, K16).astype(jnp.bfloat16)

    # --- weights: (Cout, Cin, kh, kw) -> (J, kh, kw*Cin, tn), bf16 -----------
    w2 = jnp.transpose(w, (2, 3, 1, 0)).reshape(KSIZE, K16, Cout)
    if Coutp != Cout:
        w2 = jnp.pad(w2, ((0, 0), (0, 0), (0, Coutp - Cout)))
    w2 = jnp.moveaxis(w2.reshape(KSIZE, K16, J, tn), 2, 0).astype(jnp.bfloat16)

    kernel = functools.partial(_conv_kernel, T=T, OWp=OWp, Rc=Rc, Kc=Kc,
                               apply_act=apply_act, neg_slope=NEG_SLOPE)
    out = pl.pallas_call(
        kernel,
        out_shape=jax.ShapeDtypeStruct((N, J, I * TM, tn), out_dtype),
        grid=(N, J, I),
        in_specs=[
            pl.BlockSpec((None, None, 2, BAND, K16),
                         lambda n, j, i: (n, i, 0, 0, 0)),
            pl.BlockSpec((None, KSIZE, K16, tn),
                         lambda n, j, i: (j, 0, 0, 0)),
        ],
        out_specs=pl.BlockSpec((None, None, TM, tn),
                               lambda n, j, i: (n, j, i, 0)),
        scratch_shapes=[pltpu.VMEM((Rc * OWp, tn), jnp.float32)],
        compiler_params=pltpu.CompilerParams(
            dimension_semantics=("parallel", "parallel", "parallel"),
            vmem_limit_bytes=48 * 1024 * 1024,
        ),
    )(xb, w2)

    # (N, J, I*T*OWp, tn) -> (N, OH, OW, Cout)
    y = out.reshape(N, J, I * T, OWp, tn)
    y = jnp.moveaxis(y, 1, 3).reshape(N, I * T, OWp, Coutp)
    return y[:, :OH, :OW, :Cout]


# Per-layer tiling (rows/tile T, rows/GEMM-chunk Rc, Cout tile tn, K-chunk cap).
# Chosen so each pallas_call stays under ~31 MiB VMEM (v7x-safe) while the MXU
# sees large (M ~ 256..3700, K = 1024..2048) bf16 matmuls.
_LAYER_TILES = (
    (48, 16, 64, 2048),    # conv1: Cin=num_classes -> 64,  OH=226
    (16, 8, 128, 1024),    # conv2: 64  -> 128, OH=106
    (8, 8, 128, 2048),     # conv3: 128 -> 256, OH=46
    (16, 16, 64, 2048),    # conv4: 256 -> 512, OH=16
    (1, 1, 8, 2048),       # conv5: 512 -> 1,   OH=1
)


def _bilinear_matrix(in_size, out_size, dtype=jnp.float32):
    """nn.Upsample(mode='bilinear', align_corners=False) as an interp matrix."""
    scale = in_size / out_size
    o = jnp.arange(out_size)
    src = (o.astype(jnp.float32) + 0.5) * scale - 0.5
    src = jnp.clip(src, 0.0, float(in_size - 1))
    lo = jnp.floor(src).astype(jnp.int32)
    hi = jnp.minimum(lo + 1, in_size - 1)
    frac = src - lo.astype(jnp.float32)
    m = jnp.zeros((out_size, in_size), dtype)
    m = m.at[o, lo].add(1.0 - frac).at[o, hi].add(frac)
    return m


@jax.jit
def discriminator_forward(x_nchw, conv_ws):
    """Matches Discriminator.forward: 5x (conv16/2 [+LeakyReLU]) + 32x bilinear."""
    x = jnp.transpose(x_nchw, (0, 2, 3, 1)).astype(jnp.bfloat16)  # NCHW -> NHWC
    n_layers = len(conv_ws)
    for idx, w in enumerate(conv_ws):
        last = idx == n_layers - 1
        T, Rc, tn, kc_cap = _LAYER_TILES[idx]
        x = conv2d_s2_leaky(
            x, w, T=T, Rc=Rc, tn=tn, kc_cap=kc_cap,
            apply_act=not last,
            out_dtype=jnp.float32 if last else jnp.bfloat16)
    x = jnp.transpose(x, (0, 3, 1, 2)).astype(jnp.float32)        # NHWC -> NCHW
    n, c, h5, w5 = x.shape
    mh = _bilinear_matrix(h5, 32 * h5)
    mw = _bilinear_matrix(w5, 32 * w5)
    # out[n,c,oh,ow] = sum_{h,w} Mh[oh,h] * x[n,c,h,w] * Mw[ow,w]   (tiny, glue)
    return jnp.einsum("oh,nchw,pw->ncop", mh, x, mw)


def init_params(key, num_classes):
    chans = [num_classes, 64, 128, 256, 512, 1]
    ws = []
    for i in range(5):
        key, sub = jax.random.split(key)
        ws.append(0.02 * jax.random.normal(
            sub, (chans[i + 1], chans[i], KSIZE, KSIZE), jnp.float32))
    return tuple(ws)


def _self_check():
    """Tiny layout/indexing check of the fused conv kernel vs lax.conv."""
    key = jax.random.PRNGKey(42)
    kx, kw = jax.random.split(key)
    x = jax.random.normal(kx, (1, 20, 18, 2), jnp.float32)
    w = 0.1 * jax.random.normal(kw, (9, 2, KSIZE, KSIZE), jnp.float32)
    got = conv2d_s2_leaky(x.astype(jnp.bfloat16), w, T=2, Rc=1, tn=8,
                          kc_cap=16, apply_act=True, out_dtype=jnp.float32)
    ref = jax.lax.conv_general_dilated(
        x, w, window_strides=(STRIDE, STRIDE), padding="VALID",
        dimension_numbers=("NHWC", "OIHW", "NHWC"))
    ref = jnp.where(ref >= 0, ref, NEG_SLOPE * ref)
    err = jnp.max(jnp.abs(got - ref)) / (jnp.max(jnp.abs(ref)) + 1e-6)
    assert float(err) < 0.05, f"fused conv mismatch: rel err {float(err)}"


if __name__ == "__main__":
    _self_check()

    num_classes = 3
    batch = 1            # kept small: the architecture already forces 466x466
    spatial = 466        # minimum size implied by five 16x16 / stride-2 convs

    key = jax.random.PRNGKey(0)
    k_x, k_w = jax.random.split(key)
    x = jax.random.normal(k_x, (batch, num_classes, spatial, spatial),
                          jnp.float32)
    conv_ws = init_params(k_w, num_classes)

    out = discriminator_forward(x, conv_ws)
    out = jax.block_until_ready(out)

    assert out.shape == (batch, 1, 32, 32), out.shape
    assert out.dtype == jnp.float32
    assert bool(jnp.all(jnp.isfinite(out)))
    print("KERNEL_OK")
</pallas_src>

<mosaic_0001>
module attributes {stable_mosaic.version = 11 : i64} {
  func.func @_conv_kernel(%arg0: i32, %arg1: i32, %arg2: i32, %arg3: memref<1x1x2x72x32xbf16, #tpu.memory_space<vmem>>, %arg4: memref<1x16x32x8xbf16, #tpu.memory_space<vmem>>, %arg5: memref<1x1x16x8xf32, #tpu.memory_space<vmem>>, %arg6: memref<8x8xf32, #tpu.memory_space<vmem>>) attributes {dimension_semantics = [#tpu.dimension_semantics<parallel>, #tpu.dimension_semantics<parallel>, #tpu.dimension_semantics<parallel>], iteration_bounds = array<i64: 1, 2, 2>, scalar_prefetch = 0 : i64, scratch_operands = 1 : i64, tpu.core_type = #tpu.core_type<tc>, window_params = [{transform_indices = @transform_0, window_bounds = array<i64: 1, 1, 2, 72, 32>}, {transform_indices = @transform_1, window_bounds = array<i64: 1, 16, 32, 8>}, {transform_indices = @transform_2, window_bounds = array<i64: 1, 1, 16, 8>}]} {
    %cst = arith.constant 0.000000e+00 : f32
    %0 = vector.broadcast %cst : f32 to vector<8x8xf32>
    %c0 = arith.constant 0 : index
    %c0_0 = arith.constant 0 : index
    %1 = vector.load %arg6[%c0, %c0_0] : memref<8x8xf32, #tpu.memory_space<vmem>>, vector<8x8xf32>
    tpu.vector_store %arg6[%c0, %c0_0], %0 {strides = array<i32>} : memref<8x8xf32, #tpu.memory_space<vmem>>, vector<8x8xf32>,
    %c0_1 = arith.constant 0 : index
    %c0_2 = arith.constant 0 : index
    %c0_3 = arith.constant 0 : index
    %c0_4 = arith.constant 0 : index
    %c0_5 = arith.constant 0 : index
    %2 = vector.load %arg3[%c0_1, %c0_2, %c0_3, %c0_4, %c0_5] : memref<1x1x2x72x32xbf16, #tpu.memory_space<vmem>>, vector<1x1x1x8x16xbf16>
    %3 = vector.shape_cast %2 : vector<1x1x1x8x16xbf16> to vector<8x16xbf16>
    %c0_6 = arith.constant 0 : index
    %c0_7 = arith.constant 0 : index
    %c0_8 = arith.constant 0 : index
    %c0_9 = arith.constant 0 : index
    %4 = vector.load %arg4[%c0_6, %c0_7, %c0_8, %c0_9] : memref<1x16x32x8xbf16, #tpu.memory_space<vmem>>, vector<1x1x16x8xbf16>
    %5 = vector.shape_cast %4 : vector<1x1x16x8xbf16> to vector<16x8xbf16>
    %c0_10 = arith.constant 0 : index
    %c0_11 = arith.constant 0 : index
    %6 = vector.load %arg6[%c0_10, %c0_11] : memref<8x8xf32, #tpu.memory_space<vmem>>, vector<8x8xf32>
    %cst_12 = arith.constant dense<0.000000e+00> : vector<8x8xf32>
    %7 = tpu.matmul %3, %5, %cst_12 {dimension_numbers = #tpu.dot_dimension_numbers<[1], [0], [0], [1], [0, 0, 1, 1], [], []>} : vector<8x16xbf16>, vector<16x8xbf16>, vector<8x8xf32> -> vector<8x8xf32>
    %8 = arith.addf %6, %7 : vector<8x8xf32>
    %c0_13 = arith.constant 0 : index
    %c0_14 = arith.constant 0 : index
    %9 = vector.load %arg6[%c0_13, %c0_14] : memref<8x8xf32, #tpu.memory_space<vmem>>, vector<8x8xf32>
    tpu.vector_store %arg6[%c0_13, %c0_14], %8 {strides = array<i32>} : memref<8x8xf32, #tpu.memory_space<vmem>>, vector<8x8xf32>,
    %c0_15 = arith.constant 0 : index
    %c0_16 = arith.constant 0 : index
    %c0_17 = arith.constant 0 : index
    %c0_18 = arith.constant 0 : index
    %c16 = arith.constant 16 : index
    %10 = vector.load %arg3[%c0_15, %c0_16, %c0_17, %c0_18, %c16] : memref<1x1x2x72x32xbf16, #tpu.memory_space<vmem>>, vector<1x1x1x8x16xbf16>
    %11 = vector.shape_cast %10 : vector<1x1x1x8x16xbf16> to vector<8x16xbf16>
    %c0_19 = arith.constant 0 : index
    %c0_20 = arith.constant 0 : index
    %c16_21 = arith.constant 16 : index
    %c0_22 = arith.constant 0 : index
    %12 = vector.load %arg4[%c0_19, %c0_20, %c16_21, %c0_22] : memref<1x16x32x8xbf16, #tpu.memory_space<vmem>>, vector<1x1x16x8xbf16>
    %13 = vector.shape_cast %12 : vector<1x1x16x8xbf16> to vector<16x8xbf16>
    %c0_23 = arith.constant 0 : index
    %c0_24 = arith.constant 0 : index
    %14 = vector.load %arg6[%c0_23, %c0_24] : memref<8x8xf32, #tpu.memory_space<vmem>>, vector<8x8xf32>
    %cst_25 = arith.constant dense<0.000000e+00> : vector<8x8xf32>
    %15 = tpu.matmul %11, %13, %cst_25 {dimension_numbers = #tpu.dot_dimension_numbers<[1], [0], [0], [1], [0, 0, 1, 1], [], []>} : vector<8x16xbf16>, vector<16x8xbf16>, vector<8x8xf32> -> vector<8x8xf32>
    %16 = arith.addf %14, %15 : vector<8x8xf32>
    %c0_26 = arith.constant 0 : index
    %c0_27 = arith.constant 0 : index
    %17 = vector.load %arg6[%c0_26, %c0_27] : memref<8x8xf32, #tpu.memory_space<vmem>>, vector<8x8xf32>
    tpu.vector_store %arg6[%c0_26, %c0_27], %16 {strides = array<i32>} : memref<8x8xf32, #tpu.memory_space<vmem>>, vector<8x8xf32>,
    %c0_28 = arith.constant 0 : index
    %c0_29 = arith.constant 0 : index
    %c1 = arith.constant 1 : index
    %c0_30 = arith.constant 0 : index
    %c0_31 = arith.constant 0 : index
    %18 = vector.load %arg3[%c0_28, %c0_29, %c1, %c0_30, %c0_31] : memref<1x1x2x72x32xbf16, #tpu.memory_space<vmem>>, vector<1x1x1x8x16xbf16>
    %19 = vector.shape_cast %18 : vector<1x1x1x8x16xbf16> to vector<8x16xbf16>
    %c0_32 = arith.constant 0 : index
    %c1_33 = arith.constant 1 : index
    %c0_34 = arith.constant 0 : index
    %c0_35 = arith.constant 0 : index
    %20 = vector.load %arg4[%c0_32, %c1_33, %c0_34, %c0_35] : memref<1x16x32x8xbf16, #tpu.memory_space<vmem>>, vector<1x1x16x8xbf16>
    %21 = vector.shape_cast %20 : vector<1x1x16x8xbf16> to vector<16x8xbf16>
    %c0_36 = arith.constant 0 : index
    %c0_37 = arith.constant 0 : index
    %22 = vector.load %arg6[%c0_36, %c0_37] : memref<8x8xf32, #tpu.memory_space<vmem>>, vector<8x8xf32>
    %cst_38 = arith.constant dense<0.000000e+00> : vector<8x8xf32>
    %23 = tpu.matmul %19, %21, %cst_38 {dimension_numbers = #tpu.dot_dimension_numbers<[1], [0], [0], [1], [0, 0, 1, 1], [], []>} : vector<8x16xbf16>, vector<16x8xbf16>, vector<8x8xf32> -> vector<8x8xf32>
    %24 = arith.addf %22, %23 : vector<8x8xf32>
    %c0_39 = arith.constant 0 : index
    %c0_40 = arith.constant 0 : index
    %25 = vector.load %arg6[%c0_39, %c0_40] : memref<8x8xf32, #tpu.memory_space<vmem>>, vector<8x8xf32>
    tpu.vector_store %arg6[%c0_39, %c0_40], %24 {strides = array<i32>} : memref<8x8xf32, #tpu.memory_space<vmem>>, vector<8x8xf32>,
    %c0_41 = arith.constant 0 : index
    %c0_42 = arith.constant 0 : index
    %c1_43 = arith.constant 1 : index
    %c0_44 = arith.constant 0 : index
    %c16_45 = arith.constant 16 : index
    %26 = vector.load %arg3[%c0_41, %c0_42, %c1_43, %c0_44, %c16_45] : memref<1x1x2x72x32xbf16, #tpu.memory_space<vmem>>, vector<1x1x1x8x16xbf16>
    %27 = vector.shape_cast %26 : vector<1x1x1x8x16xbf16> to vector<8x16xbf16>
    %c0_46 = arith.constant 0 : index
    %c1_47 = arith.constant 1 : index
    %c16_48 = arith.constant 16 : index
    %c0_49 = arith.constant 0 : index
    %28 = vector.load %arg4[%c0_46, %c1_47, %c16_48, %c0_49] : memref<1x16x32x8xbf16, #tpu.memory_space<vmem>>, vector<1x1x16x8xbf16>
    %29 = vector.shape_cast %28 : vector<1x1x16x8xbf16> to vector<16x8xbf16>
    %c0_50 = arith.constant 0 : index
    %c0_51 = arith.constant 0 : index
    %30 = vector.load %arg6[%c0_50, %c0_51] : memref<8x8xf32, #tpu.memory_space<vmem>>, vector<8x8xf32>
    %cst_52 = arith.constant dense<0.000000e+00> : vector<8x8xf32>
    %31 = tpu.matmul %27, %29, %cst_52 {dimension_numbers = #tpu.dot_dimension_numbers<[1], [0], [0], [1], [0, 0, 1, 1], [], []>} : vector<8x16xbf16>, vector<16x8xbf16>, vector<8x8xf32> -> vector<8x8xf32>
    %32 = arith.addf %30, %31 : vector<8x8xf32>
    %c0_53 = arith.constant 0 : index
    %c0_54 = arith.constant 0 : index
    %33 = vector.load %arg6[%c0_53, %c0_54] : memref<8x8xf32, #tpu.memory_space<vmem>>, vector<8x8xf32>
    tpu.vector_store %arg6[%c0_53, %c0_54], %32 {strides = array<i32>} : memref<8x8xf32, #tpu.memory_space<vmem>>, vector<8x8xf32>,
    %c0_55 = arith.constant 0 : index
    %c0_56 = arith.constant 0 : index
    %c0_57 = arith.constant 0 : index
    %c8 = arith.constant 8 : index
    %c0_58 = arith.constant 0 : index
    %34 = vector.load %arg3[%c0_55, %c0_56, %c0_57, %c8, %c0_58] : memref<1x1x2x72x32xbf16, #tpu.memory_space<vmem>>, vector<1x1x1x8x16xbf16>
    %35 = vector.shape_cast %34 : vector<1x1x1x8x16xbf16> to vector<8x16xbf16>
    %c0_59 = arith.constant 0 : index
    %c2 = arith.constant 2 : index
    %c0_60 = arith.constant 0 : index
    %c0_61 = arith.constant 0 : index
    %36 = vector.load %arg4[%c0_59, %c2, %c0_60, %c0_61] : memref<1x16x32x8xbf16, #tpu.memory_space<vmem>>, vector<1x1x16x8xbf16>
    %37 = vector.shape_cast %36 : vector<1x1x16x8xbf16> to vector<16x8xbf16>
    %c0_62 = arith.constant 0 : index
    %c0_63 = arith.constant 0 : index
    %38 = vector.load %arg6[%c0_62, %c0_63] : memref<8x8xf32, #tpu.memory_space<vmem>>, vector<8x8xf32>
    %cst_64 = arith.constant dense<0.000000e+00> : vector<8x8xf32>
    %39 = tpu.matmul %35, %37, %cst_64 {dimension_numbers = #tpu.dot_dimension_numbers<[1], [0], [0], [1], [0, 0, 1, 1], [], []>} : vector<8x16xbf16>, vector<16x8xbf16>, vector<8x8xf32> -> vector<8x8xf32>
    %40 = arith.addf %38, %39 : vector<8x8xf32>
    %c0_65 = arith.constant 0 : index
    %c0_66 = arith.constant 0 : index
    %41 = vector.load %arg6[%c0_65, %c0_66] : memref<8x8xf32, #tpu.memory_space<vmem>>, vector<8x8xf32>
    tpu.vector_store %arg6[%c0_65, %c0_66], %40 {strides = array<i32>} : memref<8x8xf32, #tpu.memory_space<vmem>>, vector<8x8xf32>,
    %c0_67 = arith.constant 0 : index
    %c0_68 = arith.constant 0 : index
    %c0_69 = arith.constant 0 : index
    %c8_70 = arith.constant 8 : index
    %c16_71 = arith.constant 16 : index
    %42 = vector.load %arg3[%c0_67, %c0_68, %c0_69, %c8_70, %c16_71] : memref<1x1x2x72x32xbf16, #tpu.memory_space<vmem>>, vector<1x1x1x8x16xbf16>
    %43 = vector.shape_cast %42 : vector<1x1x1x8x16xbf16> to vector<8x16xbf16>
    %c0_72 = arith.constant 0 : index
    %c2_73 = arith.constant 2 : index
    %c16_74 = arith.constant 16 : index
    %c0_75 = arith.constant 0 : index
    %44 = vector.load %arg4[%c0_72, %c2_73, %c16_74, %c0_75] : memref<1x16x32x8xbf16, #tpu.memory_space<vmem>>, vector<1x1x16x8xbf16>
    %45 = vector.shape_cast %44 : vector<1x1x16x8xbf16> to vector<16x8xbf16>
    %c0_76 = arith.constant 0 : index
    %c0_77 = arith.constant 0 : index
    %46 = vector.load %arg6[%c0_76, %c0_77] : memref<8x8xf32, #tpu.memory_space<vmem>>, vector<8x8xf32>
    %cst_78 = arith.constant dense<0.000000e+00> : vector<8x8xf32>
    %47 = tpu.matmul %43, %45, %cst_78 {dimension_numbers = #tpu.dot_dimension_numbers<[1], [0], [0], [1], [0, 0, 1, 1], [], []>} : vector<8x16xbf16>, vector<16x8xbf16>, vector<8x8xf32> -> vector<8x8xf32>
    %48 = arith.addf %46, %47 : vector<8x8xf32>
    %c0_79 = arith.constant 0 : index
    %c0_80 = arith.constant 0 : index
    %49 = vector.load %arg6[%c0_79, %c0_80] : memref<8x8xf32, #tpu.memory_space<vmem>>, vector<8x8xf32>
    tpu.vector_store %arg6[%c0_79, %c0_80], %48 {strides = array<i32>} : memref<8x8xf32, #tpu.memory_space<vmem>>, vector<8x8xf32>,
    %c0_81 = arith.constant 0 : index
    %c0_82 = arith.constant 0 : index
    %c1_83 = arith.constant 1 : index
    %c8_84 = arith.constant 8 : index
    %c0_85 = arith.constant 0 : index
    %50 = vector.load %arg3[%c0_81, %c0_82, %c1_83, %c8_84, %c0_85] : memref<1x1x2x72x32xbf16, #tpu.memory_space<vmem>>, vector<1x1x1x8x16xbf16>
    %51 = vector.shape_cast %50 : vector<1x1x1x8x16xbf16> to vector<8x16xbf16>
    %c0_86 = arith.constant 0 : index
    %c3 = arith.constant 3 : index
    %c0_87 = arith.constant 0 : index
    %c0_88 = arith.constant 0 : index
    %52 = vector.load %arg4[%c0_86, %c3, %c0_87, %c0_88] : memref<1x16x32x8xbf16, #tpu.memory_space<vmem>>, vector<1x1x16x8xbf16>
    %53 = vector.shape_cast %52 : vector<1x1x16x8xbf16> to vector<16x8xbf16>
    %c0_89 = arith.constant 0 : index
    %c0_90 = arith.constant 0 : index
    %54 = vector.load %arg6[%c0_89, %c0_90] : memref<8x8xf32, #tpu.memory_space<vmem>>, vector<8x8xf32>
    %cst_91 = arith.constant dense<0.000000e+00> : vector<8x8xf32>
    %55 = tpu.matmul %51, %53, %cst_91 {dimension_numbers = #tpu.dot_dimension_numbers<[1], [0], [0], [1], [0, 0, 1, 1], [], []>} : vector<8x16xbf16>, vector<16x8xbf16>, vector<8x8xf32> -> vector<8x8xf32>
    %56 = arith.addf %54, %55 : vector<8x8xf32>
    %c0_92 = arith.constant 0 : index
    %c0_93 = arith.constant 0 : index
    %57 = vector.load %arg6[%c0_92, %c0_93] : memref<8x8xf32, #tpu.memory_space<vmem>>, vector<8x8xf32>
    tpu.vector_store %arg6[%c0_92, %c0_93], %56 {strides = array<i32>} : memref<8x8xf32, #tpu.memory_space<vmem>>, vector<8x8xf32>,
    %c0_94 = arith.constant 0 : index
    %c0_95 = arith.constant 0 : index
    %c1_96 = arith.constant 1 : index
    %c8_97 = arith.constant 8 : index
    %c16_98 = arith.constant 16 : index
    %58 = vector.load %arg3[%c0_94, %c0_95, %c1_96, %c8_97, %c16_98] : memref<1x1x2x72x32xbf16, #tpu.memory_space<vmem>>, vector<1x1x1x8x16xbf16>
    %59 = vector.shape_cast %58 : vector<1x1x1x8x16xbf16> to vector<8x16xbf16>
    %c0_99 = arith.constant 0 : index
    %c3_100 = arith.constant 3 : index
    %c16_101 = arith.constant 16 : index
    %c0_102 = arith.constant 0 : index
    %60 = vector.load %arg4[%c0_99, %c3_100, %c16_101, %c0_102] : memref<1x16x32x8xbf16, #tpu.memory_space<vmem>>, vector<1x1x16x8xbf16>
    %61 = vector.shape_cast %60 : vector<1x1x16x8xbf16> to vector<16x8xbf16>
    %c0_103 = arith.constant 0 : index
    %c0_104 = arith.constant 0 : index
    %62 = vector.load %arg6[%c0_103, %c0_104] : memref<8x8xf32, #tpu.memory_space<vmem>>, vector<8x8xf32>
    %cst_105 = arith.constant dense<0.000000e+00> : vector<8x8xf32>
    %63 = tpu.matmul %59, %61, %cst_105 {dimension_numbers = #tpu.dot_dimension_numbers<[1], [0], [0], [1], [0, 0, 1, 1], [], []>} : vector<8x16xbf16>, vector<16x8xbf16>, vector<8x8xf32> -> vector<8x8xf32>
    %64 = arith.addf %62, %63 : vector<8x8xf32>
    %c0_106 = arith.constant 0 : index
    %c0_107 = arith.constant 0 : index
    %65 = vector.load %arg6[%c0_106, %c0_107] : memref<8x8xf32, #tpu.memory_space<vmem>>, vector<8x8xf32>
    tpu.vector_store %arg6[%c0_106, %c0_107], %64 {strides = array<i32>} : memref<8x8xf32, #tpu.memory_space<vmem>>, vector<8x8xf32>,
    %c0_108 = arith.constant 0 : index
    %c0_109 = arith.constant 0 : index
    %c0_110 = arith.constant 0 : index
    %c16_111 = arith.constant 16 : index
    %c0_112 = arith.constant 0 : index
    %66 = vector.load %arg3[%c0_108, %c0_109, %c0_110, %c16_111, %c0_112] : memref<1x1x2x72x32xbf16, #tpu.memory_space<vmem>>, vector<1x1x1x8x16xbf16>
    %67 = vector.shape_cast %66 : vector<1x1x1x8x16xbf16> to vector<8x16xbf16>
    %c0_113 = arith.constant 0 : index
    %c4 = arith.constant 4 : index
    %c0_114 = arith.constant 0 : index
    %c0_115 = arith.constant 0 : index
    %68 = vector.load %arg4[%c0_113, %c4, %c0_114, %c0_115] : memref<1x16x32x8xbf16, #tpu.memory_space<vmem>>, vector<1x1x16x8xbf16>
    %69 = vector.shape_cast %68 : vector<1x1x16x8xbf16> to vector<16x8xbf16>
    %c0_116 = arith.constant 0 : index
    %c0_117 = arith.constant 0 : index
    %70 = vector.load %arg6[%c0_116, %c0_117] : memref<8x8xf32, #tpu.memory_space<vmem>>, vector<8x8xf32>
    %cst_118 = arith.constant dense<0.000000e+00> : vector<8x8xf32>
    %71 = tpu.matmul %67, %69, %cst_118 {dimension_numbers = #tpu.dot_dimension_numbers<[1], [0], [0], [1], [0, 0, 1, 1], [], []>} : vector<8x16xbf16>, vector<16x8xbf16>, vector<8x8xf32> -> vector<8x8xf32>
    %72 = arith.addf %70, %71 : vector<8x8xf32>
    %c0_119 = arith.constant 0 : index
    %c0_120 = arith.constant 0 : index
    %73 = vector.load %arg6[%c0_119, %c0_120] : memref<8x8xf32, #tpu.memory_space<vmem>>, vector<8x8xf32>
    tpu.vector_store %arg6[%c0_119, %c0_120], %72 {strides = array<i32>} : memref<8x8xf32, #tpu.memory_space<vmem>>, vector<8x8xf32>,
    %c0_121 = arith.constant 0 : index
    %c0_122 = arith.constant 0 : index
    %c0_123 = arith.constant 0 : index
    %c16_124 = arith.constant 16 : index
    %c16_125 = arith.constant 16 : index
    %74 = vector.load %arg3[%c0_121, %c0_122, %c0_123, %c16_124, %c16_125] : memref<1x1x2x72x32xbf16, #tpu.memory_space<vmem>>, vector<1x1x1x8x16xbf16>
    %75 = vector.shape_cast %74 : vector<1x1x1x8x16xbf16> to vector<8x16xbf16>
    %c0_126 = arith.constant 0 : index
    %c4_127 = arith.constant 4 : index
    %c16_128 = arith.constant 16 : index
    %c0_129 = arith.constant 0 : index
    %76 = vector.load %arg4[%c0_126, %c4_127, %c16_128, %c0_129] : memref<1x16x32x8xbf16, #tpu.memory_space<vmem>>, vector<1x1x16x8xbf16>
    %77 = vector.shape_cast %76 : vector<1x1x16x8xbf16> to vector<16x8xbf16>
    %c0_130 = arith.constant 0 : index
    %c0_131 = arith.constant 0 : index
    %78 = vector.load %arg6[%c0_130, %c0_131] : memref<8x8xf32, #tpu.memory_space<vmem>>, vector<8x8xf32>
    %cst_132 = arith.constant dense<0.000000e+00> : vector<8x8xf32>
    %79 = tpu.matmul %75, %77, %cst_132 {dimension_numbers = #tpu.dot_dimension_numbers<[1], [0], [0], [1], [0, 0, 1, 1], [], []>} : vector<8x16xbf16>, vector<16x8xbf16>, vector<8x8xf32> -> vector<8x8xf32>
    %80 = arith.addf %78, %79 : vector<8x8xf32>
    %c0_133 = arith.constant 0 : index
    %c0_134 = arith.constant 0 : index
    %81 = vector.load %arg6[%c0_133, %c0_134] : memref<8x8xf32, #tpu.memory_space<vmem>>, vector<8x8xf32>
    tpu.vector_store %arg6[%c0_133, %c0_134], %80 {strides = array<i32>} : memref<8x8xf32, #tpu.memory_space<vmem>>, vector<8x8xf32>,
    %c0_135 = arith.constant 0 : index
    %c0_136 = arith.constant 0 : index
    %c1_137 = arith.constant 1 : index
    %c16_138 = arith.constant 16 : index
    %c0_139 = arith.constant 0 : index
    %82 = vector.load %arg3[%c0_135, %c0_136, %c1_137, %c16_138, %c0_139] : memref<1x1x2x72x32xbf16, #tpu.memory_space<vmem>>, vector<1x1x1x8x16xbf16>
    %83 = vector.shape_cast %82 : vector<1x1x1x8x16xbf16> to vector<8x16xbf16>
    %c0_140 = arith.constant 0 : index
    %c5 = arith.constant 5 : index
    %c0_141 = arith.constant 0 : index
    %c0_142 = arith.constant 0 : index
    %84 = vector.load %arg4[%c0_140, %c5, %c0_141, %c0_142] : memref<1x16x32x8xbf16, #tpu.memory_space<vmem>>, vector<1x1x16x8xbf16>
    %85 = vector.shape_cast %84 : vector<1x1x16x8xbf16> to vector<16x8xbf16>
    %c0_143 = arith.constant 0 : index
    %c0_144 = arith.constant 0 : index
    %86 = vector.load %arg6[%c0_143, %c0_144] : memref<8x8xf32, #tpu.memory_space<vmem>>, vector<8x8xf32>
    %cst_145 = arith.constant dense<0.000000e+00> : vector<8x8xf32>
    %87 = tpu.matmul %83, %85, %cst_145 {dimension_numbers = #tpu.dot_dimension_numbers<[1], [0], [0], [1], [0, 0, 1, 1], [], []>} : vector<8x16xbf16>, vector<16x8xbf16>, vector<8x8xf32> -> vector<8x8xf32>
    %88 = arith.addf %86, %87 : vector<8x8xf32>
    %c0_146 = arith.constant 0 : index
    %c0_147 = arith.constant 0 : index
    %89 = vector.load %arg6[%c0_146, %c0_147] : memref<8x8xf32, #tpu.memory_space<vmem>>, vector<8x8xf32>
    tpu.vector_store %arg6[%c0_146, %c0_147], %88 {strides = array<i32>} : memref<8x8xf32, #tpu.memory_space<vmem>>, vector<8x8xf32>,
    %c0_148 = arith.constant 0 : index
    %c0_149 = arith.constant 0 : index
    %c1_150 = arith.constant 1 : index
    %c16_151 = arith.constant 16 : index
    %c16_152 = arith.constant 16 : index
    %90 = vector.load %arg3[%c0_148, %c0_149, %c1_150, %c16_151, %c16_152] : memref<1x1x2x72x32xbf16, #tpu.memory_space<vmem>>, vector<1x1x1x8x16xbf16>
    %91 = vector.shape_cast %90 : vector<1x1x1x8x16xbf16> to vector<8x16xbf16>
    %c0_153 = arith.constant 0 : index
    %c5_154 = arith.constant 5 : index
    %c16_155 = arith.constant 16 : index
    %c0_156 = arith.constant 0 : index
    %92 = vector.load %arg4[%c0_153, %c5_154, %c16_155, %c0_156] : memref<1x16x32x8xbf16, #tpu.memory_space<vmem>>, vector<1x1x16x8xbf16>
    %93 = vector.shape_cast %92 : vector<1x1x16x8xbf16> to vector<16x8xbf16>
    %c0_157 = arith.constant 0 : index
    %c0_158 = arith.constant 0 : index
    %94 = vector.load %arg6[%c0_157, %c0_158] : memref<8x8xf32, #tpu.memory_space<vmem>>, vector<8x8xf32>
    %cst_159 = arith.constant dense<0.000000e+00> : vector<8x8xf32>
    %95 = tpu.matmul %91, %93, %cst_159 {dimension_numbers = #tpu.dot_dimension_numbers<[1], [0], [0], [1], [0, 0, 1, 1], [], []>} : vector<8x16xbf16>, vector<16x8xbf16>, vector<8x8xf32> -> vector<8x8xf32>
    %96 = arith.addf %94, %95 : vector<8x8xf32>
    %c0_160 = arith.constant 0 : index
    %c0_161 = arith.constant 0 : index
    %97 = vector.load %arg6[%c0_160, %c0_161] : memref<8x8xf32, #tpu.memory_space<vmem>>, vector<8x8xf32>
    tpu.vector_store %arg6[%c0_160, %c0_161], %96 {strides = array<i32>} : memref<8x8xf32, #tpu.memory_space<vmem>>, vector<8x8xf32>,
    %c0_162 = arith.constant 0 : index
    %c0_163 = arith.constant 0 : index
    %c0_164 = arith.constant 0 : index
    %c24 = arith.constant 24 : index
    %c0_165 = arith.constant 0 : index
    %98 = vector.load %arg3[%c0_162, %c0_163, %c0_164, %c24, %c0_165] : memref<1x1x2x72x32xbf16, #tpu.memory_space<vmem>>, vector<1x1x1x8x16xbf16>
    %99 = vector.shape_cast %98 : vector<1x1x1x8x16xbf16> to vector<8x16xbf16>
    %c0_166 = arith.constant 0 : index
    %c6 = arith.constant 6 : index
    %c0_167 = arith.constant 0 : index
    %c0_168 = arith.constant 0 : index
    %100 = vector.load %arg4[%c0_166, %c6, %c0_167, %c0_168] : memref<1x16x32x8xbf16, #tpu.memory_space<vmem>>, vector<1x1x16x8xbf16>
    %101 = vector.shape_cast %100 : vector<1x1x16x8xbf16> to vector<16x8xbf16>
    %c0_169 = arith.constant 0 : index
    %c0_170 = arith.constant 0 : index
    %102 = vector.load %arg6[%c0_169, %c0_170] : memref<8x8xf32, #tpu.memory_space<vmem>>, vector<8x8xf32>
    %cst_171 = arith.constant dense<0.000000e+00> : vector<8x8xf32>
    %103 = tpu.matmul %99, %101, %cst_171 {dimension_numbers = #tpu.dot_dimension_numbers<[1], [0], [0], [1], [0, 0, 1, 1], [], []>} : vector<8x16xbf16>, vector<16x8xbf16>, vector<8x8xf32> -> vector<8x8xf32>
    %104 = arith.addf %102, %103 : vector<8x8xf32>
    %c0_172 = arith.constant 0 : index
    %c0_173 = arith.constant 0 : index
    %105 = vector.load %arg6[%c0_172, %c0_173] : memref<8x8xf32, #tpu.memory_space<vmem>>, vector<8x8xf32>
    tpu.vector_store %arg6[%c0_172, %c0_173], %104 {strides = array<i32>} : memref<8x8xf32, #tpu.memory_space<vmem>>, vector<8x8xf32>,
    %c0_174 = arith.constant 0 : index
    %c0_175 = arith.constant 0 : index
    %c0_176 = arith.constant 0 : index
    %c24_177 = arith.constant 24 : index
    %c16_178 = arith.constant 16 : index
    %106 = vector.load %arg3[%c0_174, %c0_175, %c0_176, %c24_177, %c16_178] : memref<1x1x2x72x32xbf16, #tpu.memory_space<vmem>>, vector<1x1x1x8x16xbf16>
    %107 = vector.shape_cast %106 : vector<1x1x1x8x16xbf16> to vector<8x16xbf16>
    %c0_179 = arith.constant 0 : index
    %c6_180 = arith.constant 6 : index
    %c16_181 = arith.constant 16 : index
    %c0_182 = arith.constant 0 : index
    %108 = vector.load %arg4[%c0_179, %c6_180, %c16_181, %c0_182] : memref<1x16x32x8xbf16, #tpu.memory_space<vmem>>, vector<1x1x16x8xbf16>
    %109 = vector.shape_cast %108 : vector<1x1x16x8xbf16> to vector<16x8xbf16>
    %c0_183 = arith.constant 0 : index
    %c0_184 = arith.constant 0 : index
    %110 = vector.load %arg6[%c0_183, %c0_184] : memref<8x8xf32, #tpu.memory_space<vmem>>, vector<8x8xf32>
    %cst_185 = arith.constant dense<0.000000e+00> : vector<8x8xf32>
    %111 = tpu.matmul %107, %109, %cst_185 {dimension_numbers = #tpu.dot_dimension_numbers<[1], [0], [0], [1], [0, 0, 1, 1], [], []>} : vector<8x16xbf16>, vector<16x8xbf16>, vector<8x8xf32> -> vector<8x8xf32>
    %112 = arith.addf %110, %111 : vector<8x8xf32>
    %c0_186 = arith.constant 0 : index
    %c0_187 = arith.constant 0 : index
    %113 = vector.load %arg6[%c0_186, %c0_187] : memref<8x8xf32, #tpu.memory_space<vmem>>, vector<8x8xf32>
    tpu.vector_store %arg6[%c0_186, %c0_187], %112 {strides = array<i32>} : memref<8x8xf32, #tpu.memory_space<vmem>>, vector<8x8xf32>,
    %c0_188 = arith.constant 0 : index
    %c0_189 = arith.constant 0 : index
    %c1_190 = arith.constant 1 : index
    %c24_191 = arith.constant 24 : index
    %c0_192 = arith.constant 0 : index
    %114 = vector.load %arg3[%c0_188, %c0_189, %c1_190, %c24_191, %c0_192] : memref<1x1x2x72x32xbf16, #tpu.memory_space<vmem>>, vector<1x1x1x8x16xbf16>
    %115 = vector.shape_cast %114 : vector<1x1x1x8x16xbf16> to vector<8x16xbf16>
    %c0_193 = arith.constant 0 : index
    %c7 = arith.constant 7 : index
    %c0_194 = arith.constant 0 : index
    %c0_195 = arith.constant 0 : index
    %116 = vector.load %arg4[%c0_193, %c7, %c0_194, %c0_195] : memref<1x16x32x8xbf16, #tpu.memory_space<vmem>>, vector<1x1x16x8xbf16>
    %117 = vector.shape_cast %116 : vector<1x1x16x8xbf16> to vector<16x8xbf16>
    %c0_196 = arith.constant 0 : index
    %c0_197 = arith.constant 0 : index
    %118 = vector.load %arg6[%c0_196, %c0_197] : memref<8x8xf32, #tpu.memory_space<vmem>>, vector<8x8xf32>
    %cst_198 = arith.constant dense<0.000000e+00> : vector<8x8xf32>
    %119 = tpu.matmul %115, %117, %cst_198 {dimension_numbers = #tpu.dot_dimension_numbers<[1], [0], [0], [1], [0, 0, 1, 1], [], []>} : vector<8x16xbf16>, vector<16x8xbf16>, vector<8x8xf32> -> vector<8x8xf32>
    %120 = arith.addf %118, %119 : vector<8x8xf32>
    %c0_199 = arith.constant 0 : index
    %c0_200 = arith.constant 0 : index
    %121 = vector.load %arg6[%c0_199, %c0_200] : memref<8x8xf32, #tpu.memory_space<vmem>>, vector<8x8xf32>
    tpu.vector_store %arg6[%c0_199, %c0_200], %120 {strides = array<i32>} : memref<8x8xf32, #tpu.memory_space<vmem>>, vector<8x8xf32>,
    %c0_201 = arith.constant 0 : index
    %c0_202 = arith.constant 0 : index
    %c1_203 = arith.constant 1 : index
    %c24_204 = arith.constant 24 : index
    %c16_205 = arith.constant 16 : index
    %122 = vector.load %arg3[%c0_201, %c0_202, %c1_203, %c24_204, %c16_205] : memref<1x1x2x72x32xbf16, #tpu.memory_space<vmem>>, vector<1x1x1x8x16xbf16>
    %123 = vector.shape_cast %122 : vector<1x1x1x8x16xbf16> to vector<8x16xbf16>
    %c0_206 = arith.constant 0 : index
    %c7_207 = arith.constant 7 : index
    %c16_208 = arith.constant 16 : index
    %c0_209 = arith.constant 0 : index
    %124 = vector.load %arg4[%c0_206, %c7_207, %c16_208, %c0_209] : memref<1x16x32x8xbf16, #tpu.memory_space<vmem>>, vector<1x1x16x8xbf16>
    %125 = vector.shape_cast %124 : vector<1x1x16x8xbf16> to vector<16x8xbf16>
    %c0_210 = arith.constant 0 : index
    %c0_211 = arith.constant 0 : index
    %126 = vector.load %arg6[%c0_210, %c0_211] : memref<8x8xf32, #tpu.memory_space<vmem>>, vector<8x8xf32>
    %cst_212 = arith.constant dense<0.000000e+00> : vector<8x8xf32>
    %127 = tpu.matmul %123, %125, %cst_212 {dimension_numbers = #tpu.dot_dimension_numbers<[1], [0], [0], [1], [0, 0, 1, 1], [], []>} : vector<8x16xbf16>, vector<16x8xbf16>, vector<8x8xf32> -> vector<8x8xf32>
    %128 = arith.addf %126, %127 : vector<8x8xf32>
    %c0_213 = arith.constant 0 : index
    %c0_214 = arith.constant 0 : index
    %129 = vector.load %arg6[%c0_213, %c0_214] : memref<8x8xf32, #tpu.memory_space<vmem>>, vector<8x8xf32>
    tpu.vector_store %arg6[%c0_213, %c0_214], %128 {strides = array<i32>} : memref<8x8xf32, #tpu.memory_space<vmem>>, vector<8x8xf32>,
    %c0_215 = arith.constant 0 : index
    %c0_216 = arith.constant 0 : index
    %c0_217 = arith.constant 0 : index
    %c32 = arith.constant 32 : index
    %c0_218 = arith.constant 0 : index
    %130 = vector.load %arg3[%c0_215, %c0_216, %c0_217, %c32, %c0_218] : memref<1x1x2x72x32xbf16, #tpu.memory_space<vmem>>, vector<1x1x1x8x16xbf16>
    %131 = vector.shape_cast %130 : vector<1x1x1x8x16xbf16> to vector<8x16xbf16>
    %c0_219 = arith.constant 0 : index
    %c8_220 = arith.constant 8 : index
    %c0_221 = arith.constant 0 : index
    %c0_222 = arith.constant 0 : index
    %132 = vector.load %arg4[%c0_219, %c8_220, %c0_221, %c0_222] : memref<1x16x32x8xbf16, #tpu.memory_space<vmem>>, vector<1x1x16x8xbf16>
    %133 = vector.shape_cast %132 : vector<1x1x16x8xbf16> to vector<16x8xbf16>
    %c0_223 = arith.constant 0 : index
    %c0_224 = arith.constant 0 : index
    %134 = vector.load %arg6[%c0_223, %c0_224] : memref<8x8xf32, #tpu.memory_space<vmem>>, vector<8x8xf32>
    %cst_225 = arith.constant dense<0.000000e+00> : vector<8x8xf32>
    %135 = tpu.matmul %131, %133, %cst_225 {dimension_numbers = #tpu.dot_dimension_numbers<[1], [0], [0], [1], [0, 0, 1, 1], [], []>} : vector<8x16xbf16>, vector<16x8xbf16>, vector<8x8xf32> -> vector<8x8xf32>
    %136 = arith.addf %134, %135 : vector<8x8xf32>
    %c0_226 = arith.constant 0 : index
    %c0_227 = arith.constant 0 : index
    %137 = vector.load %arg6[%c0_226, %c0_227] : memref<8x8xf32, #tpu.memory_space<vmem>>, vector<8x8xf32>
    tpu.vector_store %arg6[%c0_226, %c0_227], %136 {strides = array<i32>} : memref<8x8xf32, #tpu.memory_space<vmem>>, vector<8x8xf32>,
    %c0_228 = arith.constant 0 : index
    %c0_229 = arith.constant 0 : index
    %c0_230 = arith.constant 0 : index
    %c32_231 = arith.constant 32 : index
    %c16_232 = arith.constant 16 : index
    %138 = vector.load %arg3[%c0_228, %c0_229, %c0_230, %c32_231, %c16_232] : memref<1x1x2x72x32xbf16, #tpu.memory_space<vmem>>, vector<1x1x1x8x16xbf16>
    %139 = vector.shape_cast %138 : vector<1x1x1x8x16xbf16> to vector<8x16xbf16>
    %c0_233 = arith.constant 0 : index
    %c8_234 = arith.constant 8 : index
    %c16_235 = arith.constant 16 : index
    %c0_236 = arith.constant 0 : index
    %140 = vector.load %arg4[%c0_233, %c8_234, %c16_235, %c0_236] : memref<1x16x32x8xbf16, #tpu.memory_space<vmem>>, vector<1x1x16x8xbf16>
    %141 = vector.shape_cast %140 : vector<1x1x16x8xbf16> to vector<16x8xbf16>
    %c0_237 = arith.constant 0 : index
    %c0_238 = arith.constant 0 : index
    %142 = vector.load %arg6[%c0_237, %c0_238] : memref<8x8xf32, #tpu.memory_space<vmem>>, vector<8x8xf32>
    %cst_239 = arith.constant dense<0.000000e+00> : vector<8x8xf32>
    %143 = tpu.matmul %139, %141, %cst_239 {dimension_numbers = #tpu.dot_dimension_numbers<[1], [0], [0], [1], [0, 0, 1, 1], [], []>} : vector<8x16xbf16>, vector<16x8xbf16>, vector<8x8xf32> -> vector<8x8xf32>
    %144 = arith.addf %142, %143 : vector<8x8xf32>
    %c0_240 = arith.constant 0 : index
    %c0_241 = arith.constant 0 : index
    %145 = vector.load %arg6[%c0_240, %c0_241] : memref<8x8xf32, #tpu.memory_space<vmem>>, vector<8x8xf32>
    tpu.vector_store %arg6[%c0_240, %c0_241], %144 {strides = array<i32>} : memref<8x8xf32, #tpu.memory_space<vmem>>, vector<8x8xf32>,
    %c0_242 = arith.constant 0 : index
    %c0_243 = arith.constant 0 : index
    %c1_244 = arith.constant 1 : index
    %c32_245 = arith.constant 32 : index
    %c0_246 = arith.constant 0 : index
    %146 = vector.load %arg3[%c0_242, %c0_243, %c1_244, %c32_245, %c0_246] : memref<1x1x2x72x32xbf16, #tpu.memory_space<vmem>>, vector<1x1x1x8x16xbf16>
    %147 = vector.shape_cast %146 : vector<1x1x1x8x16xbf16> to vector<8x16xbf16>
    %c0_247 = arith.constant 0 : index
    %c9 = arith.constant 9 : index
    %c0_248 = arith.constant 0 : index
    %c0_249 = arith.constant 0 : index
    %148 = vector.load %arg4[%c0_247, %c9, %c0_248, %c0_249] : memref<1x16x32x8xbf16, #tpu.memory_space<vmem>>, vector<1x1x16x8xbf16>
    %149 = vector.shape_cast %148 : vector<1x1x16x8xbf16> to vector<16x8xbf16>
    %c0_250 = arith.constant 0 : index
    %c0_251 = arith.constant 0 : index
    %150 = vector.load %arg6[%c0_250, %c0_251] : memref<8x8xf32, #tpu.memory_space<vmem>>, vector<8x8xf32>
    %cst_252 = arith.constant dense<0.000000e+00> : vector<8x8xf32>
    %151 = tpu.matmul %147, %149, %cst_252 {dimension_numbers = #tpu.dot_dimension_numbers<[1], [0], [0], [1], [0, 0, 1, 1], [], []>} : vector<8x16xbf16>, vector<16x8xbf16>, vector<8x8xf32> -> vector<8x8xf32>
    %152 = arith.addf %150, %151 : vector<8x8xf32>
    %c0_253 = arith.constant 0 : index
    %c0_254 = arith.constant 0 : index
    %153 = vector.load %arg6[%c0_253, %c0_254] : memref<8x8xf32, #tpu.memory_space<vmem>>, vector<8x8xf32>
    tpu.vector_store %arg6[%c0_253, %c0_254], %152 {strides = array<i32>} : memref<8x8xf32, #tpu.memory_space<vmem>>, vector<8x8xf32>,
    %c0_255 = arith.constant 0 : index
    %c0_256 = arith.constant 0 : index
    %c1_257 = arith.constant 1 : index
    %c32_258 = arith.constant 32 : index
    %c16_259 = arith.constant 16 : index
    %154 = vector.load %arg3[%c0_255, %c0_256, %c1_257, %c32_258, %c16_259] : memref<1x1x2x72x32xbf16, #tpu.memory_space<vmem>>, vector<1x1x1x8x16xbf16>
    %155 = vector.shape_cast %154 : vector<1x1x1x8x16xbf16> to vector<8x16xbf16>
    %c0_260 = arith.constant 0 : index
    %c9_261 = arith.constant 9 : index
    %c16_262 = arith.constant 16 : index
    %c0_263 = arith.constant 0 : index
    %156 = vector.load %arg4[%c0_260, %c9_261, %c16_262, %c0_263] : memref<1x16x32x8xbf16, #tpu.memory_space<vmem>>, vector<1x1x16x8xbf16>
    %157 = vector.shape_cast %156 : vector<1x1x16x8xbf16> to vector<16x8xbf16>
    %c0_264 = arith.constant 0 : index
    %c0_265 = arith.constant 0 : index
    %158 = vector.load %arg6[%c0_264, %c0_265] : memref<8x8xf32, #tpu.memory_space<vmem>>, vector<8x8xf32>
    %cst_266 = arith.constant dense<0.000000e+00> : vector<8x8xf32>
    %159 = tpu.matmul %155, %157, %cst_266 {dimension_numbers = #tpu.dot_dimension_numbers<[1], [0], [0], [1], [0, 0, 1, 1], [], []>} : vector<8x16xbf16>, vector<16x8xbf16>, vector<8x8xf32> -> vector<8x8xf32>
    %160 = arith.addf %158, %159 : vector<8x8xf32>
    %c0_267 = arith.constant 0 : index
    %c0_268 = arith.constant 0 : index
    %161 = vector.load %arg6[%c0_267, %c0_268] : memref<8x8xf32, #tpu.memory_space<vmem>>, vector<8x8xf32>
    tpu.vector_store %arg6[%c0_267, %c0_268], %160 {strides = array<i32>} : memref<8x8xf32, #tpu.memory_space<vmem>>, vector<8x8xf32>,
    %c0_269 = arith.constant 0 : index
    %c0_270 = arith.constant 0 : index
    %c0_271 = arith.constant 0 : index
    %c40 = arith.constant 40 : index
    %c0_272 = arith.constant 0 : index
    %162 = vector.load %arg3[%c0_269, %c0_270, %c0_271, %c40, %c0_272] : memref<1x1x2x72x32xbf16, #tpu.memory_space<vmem>>, vector<1x1x1x8x16xbf16>
    %163 = vector.shape_cast %162 : vector<1x1x1x8x16xbf16> to vector<8x16xbf16>
    %c0_273 = arith.constant 0 : index
    %c10 = arith.constant 10 : index
    %c0_274 = arith.constant 0 : index
    %c0_275 = arith.constant 0 : index
    %164 = vector.load %arg4[%c0_273, %c10, %c0_274, %c0_275] : memref<1x16x32x8xbf16, #tpu.memory_space<vmem>>, vector<1x1x16x8xbf16>
    %165 = vector.shape_cast %164 : vector<1x1x16x8xbf16> to vector<16x8xbf16>
    %c0_276 = arith.constant 0 : index
    %c0_277 = arith.constant 0 : index
    %166 = vector.load %arg6[%c0_276, %c0_277] : memref<8x8xf32, #tpu.memory_space<vmem>>, vector<8x8xf32>
    %cst_278 = arith.constant dense<0.000000e+00> : vector<8x8xf32>
    %167 = tpu.matmul %163, %165, %cst_278 {dimension_numbers = #tpu.dot_dimension_numbers<[1], [0], [0], [1], [0, 0, 1, 1], [], []>} : vector<8x16xbf16>, vector<16x8xbf16>, vector<8x8xf32> -> vector<8x8xf32>
    %168 = arith.addf %166, %167 : vector<8x8xf32>
    %c0_279 = arith.constant 0 : index
    %c0_280 = arith.constant 0 : index
    %169 = vector.load %arg6[%c0_279, %c0_280] : memref<8x8xf32, #tpu.memory_space<vmem>>, vector<8x8xf32>
    tpu.vector_store %arg6[%c0_279, %c0_280], %168 {strides = array<i32>} : memref<8x8xf32, #tpu.memory_space<vmem>>, vector<8x8xf32>,
    %c0_281 = arith.constant 0 : index
    %c0_282 = arith.constant 0 : index
    %c0_283 = arith.constant 0 : index
    %c40_284 = arith.constant 40 : index
    %c16_285 = arith.constant 16 : index
    %170 = vector.load %arg3[%c0_281, %c0_282, %c0_283, %c40_284, %c16_285] : memref<1x1x2x72x32xbf16, #tpu.memory_space<vmem>>, vector<1x1x1x8x16xbf16>
    %171 = vector.shape_cast %170 : vector<1x1x1x8x16xbf16> to vector<8x16xbf16>
    %c0_286 = arith.constant 0 : index
    %c10_287 = arith.constant 10 : index
    %c16_288 = arith.constant 16 : index
    %c0_289 = arith.constant 0 : index
    %172 = vector.load %arg4[%c0_286, %c10_287, %c16_288, %c0_289] : memref<1x16x32x8xbf16, #tpu.memory_space<vmem>>, vector<1x1x16x8xbf16>
    %173 = vector.shape_cast %172 : vector<1x1x16x8xbf16> to vector<16x8xbf16>
    %c0_290 = arith.constant 0 : index
    %c0_291 = arith.constant 0 : index
    %174 = vector.load %arg6[%c0_290, %c0_291] : memref<8x8xf32, #tpu.memory_space<vmem>>, vector<8x8xf32>
    %cst_292 = arith.constant dense<0.000000e+00> : vector<8x8xf32>
    %175 = tpu.matmul %171, %173, %cst_292 {dimension_numbers = #tpu.dot_dimension_numbers<[1], [0], [0], [1], [0, 0, 1, 1], [], []>} : vector<8x16xbf16>, vector<16x8xbf16>, vector<8x8xf32> -> vector<8x8xf32>
    %176 = arith.addf %174, %175 : vector<8x8xf32>
    %c0_293 = arith.constant 0 : index
    %c0_294 = arith.constant 0 : index
    %177 = vector.load %arg6[%c0_293, %c0_294] : memref<8x8xf32, #tpu.memory_space<vmem>>, vector<8x8xf32>
    tpu.vector_store %arg6[%c0_293, %c0_294], %176 {strides = array<i32>} : memref<8x8xf32, #tpu.memory_space<vmem>>, vector<8x8xf32>,
    %c0_295 = arith.constant 0 : index
    %c0_296 = arith.constant 0 : index
    %c1_297 = arith.constant 1 : index
    %c40_298 = arith.constant 40 : index
    %c0_299 = arith.constant 0 : index
    %178 = vector.load %arg3[%c0_295, %c0_296, %c1_297, %c40_298, %c0_299] : memref<1x1x2x72x32xbf16, #tpu.memory_space<vmem>>, vector<1x1x1x8x16xbf16>
    %179 = vector.shape_cast %178 : vector<1x1x1x8x16xbf16> to vector<8x16xbf16>
    %c0_300 = arith.constant 0 : index
    %c11 = arith.constant 11 : index
    %c0_301 = arith.constant 0 : index
    %c0_302 = arith.constant 0 : index
    %180 = vector.load %arg4[%c0_300, %c11, %c0_301, %c0_302] : memref<1x16x32x8xbf16, #tpu.memory_space<vmem>>, vector<1x1x16x8xbf16>
    %181 = vector.shape_cast %180 : vector<1x1x16x8xbf16> to vector<16x8xbf16>
    %c0_303 = arith.constant 0 : index
    %c0_304 = arith.constant 0 : index
    %182 = vector.load %arg6[%c0_303, %c0_304] : memref<8x8xf32, #tpu.memory_space<vmem>>, vector<8x8xf32>
    %cst_305 = arith.constant dense<0.000000e+00> : vector<8x8xf32>
    %183 = tpu.matmul %179, %181, %cst_305 {dimension_numbers = #tpu.dot_dimension_numbers<[1], [0], [0], [1], [0, 0, 1, 1], [], []>} : vector<8x16xbf16>, vector<16x8xbf16>, vector<8x8xf32> -> vector<8x8xf32>
    %184 = arith.addf %182, %183 : vector<8x8xf32>
    %c0_306 = arith.constant 0 : index
    %c0_307 = arith.constant 0 : index
    %185 = vector.load %arg6[%c0_306, %c0_307] : memref<8x8xf32, #tpu.memory_space<vmem>>, vector<8x8xf32>
    tpu.vector_store %arg6[%c0_306, %c0_307], %184 {strides = array<i32>} : memref<8x8xf32, #tpu.memory_space<vmem>>, vector<8x8xf32>,
    %c0_308 = arith.constant 0 : index
    %c0_309 = arith.constant 0 : index
    %c1_310 = arith.constant 1 : index
    %c40_311 = arith.constant 40 : index
    %c16_312 = arith.constant 16 : index
    %186 = vector.load %arg3[%c0_308, %c0_309, %c1_310, %c40_311, %c16_312] : memref<1x1x2x72x32xbf16, #tpu.memory_space<vmem>>, vector<1x1x1x8x16xbf16>
    %187 = vector.shape_cast %186 : vector<1x1x1x8x16xbf16> to vector<8x16xbf16>
    %c0_313 = arith.constant 0 : index
    %c11_314 = arith.constant 11 : index
    %c16_315 = arith.constant 16 : index
    %c0_316 = arith.constant 0 : index
    %188 = vector.load %arg4[%c0_313, %c11_314, %c16_315, %c0_316] : memref<1x16x32x8xbf16, #tpu.memory_space<vmem>>, vector<1x1x16x8xbf16>
    %189 = vector.shape_cast %188 : vector<1x1x16x8xbf16> to vector<16x8xbf16>
    %c0_317 = arith.constant 0 : index
    %c0_318 = arith.constant 0 : index
    %190 = vector.load %arg6[%c0_317, %c0_318] : memref<8x8xf32, #tpu.memory_space<vmem>>, vector<8x8xf32>
    %cst_319 = arith.constant dense<0.000000e+00> : vector<8x8xf32>
    %191 = tpu.matmul %187, %189, %cst_319 {dimension_numbers = #tpu.dot_dimension_numbers<[1], [0], [0], [1], [0, 0, 1, 1], [], []>} : vector<8x16xbf16>, vector<16x8xbf16>, vector<8x8xf32> -> vector<8x8xf32>
    %192 = arith.addf %190, %191 : vector<8x8xf32>
    %c0_320 = arith.constant 0 : index
    %c0_321 = arith.constant 0 : index
    %193 = vector.load %arg6[%c0_320, %c0_321] : memref<8x8xf32, #tpu.memory_space<vmem>>, vector<8x8xf32>
    tpu.vector_store %arg6[%c0_320, %c0_321], %192 {strides = array<i32>} : memref<8x8xf32, #tpu.memory_space<vmem>>, vector<8x8xf32>,
    %c0_322 = arith.constant 0 : index
    %c0_323 = arith.constant 0 : index
    %c0_324 = arith.constant 0 : index
    %c48 = arith.constant 48 : index
    %c0_325 = arith.constant 0 : index
    %194 = vector.load %arg3[%c0_322, %c0_323, %c0_324, %c48, %c0_325] : memref<1x1x2x72x32xbf16, #tpu.memory_space<vmem>>, vector<1x1x1x8x16xbf16>
    %195 = vector.shape_cast %194 : vector<1x1x1x8x16xbf16> to vector<8x16xbf16>
    %c0_326 = arith.constant 0 : index
    %c12 = arith.constant 12 : index
    %c0_327 = arith.constant 0 : index
    %c0_328 = arith.constant 0 : index
    %196 = vector.load %arg4[%c0_326, %c12, %c0_327, %c0_328] : memref<1x16x32x8xbf16, #tpu.memory_space<vmem>>, vector<1x1x16x8xbf16>
    %197 = vector.shape_cast %196 : vector<1x1x16x8xbf16> to vector<16x8xbf16>
    %c0_329 = arith.constant 0 : index
    %c0_330 = arith.constant 0 : index
    %198 = vector.load %arg6[%c0_329, %c0_330] : memref<8x8xf32, #tpu.memory_space<vmem>>, vector<8x8xf32>
    %cst_331 = arith.constant dense<0.000000e+00> : vector<8x8xf32>
    %199 = tpu.matmul %195, %197, %cst_331 {dimension_numbers = #tpu.dot_dimension_numbers<[1], [0], [0], [1], [0, 0, 1, 1], [], []>} : vector<8x16xbf16>, vector<16x8xbf16>, vector<8x8xf32> -> vector<8x8xf32>
    %200 = arith.addf %198, %199 : vector<8x8xf32>
    %c0_332 = arith.constant 0 : index
    %c0_333 = arith.constant 0 : index
    %201 = vector.load %arg6[%c0_332, %c0_333] : memref<8x8xf32, #tpu.memory_space<vmem>>, vector<8x8xf32>
    tpu.vector_store %arg6[%c0_332, %c0_333], %200 {strides = array<i32>} : memref<8x8xf32, #tpu.memory_space<vmem>>, vector<8x8xf32>,
    %c0_334 = arith.constant 0 : index
    %c0_335 = arith.constant 0 : index
    %c0_336 = arith.constant 0 : index
    %c48_337 = arith.constant 48 : index
    %c16_338 = arith.constant 16 : index
    %202 = vector.load %arg3[%c0_334, %c0_335, %c0_336, %c48_337, %c16_338] : memref<1x1x2x72x32xbf16, #tpu.memory_space<vmem>>, vector<1x1x1x8x16xbf16>
    %203 = vector.shape_cast %202 : vector<1x1x1x8x16xbf16> to vector<8x16xbf16>
    %c0_339 = arith.constant 0 : index
    %c12_340 = arith.constant 12 : index
    %c16_341 = arith.constant 16 : index
    %c0_342 = arith.constant 0 : index
    %204 = vector.load %arg4[%c0_339, %c12_340, %c16_341, %c0_342] : memref<1x16x32x8xbf16, #tpu.memory_space<vmem>>, vector<1x1x16x8xbf16>
    %205 = vector.shape_cast %204 : vector<1x1x16x8xbf16> to vector<16x8xbf16>
    %c0_343 = arith.constant 0 : index
    %c0_344 = arith.constant 0 : index
    %206 = vector.load %arg6[%c0_343, %c0_344] : memref<8x8xf32, #tpu.memory_space<vmem>>, vector<8x8xf32>
    %cst_345 = arith.constant dense<0.000000e+00> : vector<8x8xf32>
    %207 = tpu.matmul %203, %205, %cst_345 {dimension_numbers = #tpu.dot_dimension_numbers<[1], [0], [0], [1], [0, 0, 1, 1], [], []>} : vector<8x16xbf16>, vector<16x8xbf16>, vector<8x8xf32> -> vector<8x8xf32>
    %208 = arith.addf %206, %207 : vector<8x8xf32>
    %c0_346 = arith.constant 0 : index
    %c0_347 = arith.constant 0 : index
    %209 = vector.load %arg6[%c0_346, %c0_347] : memref<8x8xf32, #tpu.memory_space<vmem>>, vector<8x8xf32>
    tpu.vector_store %arg6[%c0_346, %c0_347], %208 {strides = array<i32>} : memref<8x8xf32, #tpu.memory_space<vmem>>, vector<8x8xf32>,
    %c0_348 = arith.constant 0 : index
    %c0_349 = arith.constant 0 : index
    %c1_350 = arith.constant 1 : index
    %c48_351 = arith.constant 48 : index
    %c0_352 = arith.constant 0 : index
    %210 = vector.load %arg3[%c0_348, %c0_349, %c1_350, %c48_351, %c0_352] : memref<1x1x2x72x32xbf16, #tpu.memory_space<vmem>>, vector<1x1x1x8x16xbf16>
    %211 = vector.shape_cast %210 : vector<1x1x1x8x16xbf16> to vector<8x16xbf16>
    %c0_353 = arith.constant 0 : index
    %c13 = arith.constant 13 : index
    %c0_354 = arith.constant 0 : index
    %c0_355 = arith.constant 0 : index
    %212 = vector.load %arg4[%c0_353, %c13, %c0_354, %c0_355] : memref<1x16x32x8xbf16, #tpu.memory_space<vmem>>, vector<1x1x16x8xbf16>
    %213 = vector.shape_cast %212 : vector<1x1x16x8xbf16> to vector<16x8xbf16>
    %c0_356 = arith.constant 0 : index
    %c0_357 = arith.constant 0 : index
    %214 = vector.load %arg6[%c0_356, %c0_357] : memref<8x8xf32, #tpu.memory_space<vmem>>, vector<8x8xf32>
    %cst_358 = arith.constant dense<0.000000e+00> : vector<8x8xf32>
    %215 = tpu.matmul %211, %213, %cst_358 {dimension_numbers = #tpu.dot_dimension_numbers<[1], [0], [0], [1], [0, 0, 1, 1], [], []>} : vector<8x16xbf16>, vector<16x8xbf16>, vector<8x8xf32> -> vector<8x8xf32>
    %216 = arith.addf %214, %215 : vector<8x8xf32>
    %c0_359 = arith.constant 0 : index
    %c0_360 = arith.constant 0 : index
    %217 = vector.load %arg6[%c0_359, %c0_360] : memref<8x8xf32, #tpu.memory_space<vmem>>, vector<8x8xf32>
    tpu.vector_store %arg6[%c0_359, %c0_360], %216 {strides = array<i32>} : memref<8x8xf32, #tpu.memory_space<vmem>>, vector<8x8xf32>,
    %c0_361 = arith.constant 0 : index
    %c0_362 = arith.constant 0 : index
    %c1_363 = arith.constant 1 : index
    %c48_364 = arith.constant 48 : index
    %c16_365 = arith.constant 16 : index
    %218 = vector.load %arg3[%c0_361, %c0_362, %c1_363, %c48_364, %c16_365] : memref<1x1x2x72x32xbf16, #tpu.memory_space<vmem>>, vector<1x1x1x8x16xbf16>
    %219 = vector.shape_cast %218 : vector<1x1x1x8x16xbf16> to vector<8x16xbf16>
    %c0_366 = arith.constant 0 : index
    %c13_367 = arith.constant 13 : index
    %c16_368 = arith.constant 16 : index
    %c0_369 = arith.constant 0 : index
    %220 = vector.load %arg4[%c0_366, %c13_367, %c16_368, %c0_369] : memref<1x16x32x8xbf16, #tpu.memory_space<vmem>>, vector<1x1x16x8xbf16>
    %221 = vector.shape_cast %220 : vector<1x1x16x8xbf16> to vector<16x8xbf16>
    %c0_370 = arith.constant 0 : index
    %c0_371 = arith.constant 0 : index
    %222 = vector.load %arg6[%c0_370, %c0_371] : memref<8x8xf32, #tpu.memory_space<vmem>>, vector<8x8xf32>
    %cst_372 = arith.constant dense<0.000000e+00> : vector<8x8xf32>
    %223 = tpu.matmul %219, %221, %cst_372 {dimension_numbers = #tpu.dot_dimension_numbers<[1], [0], [0], [1], [0, 0, 1, 1], [], []>} : vector<8x16xbf16>, vector<16x8xbf16>, vector<8x8xf32> -> vector<8x8xf32>
    %224 = arith.addf %222, %223 : vector<8x8xf32>
    %c0_373 = arith.constant 0 : index
    %c0_374 = arith.constant 0 : index
    %225 = vector.load %arg6[%c0_373, %c0_374] : memref<8x8xf32, #tpu.memory_space<vmem>>, vector<8x8xf32>
    tpu.vector_store %arg6[%c0_373, %c0_374], %224 {strides = array<i32>} : memref<8x8xf32, #tpu.memory_space<vmem>>, vector<8x8xf32>,
    %c0_375 = arith.constant 0 : index
    %c0_376 = arith.constant 0 : index
    %c0_377 = arith.constant 0 : index
    %c56 = arith.constant 56 : index
    %c0_378 = arith.constant 0 : index
    %226 = vector.load %arg3[%c0_375, %c0_376, %c0_377, %c56, %c0_378] : memref<1x1x2x72x32xbf16, #tpu.memory_space<vmem>>, vector<1x1x1x8x16xbf16>
    %227 = vector.shape_cast %226 : vector<1x1x1x8x16xbf16> to vector<8x16xbf16>
    %c0_379 = arith.constant 0 : index
    %c14 = arith.constant 14 : index
    %c0_380 = arith.constant 0 : index
    %c0_381 = arith.constant 0 : index
    %228 = vector.load %arg4[%c0_379, %c14, %c0_380, %c0_381] : memref<1x16x32x8xbf16, #tpu.memory_space<vmem>>, vector<1x1x16x8xbf16>
    %229 = vector.shape_cast %228 : vector<1x1x16x8xbf16> to vector<16x8xbf16>
    %c0_382 = arith.constant 0 : index
    %c0_383 = arith.constant 0 : index
    %230 = vector.load %arg6[%c0_382, %c0_383] : memref<8x8xf32, #tpu.memory_space<vmem>>, vector<8x8xf32>
    %cst_384 = arith.constant dense<0.000000e+00> : vector<8x8xf32>
    %231 = tpu.matmul %227, %229, %cst_384 {dimension_numbers = #tpu.dot_dimension_numbers<[1], [0], [0], [1], [0, 0, 1, 1], [], []>} : vector<8x16xbf16>, vector<16x8xbf16>, vector<8x8xf32> -> vector<8x8xf32>
    %232 = arith.addf %230, %231 : vector<8x8xf32>
    %c0_385 = arith.constant 0 : index
    %c0_386 = arith.constant 0 : index
    %233 = vector.load %arg6[%c0_385, %c0_386] : memref<8x8xf32, #tpu.memory_space<vmem>>, vector<8x8xf32>
    tpu.vector_store %arg6[%c0_385, %c0_386], %232 {strides = array<i32>} : memref<8x8xf32, #tpu.memory_space<vmem>>, vector<8x8xf32>,
    %c0_387 = arith.constant 0 : index
    %c0_388 = arith.constant 0 : index
    %c0_389 = arith.constant 0 : index
    %c56_390 = arith.constant 56 : index
    %c16_391 = arith.constant 16 : index
    %234 = vector.load %arg3[%c0_387, %c0_388, %c0_389, %c56_390, %c16_391] : memref<1x1x2x72x32xbf16, #tpu.memory_space<vmem>>, vector<1x1x1x8x16xbf16>
    %235 = vector.shape_cast %234 : vector<1x1x1x8x16xbf16> to vector<8x16xbf16>
    %c0_392 = arith.constant 0 : index
    %c14_393 = arith.constant 14 : index
    %c16_394 = arith.constant 16 : index
    %c0_395 = arith.constant 0 : index
    %236 = vector.load %arg4[%c0_392, %c14_393, %c16_394, %c0_395] : memref<1x16x32x8xbf16, #tpu.memory_space<vmem>>, vector<1x1x16x8xbf16>
    %237 = vector.shape_cast %236 : vector<1x1x16x8xbf16> to vector<16x8xbf16>
    %c0_396 = arith.constant 0 : index
    %c0_397 = arith.constant 0 : index
    %238 = vector.load %arg6[%c0_396, %c0_397] : memref<8x8xf32, #tpu.memory_space<vmem>>, vector<8x8xf32>
    %cst_398 = arith.constant dense<0.000000e+00> : vector<8x8xf32>
    %239 = tpu.matmul %235, %237, %cst_398 {dimension_numbers = #tpu.dot_dimension_numbers<[1], [0], [0], [1], [0, 0, 1, 1], [], []>} : vector<8x16xbf16>, vector<16x8xbf16>, vector<8x8xf32> -> vector<8x8xf32>
    %240 = arith.addf %238, %239 : vector<8x8xf32>
    %c0_399 = arith.constant 0 : index
    %c0_400 = arith.constant 0 : index
    %241 = vector.load %arg6[%c0_399, %c0_400] : memref<8x8xf32, #tpu.memory_space<vmem>>, vector<8x8xf32>
    tpu.vector_store %arg6[%c0_399, %c0_400], %240 {strides = array<i32>} : memref<8x8xf32, #tpu.memory_space<vmem>>, vector<8x8xf32>,
    %c0_401 = arith.constant 0 : index
    %c0_402 = arith.constant 0 : index
    %c1_403 = arith.constant 1 : index
    %c56_404 = arith.constant 56 : index
    %c0_405 = arith.constant 0 : index
    %242 = vector.load %arg3[%c0_401, %c0_402, %c1_403, %c56_404, %c0_405] : memref<1x1x2x72x32xbf16, #tpu.memory_space<vmem>>, vector<1x1x1x8x16xbf16>
    %243 = vector.shape_cast %242 : vector<1x1x1x8x16xbf16> to vector<8x16xbf16>
    %c0_406 = arith.constant 0 : index
    %c15 = arith.constant 15 : index
    %c0_407 = arith.constant 0 : index
    %c0_408 = arith.constant 0 : index
    %244 = vector.load %arg4[%c0_406, %c15, %c0_407, %c0_408] : memref<1x16x32x8xbf16, #tpu.memory_space<vmem>>, vector<1x1x16x8xbf16>
    %245 = vector.shape_cast %244 : vector<1x1x16x8xbf16> to vector<16x8xbf16>
    %c0_409 = arith.constant 0 : index
    %c0_410 = arith.constant 0 : index
    %246 = vector.load %arg6[%c0_409, %c0_410] : memref<8x8xf32, #tpu.memory_space<vmem>>, vector<8x8xf32>
    %cst_411 = arith.constant dense<0.000000e+00> : vector<8x8xf32>
    %247 = tpu.matmul %243, %245, %cst_411 {dimension_numbers = #tpu.dot_dimension_numbers<[1], [0], [0], [1], [0, 0, 1, 1], [], []>} : vector<8x16xbf16>, vector<16x8xbf16>, vector<8x8xf32> -> vector<8x8xf32>
    %248 = arith.addf %246, %247 : vector<8x8xf32>
    %c0_412 = arith.constant 0 : index
    %c0_413 = arith.constant 0 : index
    %249 = vector.load %arg6[%c0_412, %c0_413] : memref<8x8xf32, #tpu.memory_space<vmem>>, vector<8x8xf32>
    tpu.vector_store %arg6[%c0_412, %c0_413], %248 {strides = array<i32>} : memref<8x8xf32, #tpu.memory_space<vmem>>, vector<8x8xf32>,
    %c0_414 = arith.constant 0 : index
    %c0_415 = arith.constant 0 : index
    %c1_416 = arith.constant 1 : index
    %c56_417 = arith.constant 56 : index
    %c16_418 = arith.constant 16 : index
    %250 = vector.load %arg3[%c0_414, %c0_415, %c1_416, %c56_417, %c16_418] : memref<1x1x2x72x32xbf16, #tpu.memory_space<vmem>>, vector<1x1x1x8x16xbf16>
    %251 = vector.shape_cast %250 : vector<1x1x1x8x16xbf16> to vector<8x16xbf16>
    %c0_419 = arith.constant 0 : index
    %c15_420 = arith.constant 15 : index
    %c16_421 = arith.constant 16 : index
    %c0_422 = arith.constant 0 : index
    %252 = vector.load %arg4[%c0_419, %c15_420, %c16_421, %c0_422] : memref<1x16x32x8xbf16, #tpu.memory_space<vmem>>, vector<1x1x16x8xbf16>
    %253 = vector.shape_cast %252 : vector<1x1x16x8xbf16> to vector<16x8xbf16>
    %c0_423 = arith.constant 0 : index
    %c0_424 = arith.constant 0 : index
    %254 = vector.load %arg6[%c0_423, %c0_424] : memref<8x8xf32, #tpu.memory_space<vmem>>, vector<8x8xf32>
    %cst_425 = arith.constant dense<0.000000e+00> : vector<8x8xf32>
    %255 = tpu.matmul %251, %253, %cst_425 {dimension_numbers = #tpu.dot_dimension_numbers<[1], [0], [0], [1], [0, 0, 1, 1], [], []>} : vector<8x16xbf16>, vector<16x8xbf16>, vector<8x8xf32> -> vector<8x8xf32>
    %256 = arith.addf %254, %255 : vector<8x8xf32>
    %c0_426 = arith.constant 0 : index
    %c0_427 = arith.constant 0 : index
    %257 = vector.load %arg6[%c0_426, %c0_427] : memref<8x8xf32, #tpu.memory_space<vmem>>, vector<8x8xf32>
    tpu.vector_store %arg6[%c0_426, %c0_427], %256 {strides = array<i32>} : memref<8x8xf32, #tpu.memory_space<vmem>>, vector<8x8xf32>,
    %c0_428 = arith.constant 0 : index
    %c0_429 = arith.constant 0 : index
    %258 = vector.load %arg6[%c0_428, %c0_429] : memref<8x8xf32, #tpu.memory_space<vmem>>, vector<8x8xf32>
    %cst_430 = arith.constant 0.000000e+00 : f32
    %259 = vector.broadcast %cst_430 : f32 to vector<8x8xf32>
    %260 = arith.cmpf oge, %258, %259 : vector<8x8xf32>
    %cst_431 = arith.constant 2.000000e-01 : f32
    %261 = vector.broadcast %cst_431 : f32 to vector<8x8xf32>
    %262 = arith.mulf %258, %261 : vector<8x8xf32>
    %263 = arith.select %260, %258, %262 : vector<8x8xi1>, vector<8x8xf32>
    %c0_432 = arith.constant 0 : index
    %c0_433 = arith.constant 0 : index
    %c0_434 = arith.constant 0 : index
    %c0_435 = arith.constant 0 : index
    %264 = vector.load %arg5[%c0_432, %c0_433, %c0_434, %c0_435] : memref<1x1x16x8xf32, #tpu.memory_space<vmem>>, vector<1x1x8x8xf32>
    %265 = vector.shape_cast %264 : vector<1x1x8x8xf32> to vector<8x8xf32>
    %266 = vector.shape_cast %263 : vector<8x8xf32> to vector<1x1x8x8xf32>
    tpu.vector_store %arg5[%c0_432, %c0_433, %c0_434, %c0_435], %266 {strides = array<i32>} : memref<1x1x16x8xf32, #tpu.memory_space<vmem>>, vector<1x1x8x8xf32>,
    %cst_436 = arith.constant 0.000000e+00 : f32
    %267 = vector.broadcast %cst_436 : f32 to vector<8x8xf32>
    %c0_437 = arith.constant 0 : index
    %c0_438 = arith.constant 0 : index
    %268 = vector.load %arg6[%c0_437, %c0_438] : memref<8x8xf32, #tpu.memory_space<vmem>>, vector<8x8xf32>
    tpu.vector_store %arg6[%c0_437, %c0_438], %267 {strides = array<i32>} : memref<8x8xf32, #tpu.memory_space<vmem>>, vector<8x8xf32>,
    %c0_439 = arith.constant 0 : index
    %c0_440 = arith.constant 0 : index
    %c0_441 = arith.constant 0 : index
    %c8_442 = arith.constant 8 : index
    %c0_443 = arith.constant 0 : index
    %269 = vector.load %arg3[%c0_439, %c0_440, %c0_441, %c8_442, %c0_443] : memref<1x1x2x72x32xbf16, #tpu.memory_space<vmem>>, vector<1x1x1x8x16xbf16>
    %270 = vector.shape_cast %269 : vector<1x1x1x8x16xbf16> to vector<8x16xbf16>
    %c0_444 = arith.constant 0 : index
    %c0_445 = arith.constant 0 : index
    %c0_446 = arith.constant 0 : index
    %c0_447 = arith.constant 0 : index
    %271 = vector.load %arg4[%c0_444, %c0_445, %c0_446, %c0_447] : memref<1x16x32x8xbf16, #tpu.memory_space<vmem>>, vector<1x1x16x8xbf16>
    %272 = vector.shape_cast %271 : vector<1x1x16x8xbf16> to vector<16x8xbf16>
    %c0_448 = arith.constant 0 : index
    %c0_449 = arith.constant 0 : index
    %273 = vector.load %arg6[%c0_448, %c0_449] : memref<8x8xf32, #tpu.memory_space<vmem>>, vector<8x8xf32>
    %cst_450 = arith.constant dense<0.000000e+00> : vector<8x8xf32>
    %274 = tpu.matmul %270, %272, %cst_450 {dimension_numbers = #tpu.dot_dimension_numbers<[1], [0], [0], [1], [0, 0, 1, 1], [], []>} : vector<8x16xbf16>, vector<16x8xbf16>, vector<8x8xf32> -> vector<8x8xf32>
    %275 = arith.addf %273, %274 : vector<8x8xf32>
    %c0_451 = arith.constant 0 : index
    %c0_452 = arith.constant 0 : index
    %276 = vector.load %arg6[%c0_451, %c0_452] : memref<8x8xf32, #tpu.memory_space<vmem>>, vector<8x8xf32>
    tpu.vector_store %arg6[%c0_451, %c0_452], %275 {strides = array<i32>} : memref<8x8xf32, #tpu.memory_space<vmem>>, vector<8x8xf32>,
    %c0_453 = arith.constant 0 : index
    %c0_454 = arith.constant 0 : index
    %c0_455 = arith.constant 0 : index
    %c8_456 = arith.constant 8 : index
    %c16_457 = arith.constant 16 : index
    %277 = vector.load %arg3[%c0_453, %c0_454, %c0_455, %c8_456, %c16_457] : memref<1x1x2x72x32xbf16, #tpu.memory_space<vmem>>, vector<1x1x1x8x16xbf16>
    %278 = vector.shape_cast %277 : vector<1x1x1x8x16xbf16> to vector<8x16xbf16>
    %c0_458 = arith.constant 0 : index
    %c0_459 = arith.constant 0 : index
    %c16_460 = arith.constant 16 : index
    %c0_461 = arith.constant 0 : index
    %279 = vector.load %arg4[%c0_458, %c0_459, %c16_460, %c0_461] : memref<1x16x32x8xbf16, #tpu.memory_space<vmem>>, vector<1x1x16x8xbf16>
    %280 = vector.shape_cast %279 : vector<1x1x16x8xbf16> to vector<16x8xbf16>
    %c0_462 = arith.constant 0 : index
    %c0_463 = arith.constant 0 : index
    %281 = vector.load %arg6[%c0_462, %c0_463] : memref<8x8xf32, #tpu.memory_space<vmem>>, vector<8x8xf32>
    %cst_464 = arith.constant dense<0.000000e+00> : vector<8x8xf32>
    %282 = tpu.matmul %278, %280, %cst_464 {dimension_numbers = #tpu.dot_dimension_numbers<[1], [0], [0], [1], [0, 0, 1, 1], [], []>} : vector<8x16xbf16>, vector<16x8xbf16>, vector<8x8xf32> -> vector<8x8xf32>
    %283 = arith.addf %281, %282 : vector<8x8xf32>
    %c0_465 = arith.constant 0 : index
    %c0_466 = arith.constant 0 : index
    %284 = vector.load %arg6[%c0_465, %c0_466] : memref<8x8xf32, #tpu.memory_space<vmem>>, vector<8x8xf32>
    tpu.vector_store %arg6[%c0_465, %c0_466], %283 {strides = array<i32>} : memref<8x8xf32, #tpu.memory_space<vmem>>, vector<8x8xf32>,
    %c0_467 = arith.constant 0 : index
    %c0_468 = arith.constant 0 : index
    %c1_469 = arith.constant 1 : index
    %c8_470 = arith.constant 8 : index
    %c0_471 = arith.constant 0 : index
    %285 = vector.load %arg3[%c0_467, %c0_468, %c1_469, %c8_470, %c0_471] : memref<1x1x2x72x32xbf16, #tpu.memory_space<vmem>>, vector<1x1x1x8x16xbf16>
    %286 = vector.shape_cast %285 : vector<1x1x1x8x16xbf16> to vector<8x16xbf16>
    %c0_472 = arith.constant 0 : index
    %c1_473 = arith.constant 1 : index
    %c0_474 = arith.constant 0 : index
    %c0_475 = arith.constant 0 : index
    %287 = vector.load %arg4[%c0_472, %c1_473, %c0_474, %c0_475] : memref<1x16x32x8xbf16, #tpu.memory_space<vmem>>, vector<1x1x16x8xbf16>
    %288 = vector.shape_cast %287 : vector<1x1x16x8xbf16> to vector<16x8xbf16>
    %c0_476 = arith.constant 0 : index
    %c0_477 = arith.constant 0 : index
    %289 = vector.load %arg6[%c0_476, %c0_477] : memref<8x8xf32, #tpu.memory_space<vmem>>, vector<8x8xf32>
    %cst_478 = arith.constant dense<0.000000e+00> : vector<8x8xf32>
    %290 = tpu.matmul %286, %288, %cst_478 {dimension_numbers = #tpu.dot_dimension_numbers<[1], [0], [0], [1], [0, 0, 1, 1], [], []>} : vector<8x16xbf16>, vector<16x8xbf16>, vector<8x8xf32> -> vector<8x8xf32>
    %291 = arith.addf %289, %290 : vector<8x8xf32>
    %c0_479 = arith.constant 0 : index
    %c0_480 = arith.constant 0 : index
    %292 = vector.load %arg6[%c0_479, %c0_480] : memref<8x8xf32, #tpu.memory_space<vmem>>, vector<8x8xf32>
    tpu.vector_store %arg6[%c0_479, %c0_480], %291 {strides = array<i32>} : memref<8x8xf32, #tpu.memory_space<vmem>>, vector<8x8xf32>,
    %c0_481 = arith.constant 0 : index
    %c0_482 = arith.constant 0 : index
    %c1_483 = arith.constant 1 : index
    %c8_484 = arith.constant 8 : index
    %c16_485 = arith.constant 16 : index
    %293 = vector.load %arg3[%c0_481, %c0_482, %c1_483, %c8_484, %c16_485] : memref<1x1x2x72x32xbf16, #tpu.memory_space<vmem>>, vector<1x1x1x8x16xbf16>
    %294 = vector.shape_cast %293 : vector<1x1x1x8x16xbf16> to vector<8x16xbf16>
    %c0_486 = arith.constant 0 : index
    %c1_487 = arith.constant 1 : index
    %c16_488 = arith.constant 16 : index
    %c0_489 = arith.constant 0 : index
    %295 = vector.load %arg4[%c0_486, %c1_487, %c16_488, %c0_489] : memref<1x16x32x8xbf16, #tpu.memory_space<vmem>>, vector<1x1x16x8xbf16>
    %296 = vector.shape_cast %295 : vector<1x1x16x8xbf16> to vector<16x8xbf16>
    %c0_490 = arith.constant 0 : index
    %c0_491 = arith.constant 0 : index
    %297 = vector.load %arg6[%c0_490, %c0_491] : memref<8x8xf32, #tpu.memory_space<vmem>>, vector<8x8xf32>
    %cst_492 = arith.constant dense<0.000000e+00> : vector<8x8xf32>
    %298 = tpu.matmul %294, %296, %cst_492 {dimension_numbers = #tpu.dot_dimension_numbers<[1], [0], [0], [1], [0, 0, 1, 1], [], []>} : vector<8x16xbf16>, vector<16x8xbf16>, vector<8x8xf32> -> vector<8x8xf32>
    %299 = arith.addf %297, %298 : vector<8x8xf32>
    %c0_493 = arith.constant 0 : index
    %c0_494 = arith.constant 0 : index
    %300 = vector.load %arg6[%c0_493, %c0_494] : memref<8x8xf32, #tpu.memory_space<vmem>>, vector<8x8xf32>
    tpu.vector_store %arg6[%c0_493, %c0_494], %299 {strides = array<i32>} : memref<8x8xf32, #tpu.memory_space<vmem>>, vector<8x8xf32>,
    %c0_495 = arith.constant 0 : index
    %c0_496 = arith.constant 0 : index
    %c0_497 = arith.constant 0 : index
    %c16_498 = arith.constant 16 : index
    %c0_499 = arith.constant 0 : index
    %301 = vector.load %arg3[%c0_495, %c0_496, %c0_497, %c16_498, %c0_499] : memref<1x1x2x72x32xbf16, #tpu.memory_space<vmem>>, vector<1x1x1x8x16xbf16>
    %302 = vector.shape_cast %301 : vector<1x1x1x8x16xbf16> to vector<8x16xbf16>
    %c0_500 = arith.constant 0 : index
    %c2_501 = arith.constant 2 : index
    %c0_502 = arith.constant 0 : index
    %c0_503 = arith.constant 0 : index
    %303 = vector.load %arg4[%c0_500, %c2_501, %c0_502, %c0_503] : memref<1x16x32x8xbf16, #tpu.memory_space<vmem>>, vector<1x1x16x8xbf16>
    %304 = vector.shape_cast %303 : vector<1x1x16x8xbf16> to vector<16x8xbf16>
    %c0_504 = arith.constant 0 : index
    %c0_505 = arith.constant 0 : index
    %305 = vector.load %arg6[%c0_504, %c0_505] : memref<8x8xf32, #tpu.memory_space<vmem>>, vector<8x8xf32>
    %cst_506 = arith.constant dense<0.000000e+00> : vector<8x8xf32>
    %306 = tpu.matmul %302, %304, %cst_506 {dimension_numbers = #tpu.dot_dimension_numbers<[1], [0], [0], [1], [0, 0, 1, 1], [], []>} : vector<8x16xbf16>, vector<16x8xbf16>, vector<8x8xf32> -> vector<8x8xf32>
    %307 = arith.addf %305, %306 : vector<8x8xf32>
    %c0_507 = arith.constant 0 : index
    %c0_508 = arith.constant 0 : index
    %308 = vector.load %arg6[%c0_507, %c0_508] : memref<8x8xf32, #tpu.memory_space<vmem>>, vector<8x8xf32>
    tpu.vector_store %arg6[%c0_507, %c0_508], %307 {strides = array<i32>} : memref<8x8xf32, #tpu.memory_space<vmem>>, vector<8x8xf32>,
    %c0_509 = arith.constant 0 : index
    %c0_510 = arith.constant 0 : index
    %c0_511 = arith.constant 0 : index
    %c16_512 = arith.constant 16 : index
    %c16_513 = arith.constant 16 : index
    %309 = vector.load %arg3[%c0_509, %c0_510, %c0_511, %c16_512, %c16_513] : memref<1x1x2x72x32xbf16, #tpu.memory_space<vmem>>, vector<1x1x1x8x16xbf16>
    %310 = vector.shape_cast %309 : vector<1x1x1x8x16xbf16> to vector<8x16xbf16>
    %c0_514 = arith.constant 0 : index
    %c2_515 = arith.constant 2 : index
    %c16_516 = arith.constant 16 : index
    %c0_517 = arith.constant 0 : index
    %311 = vector.load %arg4[%c0_514, %c2_515, %c16_516, %c0_517] : memref<1x16x32x8xbf16, #tpu.memory_space<vmem>>, vector<1x1x16x8xbf16>
    %312 = vector.shape_cast %311 : vector<1x1x16x8xbf16> to vector<16x8xbf16>
    %c0_518 = arith.constant 0 : index
    %c0_519 = arith.constant 0 : index
    %313 = vector.load %arg6[%c0_518, %c0_519] : memref<8x8xf32, #tpu.memory_space<vmem>>, vector<8x8xf32>
    %cst_520 = arith.constant dense<0.000000e+00> : vector<8x8xf32>
    %314 = tpu.matmul %310, %312, %cst_520 {dimension_numbers = #tpu.dot_dimension_numbers<[1], [0], [0], [1], [0, 0, 1, 1], [], []>} : vector<8x16xbf16>, vector<16x8xbf16>, vector<8x8xf32> -> vector<8x8xf32>
    %315 = arith.addf %313, %314 : vector<8x8xf32>
    %c0_521 = arith.constant 0 : index
    %c0_522 = arith.constant 0 : index
    %316 = vector.load %arg6[%c0_521, %c0_522] : memref<8x8xf32, #tpu.memory_space<vmem>>, vector<8x8xf32>
    tpu.vector_store %arg6[%c0_521, %c0_522], %315 {strides = array<i32>} : memref<8x8xf32, #tpu.memory_space<vmem>>, vector<8x8xf32>,
    %c0_523 = arith.constant 0 : index
    %c0_524 = arith.constant 0 : index
    %c1_525 = arith.constant 1 : index
    %c16_526 = arith.constant 16 : index
    %c0_527 = arith.constant 0 : index
    %317 = vector.load %arg3[%c0_523, %c0_524, %c1_525, %c16_526, %c0_527] : memref<1x1x2x72x32xbf16, #tpu.memory_space<vmem>>, vector<1x1x1x8x16xbf16>
    %318 = vector.shape_cast %317 : vector<1x1x1x8x16xbf16> to vector<8x16xbf16>
    %c0_528 = arith.constant 0 : index
    %c3_529 = arith.constant 3 : index
    %c0_530 = arith.constant 0 : index
    %c0_531 = arith.constant 0 : index
    %319 = vector.load %arg4[%c0_528, %c3_529, %c0_530, %c0_531] : memref<1x16x32x8xbf16, #tpu.memory_space<vmem>>, vector<1x1x16x8xbf16>
    %320 = vector.shape_cast %319 : vector<1x1x16x8xbf16> to vector<16x8xbf16>
    %c0_532 = arith.constant 0 : index
    %c0_533 = arith.constant 0 : index
    %321 = vector.load %arg6[%c0_532, %c0_533] : memref<8x8xf32, #tpu.memory_space<vmem>>, vector<8x8xf32>
    %cst_534 = arith.constant dense<0.000000e+00> : vector<8x8xf32>
    %322 = tpu.matmul %318, %320, %cst_534 {dimension_numbers = #tpu.dot_dimension_numbers<[1], [0], [0], [1], [0, 0, 1, 1], [], []>} : vector<8x16xbf16>, vector<16x8xbf16>, vector<8x8xf32> -> vector<8x8xf32>
    %323 = arith.addf %321, %322 : vector<8x8xf32>
    %c0_535 = arith.constant 0 : index
    %c0_536 = arith.constant 0 : index
    %324 = vector.load %arg6[%c0_535, %c0_536] : memref<8x8xf32, #tpu.memory_space<vmem>>, vector<8x8xf32>
    tpu.vector_store %arg6[%c0_535, %c0_536], %323 {strides = array<i32>} : memref<8x8xf32, #tpu.memory_space<vmem>>, vector<8x8xf32>,
    %c0_537 = arith.constant 0 : index
    %c0_538 = arith.constant 0 : index
    %c1_539 = arith.constant 1 : index
    %c16_540 = arith.constant 16 : index
    %c16_541 = arith.constant 16 : index
    %325 = vector.load %arg3[%c0_537, %c0_538, %c1_539, %c16_540, %c16_541] : memref<1x1x2x72x32xbf16, #tpu.memory_space<vmem>>, vector<1x1x1x8x16xbf16>
    %326 = vector.shape_cast %325 : vector<1x1x1x8x16xbf16> to vector<8x16xbf16>
    %c0_542 = arith.constant 0 : index
    %c3_543 = arith.constant 3 : index
    %c16_544 = arith.constant 16 : index
    %c0_545 = arith.constant 0 : index
    %327 = vector.load %arg4[%c0_542, %c3_543, %c16_544, %c0_545] : memref<1x16x32x8xbf16, #tpu.memory_space<vmem>>, vector<1x1x16x8xbf16>
    %328 = vector.shape_cast %327 : vector<1x1x16x8xbf16> to vector<16x8xbf16>
    %c0_546 = arith.constant 0 : index
    %c0_547 = arith.constant 0 : index
    %329 = vector.load %arg6[%c0_546, %c0_547] : memref<8x8xf32, #tpu.memory_space<vmem>>, vector<8x8xf32>
    %cst_548 = arith.constant dense<0.000000e+00> : vector<8x8xf32>
    %330 = tpu.matmul %326, %328, %cst_548 {dimension_numbers = #tpu.dot_dimension_numbers<[1], [0], [0], [1], [0, 0, 1, 1], [], []>} : vector<8x16xbf16>, vector<16x8xbf16>, vector<8x8xf32> -> vector<8x8xf32>
    %331 = arith.addf %329, %330 : vector<8x8xf32>
    %c0_549 = arith.constant 0 : index
    %c0_550 = arith.constant 0 : index
    %332 = vector.load %arg6[%c0_549, %c0_550] : memref<8x8xf32, #tpu.memory_space<vmem>>, vector<8x8xf32>
    tpu.vector_store %arg6[%c0_549, %c0_550], %331 {strides = array<i32>} : memref<8x8xf32, #tpu.memory_space<vmem>>, vector<8x8xf32>,
    %c0_551 = arith.constant 0 : index
    %c0_552 = arith.constant 0 : index
    %c0_553 = arith.constant 0 : index
    %c24_554 = arith.constant 24 : index
    %c0_555 = arith.constant 0 : index
    %333 = vector.load %arg3[%c0_551, %c0_552, %c0_553, %c24_554, %c0_555] : memref<1x1x2x72x32xbf16, #tpu.memory_space<vmem>>, vector<1x1x1x8x16xbf16>
    %334 = vector.shape_cast %333 : vector<1x1x1x8x16xbf16> to vector<8x16xbf16>
    %c0_556 = arith.constant 0 : index
    %c4_557 = arith.constant 4 : index
    %c0_558 = arith.constant 0 : index
    %c0_559 = arith.constant 0 : index
    %335 = vector.load %arg4[%c0_556, %c4_557, %c0_558, %c0_559] : memref<1x16x32x8xbf16, #tpu.memory_space<vmem>>, vector<1x1x16x8xbf16>
    %336 = vector.shape_cast %335 : vector<1x1x16x8xbf16> to vector<16x8xbf16>
    %c0_560 = arith.constant 0 : index
    %c0_561 = arith.constant 0 : index
    %337 = vector.load %arg6[%c0_560, %c0_561] : memref<8x8xf32, #tpu.memory_space<vmem>>, vector<8x8xf32>
    %cst_562 = arith.constant dense<0.000000e+00> : vector<8x8xf32>
    %338 = tpu.matmul %334, %336, %cst_562 {dimension_numbers = #tpu.dot_dimension_numbers<[1], [0], [0], [1], [0, 0, 1, 1], [], []>} : vector<8x16xbf16>, vector<16x8xbf16>, vector<8x8xf32> -> vector<8x8xf32>
    %339 = arith.addf %337, %338 : vector<8x8xf32>
    %c0_563 = arith.constant 0 : index
    %c0_564 = arith.constant 0 : index
    %340 = vector.load %arg6[%c0_563, %c0_564] : memref<8x8xf32, #tpu.memory_space<vmem>>, vector<8x8xf32>
    tpu.vector_store %arg6[%c0_563, %c0_564], %339 {strides = array<i32>} : memref<8x8xf32, #tpu.memory_space<vmem>>, vector<8x8xf32>,
    %c0_565 = arith.constant 0 : index
    %c0_566 = arith.constant 0 : index
    %c0_567 = arith.constant 0 : index
    %c24_568 = arith.constant 24 : index
    %c16_569 = arith.constant 16 : index
    %341 = vector.load %arg3[%c0_565, %c0_566, %c0_567, %c24_568, %c16_569] : memref<1x1x2x72x32xbf16, #tpu.memory_space<vmem>>, vector<1x1x1x8x16xbf16>
    %342 = vector.shape_cast %341 : vector<1x1x1x8x16xbf16> to vector<8x16xbf16>
    %c0_570 = arith.constant 0 : index
    %c4_571 = arith.constant 4 : index
    %c16_572 = arith.constant 16 : index
    %c0_573 = arith.constant 0 : index
    %343 = vector.load %arg4[%c0_570, %c4_571, %c16_572, %c0_573] : memref<1x16x32x8xbf16, #tpu.memory_space<vmem>>, vector<1x1x16x8xbf16>
    %344 = vector.shape_cast %343 : vector<1x1x16x8xbf16> to vector<16x8xbf16>
    %c0_574 = arith.constant 0 : index
    %c0_575 = arith.constant 0 : index
    %345 = vector.load %arg6[%c0_574, %c0_575] : memref<8x8xf32, #tpu.memory_space<vmem>>, vector<8x8xf32>
    %cst_576 = arith.constant dense<0.000000e+00> : vector<8x8xf32>
    %346 = tpu.matmul %342, %344, %cst_576 {dimension_numbers = #tpu.dot_dimension_numbers<[1], [0], [0], [1], [0, 0, 1, 1], [], []>} : vector<8x16xbf16>, vector<16x8xbf16>, vector<8x8xf32> -> vector<8x8xf32>
    %347 = arith.addf %345, %346 : vector<8x8xf32>
    %c0_577 = arith.constant 0 : index
    %c0_578 = arith.constant 0 : index
    %348 = vector.load %arg6[%c0_577, %c0_578] : memref<8x8xf32, #tpu.memory_space<vmem>>, vector<8x8xf32>
    tpu.vector_store %arg6[%c0_577, %c0_578], %347 {strides = array<i32>} : memref<8x8xf32, #tpu.memory_space<vmem>>, vector<8x8xf32>,
    %c0_579 = arith.constant 0 : index
    %c0_580 = arith.constant 0 : index
    %c1_581 = arith.constant 1 : index
    %c24_582 = arith.constant 24 : index
    %c0_583 = arith.constant 0 : index
    %349 = vector.load %arg3[%c0_579, %c0_580, %c1_581, %c24_582, %c0_583] : memref<1x1x2x72x32xbf16, #tpu.memory_space<vmem>>, vector<1x1x1x8x16xbf16>
    %350 = vector.shape_cast %349 : vector<1x1x1x8x16xbf16> to vector<8x16xbf16>
    %c0_584 = arith.constant 0 : index
    %c5_585 = arith.constant 5 : index
    %c0_586 = arith.constant 0 : index
    %c0_587 = arith.constant 0 : index
    %351 = vector.load %arg4[%c0_584, %c5_585, %c0_586, %c0_587] : memref<1x16x32x8xbf16, #tpu.memory_space<vmem>>, vector<1x1x16x8xbf16>
    %352 = vector.shape_cast %351 : vector<1x1x16x8xbf16> to vector<16x8xbf16>
    %c0_588 = arith.constant 0 : index
    %c0_589 = arith.constant 0 : index
    %353 = vector.load %arg6[%c0_588, %c0_589] : memref<8x8xf32, #tpu.memory_space<vmem>>, vector<8x8xf32>
    %cst_590 = arith.constant dense<0.000000e+00> : vector<8x8xf32>
    %354 = tpu.matmul %350, %352, %cst_590 {dimension_numbers = #tpu.dot_dimension_numbers<[1], [0], [0], [1], [0, 0, 1, 1], [], []>} : vector<8x16xbf16>, vector<16x8xbf16>, vector<8x8xf32> -> vector<8x8xf32>
    %355 = arith.addf %353, %354 : vector<8x8xf32>
    %c0_591 = arith.constant 0 : index
    %c0_592 = arith.constant 0 : index
    %356 = vector.load %arg6[%c0_591, %c0_592] : memref<8x8xf32, #tpu.memory_space<vmem>>, vector<8x8xf32>
    tpu.vector_store %arg6[%c0_591, %c0_592], %355 {strides = array<i32>} : memref<8x8xf32, #tpu.memory_space<vmem>>, vector<8x8xf32>,
    %c0_593 = arith.constant 0 : index
    %c0_594 = arith.constant 0 : index
    %c1_595 = arith.constant 1 : index
    %c24_596 = arith.constant 24 : index
    %c16_597 = arith.constant 16 : index
    %357 = vector.load %arg3[%c0_593, %c0_594, %c1_595, %c24_596, %c16_597] : memref<1x1x2x72x32xbf16, #tpu.memory_space<vmem>>, vector<1x1x1x8x16xbf16>
    %358 = vector.shape_cast %357 : vector<1x1x1x8x16xbf16> to vector<8x16xbf16>
    %c0_598 = arith.constant 0 : index
    %c5_599 = arith.constant 5 : index
    %c16_600 = arith.constant 16 : index
    %c0_601 = arith.constant 0 : index
    %359 = vector.load %arg4[%c0_598, %c5_599, %c16_600, %c0_601] : memref<1x16x32x8xbf16, #tpu.memory_space<vmem>>, vector<1x1x16x8xbf16>
    %360 = vector.shape_cast %359 : vector<1x1x16x8xbf16> to vector<16x8xbf16>
    %c0_602 = arith.constant 0 : index
    %c0_603 = arith.constant 0 : index
    %361 = vector.load %arg6[%c0_602, %c0_603] : memref<8x8xf32, #tpu.memory_space<vmem>>, vector<8x8xf32>
    %cst_604 = arith.constant dense<0.000000e+00> : vector<8x8xf32>
    %362 = tpu.matmul %358, %360, %cst_604 {dimension_numbers = #tpu.dot_dimension_numbers<[1], [0], [0], [1], [0, 0, 1, 1], [], []>} : vector<8x16xbf16>, vector<16x8xbf16>, vector<8x8xf32> -> vector<8x8xf32>
    %363 = arith.addf %361, %362 : vector<8x8xf32>
    %c0_605 = arith.constant 0 : index
    %c0_606 = arith.constant 0 : index
    %364 = vector.load %arg6[%c0_605, %c0_606] : memref<8x8xf32, #tpu.memory_space<vmem>>, vector<8x8xf32>
    tpu.vector_store %arg6[%c0_605, %c0_606], %363 {strides = array<i32>} : memref<8x8xf32, #tpu.memory_space<vmem>>, vector<8x8xf32>,
    %c0_607 = arith.constant 0 : index
    %c0_608 = arith.constant 0 : index
    %c0_609 = arith.constant 0 : index
    %c32_610 = arith.constant 32 : index
    %c0_611 = arith.constant 0 : index
    %365 = vector.load %arg3[%c0_607, %c0_608, %c0_609, %c32_610, %c0_611] : memref<1x1x2x72x32xbf16, #tpu.memory_space<vmem>>, vector<1x1x1x8x16xbf16>
    %366 = vector.shape_cast %365 : vector<1x1x1x8x16xbf16> to vector<8x16xbf16>
    %c0_612 = arith.constant 0 : index
    %c6_613 = arith.constant 6 : index
    %c0_614 = arith.constant 0 : index
    %c0_615 = arith.constant 0 : index
    %367 = vector.load %arg4[%c0_612, %c6_613, %c0_614, %c0_615] : memref<1x16x32x8xbf16, #tpu.memory_space<vmem>>, vector<1x1x16x8xbf16>
    %368 = vector.shape_cast %367 : vector<1x1x16x8xbf16> to vector<16x8xbf16>
    %c0_616 = arith.constant 0 : index
    %c0_617 = arith.constant 0 : index
    %369 = vector.load %arg6[%c0_616, %c0_617] : memref<8x8xf32, #tpu.memory_space<vmem>>, vector<8x8xf32>
    %cst_618 = arith.constant dense<0.000000e+00> : vector<8x8xf32>
    %370 = tpu.matmul %366, %368, %cst_618 {dimension_numbers = #tpu.dot_dimension_numbers<[1], [0], [0], [1], [0, 0, 1, 1], [], []>} : vector<8x16xbf16>, vector<16x8xbf16>, vector<8x8xf32> -> vector<8x8xf32>
    %371 = arith.addf %369, %370 : vector<8x8xf32>
    %c0_619 = arith.constant 0 : index
    %c0_620 = arith.constant 0 : index
    %372 = vector.load %arg6[%c0_619, %c0_620] : memref<8x8xf32, #tpu.memory_space<vmem>>, vector<8x8xf32>
    tpu.vector_store %arg6[%c0_619, %c0_620], %371 {strides = array<i32>} : memref<8x8xf32, #tpu.memory_space<vmem>>, vector<8x8xf32>,
    %c0_621 = arith.constant 0 : index
    %c0_622 = arith.constant 0 : index
    %c0_623 = arith.constant 0 : index
    %c32_624 = arith.constant 32 : index
    %c16_625 = arith.constant 16 : index
    %373 = vector.load %arg3[%c0_621, %c0_622, %c0_623, %c32_624, %c16_625] : memref<1x1x2x72x32xbf16, #tpu.memory_space<vmem>>, vector<1x1x1x8x16xbf16>
    %374 = vector.shape_cast %373 : vector<1x1x1x8x16xbf16> to vector<8x16xbf16>
    %c0_626 = arith.constant 0 : index
    %c6_627 = arith.constant 6 : index
    %c16_628 = arith.constant 16 : index
    %c0_629 = arith.constant 0 : index
    %375 = vector.load %arg4[%c0_626, %c6_627, %c16_628, %c0_629] : memref<1x16x32x8xbf16, #tpu.memory_space<vmem>>, vector<1x1x16x8xbf16>
    %376 = vector.shape_cast %375 : vector<1x1x16x8xbf16> to vector<16x8xbf16>
    %c0_630 = arith.constant 0 : index
    %c0_631 = arith.constant 0 : index
    %377 = vector.load %arg6[%c0_630, %c0_631] : memref<8x8xf32, #tpu.memory_space<vmem>>, vector<8x8xf32>
    %cst_632 = arith.constant dense<0.000000e+00> : vector<8x8xf32>
    %378 = tpu.matmul %374, %376, %cst_632 {dimension_numbers = #tpu.dot_dimension_numbers<[1], [0], [0], [1], [0, 0, 1, 1], [], []>} : vector<8x16xbf16>, vector<16x8xbf16>, vector<8x8xf32> -> vector<8x8xf32>
    %379 = arith.addf %377, %378 : vector<8x8xf32>
    %c0_633 = arith.constant 0 : index
    %c0_634 = arith.constant 0 : index
    %380 = vector.load %arg6[%c0_633, %c0_634] : memref<8x8xf32, #tpu.memory_space<vmem>>, vector<8x8xf32>
    tpu.vector_store %arg6[%c0_633, %c0_634], %379 {strides = array<i32>} : memref<8x8xf32, #tpu.memory_space<vmem>>, vector<8x8xf32>,
    %c0_635 = arith.constant 0 : index
    %c0_636 = arith.constant 0 : index
    %c1_637 = arith.constant 1 : index
    %c32_638 = arith.constant 32 : index
    %c0_639 = arith.constant 0 : index
    %381 = vector.load %arg3[%c0_635, %c0_636, %c1_637, %c32_638, %c0_639] : memref<1x1x2x72x32xbf16, #tpu.memory_space<vmem>>, vector<1x1x1x8x16xbf16>
    %382 = vector.shape_cast %381 : vector<1x1x1x8x16xbf16> to vector<8x16xbf16>
    %c0_640 = arith.constant 0 : index
    %c7_641 = arith.constant 7 : index
    %c0_642 = arith.constant 0 : index
    %c0_643 = arith.constant 0 : index
    %383 = vector.load %arg4[%c0_640, %c7_641, %c0_642, %c0_643] : memref<1x16x32x8xbf16, #tpu.memory_space<vmem>>, vector<1x1x16x8xbf16>
    %384 = vector.shape_cast %383 : vector<1x1x16x8xbf16> to vector<16x8xbf16>
    %c0_644 = arith.constant 0 : index
    %c0_645 = arith.constant 0 : index
    %385 = vector.load %arg6[%c0_644, %c0_645] : memref<8x8xf32, #tpu.memory_space<vmem>>, vector<8x8xf32>
    %cst_646 = arith.constant dense<0.000000e+00> : vector<8x8xf32>
    %386 = tpu.matmul %382, %384, %cst_646 {dimension_numbers = #tpu.dot_dimension_numbers<[1], [0], [0], [1], [0, 0, 1, 1], [], []>} : vector<8x16xbf16>, vector<16x8xbf16>, vector<8x8xf32> -> vector<8x8xf32>
    %387 = arith.addf %385, %386 : vector<8x8xf32>
    %c0_647 = arith.constant 0 : index
    %c0_648 = arith.constant 0 : index
    %388 = vector.load %arg6[%c0_647, %c0_648] : memref<8x8xf32, #tpu.memory_space<vmem>>, vector<8x8xf32>
    tpu.vector_store %arg6[%c0_647, %c0_648], %387 {strides = array<i32>} : memref<8x8xf32, #tpu.memory_space<vmem>>, vector<8x8xf32>,
    %c0_649 = arith.constant 0 : index
    %c0_650 = arith.constant 0 : index
    %c1_651 = arith.constant 1 : index
    %c32_652 = arith.constant 32 : index
    %c16_653 = arith.constant 16 : index
    %389 = vector.load %arg3[%c0_649, %c0_650, %c1_651, %c32_652, %c16_653] : memref<1x1x2x72x32xbf16, #tpu.memory_space<vmem>>, vector<1x1x1x8x16xbf16>
    %390 = vector.shape_cast %389 : vector<1x1x1x8x16xbf16> to vector<8x16xbf16>
    %c0_654 = arith.constant 0 : index
    %c7_655 = arith.constant 7 : index
    %c16_656 = arith.constant 16 : index
    %c0_657 = arith.constant 0 : index
    %391 = vector.load %arg4[%c0_654, %c7_655, %c16_656, %c0_657] : memref<1x16x32x8xbf16, #tpu.memory_space<vmem>>, vector<1x1x16x8xbf16>
    %392 = vector.shape_cast %391 : vector<1x1x16x8xbf16> to vector<16x8xbf16>
    %c0_658 = arith.constant 0 : index
    %c0_659 = arith.constant 0 : index
    %393 = vector.load %arg6[%c0_658, %c0_659] : memref<8x8xf32, #tpu.memory_space<vmem>>, vector<8x8xf32>
    %cst_660 = arith.constant dense<0.000000e+00> : vector<8x8xf32>
    %394 = tpu.matmul %390, %392, %cst_660 {dimension_numbers = #tpu.dot_dimension_numbers<[1], [0], [0], [1], [0, 0, 1, 1], [], []>} : vector<8x16xbf16>, vector<16x8xbf16>, vector<8x8xf32> -> vector<8x8xf32>
    %395 = arith.addf %393, %394 : vector<8x8xf32>
    %c0_661 = arith.constant 0 : index
    %c0_662 = arith.constant 0 : index
    %396 = vector.load %arg6[%c0_661, %c0_662] : memref<8x8xf32, #tpu.memory_space<vmem>>, vector<8x8xf32>
    tpu.vector_store %arg6[%c0_661, %c0_662], %395 {strides = array<i32>} : memref<8x8xf32, #tpu.memory_space<vmem>>, vector<8x8xf32>,
    %c0_663 = arith.constant 0 : index
    %c0_664 = arith.constant 0 : index
    %c0_665 = arith.constant 0 : index
    %c40_666 = arith.constant 40 : index
    %c0_667 = arith.constant 0 : index
    %397 = vector.load %arg3[%c0_663, %c0_664, %c0_665, %c40_666, %c0_667] : memref<1x1x2x72x32xbf16, #tpu.memory_space<vmem>>, vector<1x1x1x8x16xbf16>
    %398 = vector.shape_cast %397 : vector<1x1x1x8x16xbf16> to vector<8x16xbf16>
    %c0_668 = arith.constant 0 : index
    %c8_669 = arith.constant 8 : index
    %c0_670 = arith.constant 0 : index
    %c0_671 = arith.constant 0 : index
    %399 = vector.load %arg4[%c0_668, %c8_669, %c0_670, %c0_671] : memref<1x16x32x8xbf16, #tpu.memory_space<vmem>>, vector<1x1x16x8xbf16>
    %400 = vector.shape_cast %399 : vector<1x1x16x8xbf16> to vector<16x8xbf16>
    %c0_672 = arith.constant 0 : index
    %c0_673 = arith.constant 0 : index
    %401 = vector.load %arg6[%c0_672, %c0_673] : memref<8x8xf32, #tpu.memory_space<vmem>>, vector<8x8xf32>
    %cst_674 = arith.constant dense<0.000000e+00> : vector<8x8xf32>
    %402 = tpu.matmul %398, %400, %cst_674 {dimension_numbers = #tpu.dot_dimension_numbers<[1], [0], [0], [1], [0, 0, 1, 1], [], []>} : vector<8x16xbf16>, vector<16x8xbf16>, vector<8x8xf32> -> vector<8x8xf32>
    %403 = arith.addf %401, %402 : vector<8x8xf32>
    %c0_675 = arith.constant 0 : index
    %c0_676 = arith.constant 0 : index
    %404 = vector.load %arg6[%c0_675, %c0_676] : memref<8x8xf32, #tpu.memory_space<vmem>>, vector<8x8xf32>
    tpu.vector_store %arg6[%c0_675, %c0_676], %403 {strides = array<i32>} : memref<8x8xf32, #tpu.memory_space<vmem>>, vector<8x8xf32>,
    %c0_677 = arith.constant 0 : index
    %c0_678 = arith.constant 0 : index
    %c0_679 = arith.constant 0 : index
    %c40_680 = arith.constant 40 : index
    %c16_681 = arith.constant 16 : index
    %405 = vector.load %arg3[%c0_677, %c0_678, %c0_679, %c40_680, %c16_681] : memref<1x1x2x72x32xbf16, #tpu.memory_space<vmem>>, vector<1x1x1x8x16xbf16>
    %406 = vector.shape_cast %405 : vector<1x1x1x8x16xbf16> to vector<8x16xbf16>
    %c0_682 = arith.constant 0 : index
    %c8_683 = arith.constant 8 : index
    %c16_684 = arith.constant 16 : index
    %c0_685 = arith.constant 0 : index
    %407 = vector.load %arg4[%c0_682, %c8_683, %c16_684, %c0_685] : memref<1x16x32x8xbf16, #tpu.memory_space<vmem>>, vector<1x1x16x8xbf16>
    %408 = vector.shape_cast %407 : vector<1x1x16x8xbf16> to vector<16x8xbf16>
    %c0_686 = arith.constant 0 : index
    %c0_687 = arith.constant 0 : index
    %409 = vector.load %arg6[%c0_686, %c0_687] : memref<8x8xf32, #tpu.memory_space<vmem>>, vector<8x8xf32>
    %cst_688 = arith.constant dense<0.000000e+00> : vector<8x8xf32>
    %410 = tpu.matmul %406, %408, %cst_688 {dimension_numbers = #tpu.dot_dimension_numbers<[1], [0], [0], [1], [0, 0, 1, 1], [], []>} : vector<8x16xbf16>, vector<16x8xbf16>, vector<8x8xf32> -> vector<8x8xf32>
    %411 = arith.addf %409, %410 : vector<8x8xf32>
    %c0_689 = arith.constant 0 : index
    %c0_690 = arith.constant 0 : index
    %412 = vector.load %arg6[%c0_689, %c0_690] : memref<8x8xf32, #tpu.memory_space<vmem>>, vector<8x8xf32>
    tpu.vector_store %arg6[%c0_689, %c0_690], %411 {strides = array<i32>} : memref<8x8xf32, #tpu.memory_space<vmem>>, vector<8x8xf32>,
    %c0_691 = arith.constant 0 : index
    %c0_692 = arith.constant 0 : index
    %c1_693 = arith.constant 1 : index
    %c40_694 = arith.constant 40 : index
    %c0_695 = arith.constant 0 : index
    %413 = vector.load %arg3[%c0_691, %c0_692, %c1_693, %c40_694, %c0_695] : memref<1x1x2x72x32xbf16, #tpu.memory_space<vmem>>, vector<1x1x1x8x16xbf16>
    %414 = vector.shape_cast %413 : vector<1x1x1x8x16xbf16> to vector<8x16xbf16>
    %c0_696 = arith.constant 0 : index
    %c9_697 = arith.constant 9 : index
    %c0_698 = arith.constant 0 : index
    %c0_699 = arith.constant 0 : index
    %415 = vector.load %arg4[%c0_696, %c9_697, %c0_698, %c0_699] : memref<1x16x32x8xbf16, #tpu.memory_space<vmem>>, vector<1x1x16x8xbf16>
    %416 = vector.shape_cast %415 : vector<1x1x16x8xbf16> to vector<16x8xbf16>
    %c0_700 = arith.constant 0 : index
    %c0_701 = arith.constant 0 : index
    %417 = vector.load %arg6[%c0_700, %c0_701] : memref<8x8xf32, #tpu.memory_space<vmem>>, vector<8x8xf32>
    %cst_702 = arith.constant dense<0.000000e+00> : vector<8x8xf32>
    %418 = tpu.matmul %414, %416, %cst_702 {dimension_numbers = #tpu.dot_dimension_numbers<[1], [0], [0], [1], [0, 0, 1, 1], [], []>} : vector<8x16xbf16>, vector<16x8xbf16>, vector<8x8xf32> -> vector<8x8xf32>
    %419 = arith.addf %417, %418 : vector<8x8xf32>
    %c0_703 = arith.constant 0 : index
    %c0_704 = arith.constant 0 : index
    %420 = vector.load %arg6[%c0_703, %c0_704] : memref<8x8xf32, #tpu.memory_space<vmem>>, vector<8x8xf32>
    tpu.vector_store %arg6[%c0_703, %c0_704], %419 {strides = array<i32>} : memref<8x8xf32, #tpu.memory_space<vmem>>, vector<8x8xf32>,
    %c0_705 = arith.constant 0 : index
    %c0_706 = arith.constant 0 : index
    %c1_707 = arith.constant 1 : index
    %c40_708 = arith.constant 40 : index
    %c16_709 = arith.constant 16 : index
    %421 = vector.load %arg3[%c0_705, %c0_706, %c1_707, %c40_708, %c16_709] : memref<1x1x2x72x32xbf16, #tpu.memory_space<vmem>>, vector<1x1x1x8x16xbf16>
    %422 = vector.shape_cast %421 : vector<1x1x1x8x16xbf16> to vector<8x16xbf16>
    %c0_710 = arith.constant 0 : index
    %c9_711 = arith.constant 9 : index
    %c16_712 = arith.constant 16 : index
    %c0_713 = arith.constant 0 : index
    %423 = vector.load %arg4[%c0_710, %c9_711, %c16_712, %c0_713] : memref<1x16x32x8xbf16, #tpu.memory_space<vmem>>, vector<1x1x16x8xbf16>
    %424 = vector.shape_cast %423 : vector<1x1x16x8xbf16> to vector<16x8xbf16>
    %c0_714 = arith.constant 0 : index
    %c0_715 = arith.constant 0 : index
    %425 = vector.load %arg6[%c0_714, %c0_715] : memref<8x8xf32, #tpu.memory_space<vmem>>, vector<8x8xf32>
    %cst_716 = arith.constant dense<0.000000e+00> : vector<8x8xf32>
    %426 = tpu.matmul %422, %424, %cst_716 {dimension_numbers = #tpu.dot_dimension_numbers<[1], [0], [0], [1], [0, 0, 1, 1], [], []>} : vector<8x16xbf16>, vector<16x8xbf16>, vector<8x8xf32> -> vector<8x8xf32>
    %427 = arith.addf %425, %426 : vector<8x8xf32>
    %c0_717 = arith.constant 0 : index
    %c0_718 = arith.constant 0 : index
    %428 = vector.load %arg6[%c0_717, %c0_718] : memref<8x8xf32, #tpu.memory_space<vmem>>, vector<8x8xf32>
    tpu.vector_store %arg6[%c0_717, %c0_718], %427 {strides = array<i32>} : memref<8x8xf32, #tpu.memory_space<vmem>>, vector<8x8xf32>,
    %c0_719 = arith.constant 0 : index
    %c0_720 = arith.constant 0 : index
    %c0_721 = arith.constant 0 : index
    %c48_722 = arith.constant 48 : index
    %c0_723 = arith.constant 0 : index
    %429 = vector.load %arg3[%c0_719, %c0_720, %c0_721, %c48_722, %c0_723] : memref<1x1x2x72x32xbf16, #tpu.memory_space<vmem>>, vector<1x1x1x8x16xbf16>
    %430 = vector.shape_cast %429 : vector<1x1x1x8x16xbf16> to vector<8x16xbf16>
    %c0_724 = arith.constant 0 : index
    %c10_725 = arith.constant 10 : index
    %c0_726 = arith.constant 0 : index
    %c0_727 = arith.constant 0 : index
    %431 = vector.load %arg4[%c0_724, %c10_725, %c0_726, %c0_727] : memref<1x16x32x8xbf16, #tpu.memory_space<vmem>>, vector<1x1x16x8xbf16>
    %432 = vector.shape_cast %431 : vector<1x1x16x8xbf16> to vector<16x8xbf16>
    %c0_728 = arith.constant 0 : index
    %c0_729 = arith.constant 0 : index
    %433 = vector.load %arg6[%c0_728, %c0_729] : memref<8x8xf32, #tpu.memory_space<vmem>>, vector<8x8xf32>
    %cst_730 = arith.constant dense<0.000000e+00> : vector<8x8xf32>
    %434 = tpu.matmul %430, %432, %cst_730 {dimension_numbers = #tpu.dot_dimension_numbers<[1], [0], [0], [1], [0, 0, 1, 1], [], []>} : vector<8x16xbf16>, vector<16x8xbf16>, vector<8x8xf32> -> vector<8x8xf32>
    %435 = arith.addf %433, %434 : vector<8x8xf32>
    %c0_731 = arith.constant 0 : index
    %c0_732 = arith.constant 0 : index
    %436 = vector.load %arg6[%c0_731, %c0_732] : memref<8x8xf32, #tpu.memory_space<vmem>>, vector<8x8xf32>
    tpu.vector_store %arg6[%c0_731, %c0_732], %435 {strides = array<i32>} : memref<8x8xf32, #tpu.memory_space<vmem>>, vector<8x8xf32>,
    %c0_733 = arith.constant 0 : index
    %c0_734 = arith.constant 0 : index
    %c0_735 = arith.constant 0 : index
    %c48_736 = arith.constant 48 : index
    %c16_737 = arith.constant 16 : index
    %437 = vector.load %arg3[%c0_733, %c0_734, %c0_735, %c48_736, %c16_737] : memref<1x1x2x72x32xbf16, #tpu.memory_space<vmem>>, vector<1x1x1x8x16xbf16>
    %438 = vector.shape_cast %437 : vector<1x1x1x8x16xbf16> to vector<8x16xbf16>
    %c0_738 = arith.constant 0 : index
    %c10_739 = arith.constant 10 : index
    %c16_740 = arith.constant 16 : index
    %c0_741 = arith.constant 0 : index
    %439 = vector.load %arg4[%c0_738, %c10_739, %c16_740, %c0_741] : memref<1x16x32x8xbf16, #tpu.memory_space<vmem>>, vector<1x1x16x8xbf16>
    %440 = vector.shape_cast %439 : vector<1x1x16x8xbf16> to vector<16x8xbf16>
    %c0_742 = arith.constant 0 : index
    %c0_743 = arith.constant 0 : index
    %441 = vector.load %arg6[%c0_742, %c0_743] : memref<8x8xf32, #tpu.memory_space<vmem>>, vector<8x8xf32>
    %cst_744 = arith.constant dense<0.000000e+00> : vector<8x8xf32>
    %442 = tpu.matmul %438, %440, %cst_744 {dimension_numbers = #tpu.dot_dimension_numbers<[1], [0], [0], [1], [0, 0, 1, 1], [], []>} : vector<8x16xbf16>, vector<16x8xbf16>, vector<8x8xf32> -> vector<8x8xf32>
    %443 = arith.addf %441, %442 : vector<8x8xf32>
    %c0_745 = arith.constant 0 : index
    %c0_746 = arith.constant 0 : index
    %444 = vector.load %arg6[%c0_745, %c0_746] : memref<8x8xf32, #tpu.memory_space<vmem>>, vector<8x8xf32>
    tpu.vector_store %arg6[%c0_745, %c0_746], %443 {strides = array<i32>} : memref<8x8xf32, #tpu.memory_space<vmem>>, vector<8x8xf32>,
    %c0_747 = arith.constant 0 : index
    %c0_748 = arith.constant 0 : index
    %c1_749 = arith.constant 1 : index
    %c48_750 = arith.constant 48 : index
    %c0_751 = arith.constant 0 : index
    %445 = vector.load %arg3[%c0_747, %c0_748, %c1_749, %c48_750, %c0_751] : memref<1x1x2x72x32xbf16, #tpu.memory_space<vmem>>, vector<1x1x1x8x16xbf16>
    %446 = vector.shape_cast %445 : vector<1x1x1x8x16xbf16> to vector<8x16xbf16>
    %c0_752 = arith.constant 0 : index
    %c11_753 = arith.constant 11 : index
    %c0_754 = arith.constant 0 : index
    %c0_755 = arith.constant 0 : index
    %447 = vector.load %arg4[%c0_752, %c11_753, %c0_754, %c0_755] : memref<1x16x32x8xbf16, #tpu.memory_space<vmem>>, vector<1x1x16x8xbf16>
    %448 = vector.shape_cast %447 : vector<1x1x16x8xbf16> to vector<16x8xbf16>
    %c0_756 = arith.constant 0 : index
    %c0_757 = arith.constant 0 : index
    %449 = vector.load %arg6[%c0_756, %c0_757] : memref<8x8xf32, #tpu.memory_space<vmem>>, vector<8x8xf32>
    %cst_758 = arith.constant dense<0.000000e+00> : vector<8x8xf32>
    %450 = tpu.matmul %446, %448, %cst_758 {dimension_numbers = #tpu.dot_dimension_numbers<[1], [0], [0], [1], [0, 0, 1, 1], [], []>} : vector<8x16xbf16>, vector<16x8xbf16>, vector<8x8xf32> -> vector<8x8xf32>
    %451 = arith.addf %449, %450 : vector<8x8xf32>
    %c0_759 = arith.constant 0 : index
    %c0_760 = arith.constant 0 : index
    %452 = vector.load %arg6[%c0_759, %c0_760] : memref<8x8xf32, #tpu.memory_space<vmem>>, vector<8x8xf32>
    tpu.vector_store %arg6[%c0_759, %c0_760], %451 {strides = array<i32>} : memref<8x8xf32, #tpu.memory_space<vmem>>, vector<8x8xf32>,
    %c0_761 = arith.constant 0 : index
    %c0_762 = arith.constant 0 : index
    %c1_763 = arith.constant 1 : index
    %c48_764 = arith.constant 48 : index
    %c16_765 = arith.constant 16 : index
    %453 = vector.load %arg3[%c0_761, %c0_762, %c1_763, %c48_764, %c16_765] : memref<1x1x2x72x32xbf16, #tpu.memory_space<vmem>>, vector<1x1x1x8x16xbf16>
    %454 = vector.shape_cast %453 : vector<1x1x1x8x16xbf16> to vector<8x16xbf16>
    %c0_766 = arith.constant 0 : index
    %c11_767 = arith.constant 11 : index
    %c16_768 = arith.constant 16 : index
    %c0_769 = arith.constant 0 : index
    %455 = vector.load %arg4[%c0_766, %c11_767, %c16_768, %c0_769] : memref<1x16x32x8xbf16, #tpu.memory_space<vmem>>, vector<1x1x16x8xbf16>
    %456 = vector.shape_cast %455 : vector<1x1x16x8xbf16> to vector<16x8xbf16>
    %c0_770 = arith.constant 0 : index
    %c0_771 = arith.constant 0 : index
    %457 = vector.load %arg6[%c0_770, %c0_771] : memref<8x8xf32, #tpu.memory_space<vmem>>, vector<8x8xf32>
    %cst_772 = arith.constant dense<0.000000e+00> : vector<8x8xf32>
    %458 = tpu.matmul %454, %456, %cst_772 {dimension_numbers = #tpu.dot_dimension_numbers<[1], [0], [0], [1], [0, 0, 1, 1], [], []>} : vector<8x16xbf16>, vector<16x8xbf16>, vector<8x8xf32> -> vector<8x8xf32>
    %459 = arith.addf %457, %458 : vector<8x8xf32>
    %c0_773 = arith.constant 0 : index
    %c0_774 = arith.constant 0 : index
    %460 = vector.load %arg6[%c0_773, %c0_774] : memref<8x8xf32, #tpu.memory_space<vmem>>, vector<8x8xf32>
    tpu.vector_store %arg6[%c0_773, %c0_774], %459 {strides = array<i32>} : memref<8x8xf32, #tpu.memory_space<vmem>>, vector<8x8xf32>,
    %c0_775 = arith.constant 0 : index
    %c0_776 = arith.constant 0 : index
    %c0_777 = arith.constant 0 : index
    %c56_778 = arith.constant 56 : index
    %c0_779 = arith.constant 0 : index
    %461 = vector.load %arg3[%c0_775, %c0_776, %c0_777, %c56_778, %c0_779] : memref<1x1x2x72x32xbf16, #tpu.memory_space<vmem>>, vector<1x1x1x8x16xbf16>
    %462 = vector.shape_cast %461 : vector<1x1x1x8x16xbf16> to vector<8x16xbf16>
    %c0_780 = arith.constant 0 : index
    %c12_781 = arith.constant 12 : index
    %c0_782 = arith.constant 0 : index
    %c0_783 = arith.constant 0 : index
    %463 = vector.load %arg4[%c0_780, %c12_781, %c0_782, %c0_783] : memref<1x16x32x8xbf16, #tpu.memory_space<vmem>>, vector<1x1x16x8xbf16>
    %464 = vector.shape_cast %463 : vector<1x1x16x8xbf16> to vector<16x8xbf16>
    %c0_784 = arith.constant 0 : index
    %c0_785 = arith.constant 0 : index
    %465 = vector.load %arg6[%c0_784, %c0_785] : memref<8x8xf32, #tpu.memory_space<vmem>>, vector<8x8xf32>
    %cst_786 = arith.constant dense<0.000000e+00> : vector<8x8xf32>
    %466 = tpu.matmul %462, %464, %cst_786 {dimension_numbers = #tpu.dot_dimension_numbers<[1], [0], [0], [1], [0, 0, 1, 1], [], []>} : vector<8x16xbf16>, vector<16x8xbf16>, vector<8x8xf32> -> vector<8x8xf32>
    %467 = arith.addf %465, %466 : vector<8x8xf32>
    %c0_787 = arith.constant 0 : index
    %c0_788 = arith.constant 0 : index
    %468 = vector.load %arg6[%c0_787, %c0_788] : memref<8x8xf32, #tpu.memory_space<vmem>>, vector<8x8xf32>
    tpu.vector_store %arg6[%c0_787, %c0_788], %467 {strides = array<i32>} : memref<8x8xf32, #tpu.memory_space<vmem>>, vector<8x8xf32>,
    %c0_789 = arith.constant 0 : index
    %c0_790 = arith.constant 0 : index
    %c0_791 = arith.constant 0 : index
    %c56_792 = arith.constant 56 : index
    %c16_793 = arith.constant 16 : index
    %469 = vector.load %arg3[%c0_789, %c0_790, %c0_791, %c56_792, %c16_793] : memref<1x1x2x72x32xbf16, #tpu.memory_space<vmem>>, vector<1x1x1x8x16xbf16>
    %470 = vector.shape_cast %469 : vector<1x1x1x8x16xbf16> to vector<8x16xbf16>
    %c0_794 = arith.constant 0 : index
    %c12_795 = arith.constant 12 : index
    %c16_796 = arith.constant 16 : index
    %c0_797 = arith.constant 0 : index
    %471 = vector.load %arg4[%c0_794, %c12_795, %c16_796, %c0_797] : memref<1x16x32x8xbf16, #tpu.memory_space<vmem>>, vector<1x1x16x8xbf16>
    %472 = vector.shape_cast %471 : vector<1x1x16x8xbf16> to vector<16x8xbf16>
    %c0_798 = arith.constant 0 : index
    %c0_799 = arith.constant 0 : index
    %473 = vector.load %arg6[%c0_798, %c0_799] : memref<8x8xf32, #tpu.memory_space<vmem>>, vector<8x8xf32>
    %cst_800 = arith.constant dense<0.000000e+00> : vector<8x8xf32>
    %474 = tpu.matmul %470, %472, %cst_800 {dimension_numbers = #tpu.dot_dimension_numbers<[1], [0], [0], [1], [0, 0, 1, 1], [], []>} : vector<8x16xbf16>, vector<16x8xbf16>, vector<8x8xf32> -> vector<8x8xf32>
    %475 = arith.addf %473, %474 : vector<8x8xf32>
    %c0_801 = arith.constant 0 : index
    %c0_802 = arith.constant 0 : index
    %476 = vector.load %arg6[%c0_801, %c0_802] : memref<8x8xf32, #tpu.memory_space<vmem>>, vector<8x8xf32>
    tpu.vector_store %arg6[%c0_801, %c0_802], %475 {strides = array<i32>} : memref<8x8xf32, #tpu.memory_space<vmem>>, vector<8x8xf32>,
    %c0_803 = arith.constant 0 : index
    %c0_804 = arith.constant 0 : index
    %c1_805 = arith.constant 1 : index
    %c56_806 = arith.constant 56 : index
    %c0_807 = arith.constant 0 : index
    %477 = vector.load %arg3[%c0_803, %c0_804, %c1_805, %c56_806, %c0_807] : memref<1x1x2x72x32xbf16, #tpu.memory_space<vmem>>, vector<1x1x1x8x16xbf16>
    %478 = vector.shape_cast %477 : vector<1x1x1x8x16xbf16> to vector<8x16xbf16>
    %c0_808 = arith.constant 0 : index
    %c13_809 = arith.constant 13 : index
    %c0_810 = arith.constant 0 : index
    %c0_811 = arith.constant 0 : index
    %479 = vector.load %arg4[%c0_808, %c13_809, %c0_810, %c0_811] : memref<1x16x32x8xbf16, #tpu.memory_space<vmem>>, vector<1x1x16x8xbf16>
    %480 = vector.shape_cast %479 : vector<1x1x16x8xbf16> to vector<16x8xbf16>
    %c0_812 = arith.constant 0 : index
    %c0_813 = arith.constant 0 : index
    %481 = vector.load %arg6[%c0_812, %c0_813] : memref<8x8xf32, #tpu.memory_space<vmem>>, vector<8x8xf32>
    %cst_814 = arith.constant dense<0.000000e+00> : vector<8x8xf32>
    %482 = tpu.matmul %478, %480, %cst_814 {dimension_numbers = #tpu.dot_dimension_numbers<[1], [0], [0], [1], [0, 0, 1, 1], [], []>} : vector<8x16xbf16>, vector<16x8xbf16>, vector<8x8xf32> -> vector<8x8xf32>
    %483 = arith.addf %481, %482 : vector<8x8xf32>
    %c0_815 = arith.constant 0 : index
    %c0_816 = arith.constant 0 : index
    %484 = vector.load %arg6[%c0_815, %c0_816] : memref<8x8xf32, #tpu.memory_space<vmem>>, vector<8x8xf32>
    tpu.vector_store %arg6[%c0_815, %c0_816], %483 {strides = array<i32>} : memref<8x8xf32, #tpu.memory_space<vmem>>, vector<8x8xf32>,
    %c0_817 = arith.constant 0 : index
    %c0_818 = arith.constant 0 : index
    %c1_819 = arith.constant 1 : index
    %c56_820 = arith.constant 56 : index
    %c16_821 = arith.constant 16 : index
    %485 = vector.load %arg3[%c0_817, %c0_818, %c1_819, %c56_820, %c16_821] : memref<1x1x2x72x32xbf16, #tpu.memory_space<vmem>>, vector<1x1x1x8x16xbf16>
    %486 = vector.shape_cast %485 : vector<1x1x1x8x16xbf16> to vector<8x16xbf16>
    %c0_822 = arith.constant 0 : index
    %c13_823 = arith.constant 13 : index
    %c16_824 = arith.constant 16 : index
    %c0_825 = arith.constant 0 : index
    %487 = vector.load %arg4[%c0_822, %c13_823, %c16_824, %c0_825] : memref<1x16x32x8xbf16, #tpu.memory_space<vmem>>, vector<1x1x16x8xbf16>
    %488 = vector.shape_cast %487 : vector<1x1x16x8xbf16> to vector<16x8xbf16>
    %c0_826 = arith.constant 0 : index
    %c0_827 = arith.constant 0 : index
    %489 = vector.load %arg6[%c0_826, %c0_827] : memref<8x8xf32, #tpu.memory_space<vmem>>, vector<8x8xf32>
    %cst_828 = arith.constant dense<0.000000e+00> : vector<8x8xf32>
    %490 = tpu.matmul %486, %488, %cst_828 {dimension_numbers = #tpu.dot_dimension_numbers<[1], [0], [0], [1], [0, 0, 1, 1], [], []>} : vector<8x16xbf16>, vector<16x8xbf16>, vector<8x8xf32> -> vector<8x8xf32>
    %491 = arith.addf %489, %490 : vector<8x8xf32>
    %c0_829 = arith.constant 0 : index
    %c0_830 = arith.constant 0 : index
    %492 = vector.load %arg6[%c0_829, %c0_830] : memref<8x8xf32, #tpu.memory_space<vmem>>, vector<8x8xf32>
    tpu.vector_store %arg6[%c0_829, %c0_830], %491 {strides = array<i32>} : memref<8x8xf32, #tpu.memory_space<vmem>>, vector<8x8xf32>,
    %c0_831 = arith.constant 0 : index
    %c0_832 = arith.constant 0 : index
    %c0_833 = arith.constant 0 : index
    %c64 = arith.constant 64 : index
    %c0_834 = arith.constant 0 : index
    %493 = vector.load %arg3[%c0_831, %c0_832, %c0_833, %c64, %c0_834] : memref<1x1x2x72x32xbf16, #tpu.memory_space<vmem>>, vector<1x1x1x8x16xbf16>
    %494 = vector.shape_cast %493 : vector<1x1x1x8x16xbf16> to vector<8x16xbf16>
    %c0_835 = arith.constant 0 : index
    %c14_836 = arith.constant 14 : index
    %c0_837 = arith.constant 0 : index
    %c0_838 = arith.constant 0 : index
    %495 = vector.load %arg4[%c0_835, %c14_836, %c0_837, %c0_838] : memref<1x16x32x8xbf16, #tpu.memory_space<vmem>>, vector<1x1x16x8xbf16>
    %496 = vector.shape_cast %495 : vector<1x1x16x8xbf16> to vector<16x8xbf16>
    %c0_839 = arith.constant 0 : index
    %c0_840 = arith.constant 0 : index
    %497 = vector.load %arg6[%c0_839, %c0_840] : memref<8x8xf32, #tpu.memory_space<vmem>>, vector<8x8xf32>
    %cst_841 = arith.constant dense<0.000000e+00> : vector<8x8xf32>
    %498 = tpu.matmul %494, %496, %cst_841 {dimension_numbers = #tpu.dot_dimension_numbers<[1], [0], [0], [1], [0, 0, 1, 1], [], []>} : vector<8x16xbf16>, vector<16x8xbf16>, vector<8x8xf32> -> vector<8x8xf32>
    %499 = arith.addf %497, %498 : vector<8x8xf32>
    %c0_842 = arith.constant 0 : index
    %c0_843 = arith.constant 0 : index
    %500 = vector.load %arg6[%c0_842, %c0_843] : memref<8x8xf32, #tpu.memory_space<vmem>>, vector<8x8xf32>
    tpu.vector_store %arg6[%c0_842, %c0_843], %499 {strides = array<i32>} : memref<8x8xf32, #tpu.memory_space<vmem>>, vector<8x8xf32>,
    %c0_844 = arith.constant 0 : index
    %c0_845 = arith.constant 0 : index
    %c0_846 = arith.constant 0 : index
    %c64_847 = arith.constant 64 : index
    %c16_848 = arith.constant 16 : index
    %501 = vector.load %arg3[%c0_844, %c0_845, %c0_846, %c64_847, %c16_848] : memref<1x1x2x72x32xbf16, #tpu.memory_space<vmem>>, vector<1x1x1x8x16xbf16>
    %502 = vector.shape_cast %501 : vector<1x1x1x8x16xbf16> to vector<8x16xbf16>
    %c0_849 = arith.constant 0 : index
    %c14_850 = arith.constant 14 : index
    %c16_851 = arith.constant 16 : index
    %c0_852 = arith.constant 0 : index
    %503 = vector.load %arg4[%c0_849, %c14_850, %c16_851, %c0_852] : memref<1x16x32x8xbf16, #tpu.memory_space<vmem>>, vector<1x1x16x8xbf16>
    %504 = vector.shape_cast %503 : vector<1x1x16x8xbf16> to vector<16x8xbf16>
    %c0_853 = arith.constant 0 : index
    %c0_854 = arith.constant 0 : index
    %505 = vector.load %arg6[%c0_853, %c0_854] : memref<8x8xf32, #tpu.memory_space<vmem>>, vector<8x8xf32>
    %cst_855 = arith.constant dense<0.000000e+00> : vector<8x8xf32>
    %506 = tpu.matmul %502, %504, %cst_855 {dimension_numbers = #tpu.dot_dimension_numbers<[1], [0], [0], [1], [0, 0, 1, 1], [], []>} : vector<8x16xbf16>, vector<16x8xbf16>, vector<8x8xf32> -> vector<8x8xf32>
    %507 = arith.addf %505, %506 : vector<8x8xf32>
    %c0_856 = arith.constant 0 : index
    %c0_857 = arith.constant 0 : index
    %508 = vector.load %arg6[%c0_856, %c0_857] : memref<8x8xf32, #tpu.memory_space<vmem>>, vector<8x8xf32>
    tpu.vector_store %arg6[%c0_856, %c0_857], %507 {strides = array<i32>} : memref<8x8xf32, #tpu.memory_space<vmem>>, vector<8x8xf32>,
    %c0_858 = arith.constant 0 : index
    %c0_859 = arith.constant 0 : index
    %c1_860 = arith.constant 1 : index
    %c64_861 = arith.constant 64 : index
    %c0_862 = arith.constant 0 : index
    %509 = vector.load %arg3[%c0_858, %c0_859, %c1_860, %c64_861, %c0_862] : memref<1x1x2x72x32xbf16, #tpu.memory_space<vmem>>, vector<1x1x1x8x16xbf16>
    %510 = vector.shape_cast %509 : vector<1x1x1x8x16xbf16> to vector<8x16xbf16>
    %c0_863 = arith.constant 0 : index
    %c15_864 = arith.constant 15 : index
    %c0_865 = arith.constant 0 : index
    %c0_866 = arith.constant 0 : index
    %511 = vector.load %arg4[%c0_863, %c15_864, %c0_865, %c0_866] : memref<1x16x32x8xbf16, #tpu.memory_space<vmem>>, vector<1x1x16x8xbf16>
    %512 = vector.shape_cast %511 : vector<1x1x16x8xbf16> to vector<16x8xbf16>
    %c0_867 = arith.constant 0 : index
    %c0_868 = arith.constant 0 : index
    %513 = vector.load %arg6[%c0_867, %c0_868] : memref<8x8xf32, #tpu.memory_space<vmem>>, vector<8x8xf32>
    %cst_869 = arith.constant dense<0.000000e+00> : vector<8x8xf32>
    %514 = tpu.matmul %510, %512, %cst_869 {dimension_numbers = #tpu.dot_dimension_numbers<[1], [0], [0], [1], [0, 0, 1, 1], [], []>} : vector<8x16xbf16>, vector<16x8xbf16>, vector<8x8xf32> -> vector<8x8xf32>
    %515 = arith.addf %513, %514 : vector<8x8xf32>
    %c0_870 = arith.constant 0 : index
    %c0_871 = arith.constant 0 : index
    %516 = vector.load %arg6[%c0_870, %c0_871] : memref<8x8xf32, #tpu.memory_space<vmem>>, vector<8x8xf32>
    tpu.vector_store %arg6[%c0_870, %c0_871], %515 {strides = array<i32>} : memref<8x8xf32, #tpu.memory_space<vmem>>, vector<8x8xf32>,
    %c0_872 = arith.constant 0 : index
    %c0_873 = arith.constant 0 : index
    %c1_874 = arith.constant 1 : index
    %c64_875 = arith.constant 64 : index
    %c16_876 = arith.constant 16 : index
    %517 = vector.load %arg3[%c0_872, %c0_873, %c1_874, %c64_875, %c16_876] : memref<1x1x2x72x32xbf16, #tpu.memory_space<vmem>>, vector<1x1x1x8x16xbf16>
    %518 = vector.shape_cast %517 : vector<1x1x1x8x16xbf16> to vector<8x16xbf16>
    %c0_877 = arith.constant 0 : index
    %c15_878 = arith.constant 15 : index
    %c16_879 = arith.constant 16 : index
    %c0_880 = arith.constant 0 : index
    %519 = vector.load %arg4[%c0_877, %c15_878, %c16_879, %c0_880] : memref<1x16x32x8xbf16, #tpu.memory_space<vmem>>, vector<1x1x16x8xbf16>
    %520 = vector.shape_cast %519 : vector<1x1x16x8xbf16> to vector<16x8xbf16>
    %c0_881 = arith.constant 0 : index
    %c0_882 = arith.constant 0 : index
    %521 = vector.load %arg6[%c0_881, %c0_882] : memref<8x8xf32, #tpu.memory_space<vmem>>, vector<8x8xf32>
    %cst_883 = arith.constant dense<0.000000e+00> : vector<8x8xf32>
    %522 = tpu.matmul %518, %520, %cst_883 {dimension_numbers = #tpu.dot_dimension_numbers<[1], [0], [0], [1], [0, 0, 1, 1], [], []>} : vector<8x16xbf16>, vector<16x8xbf16>, vector<8x8xf32> -> vector<8x8xf32>
    %523 = arith.addf %521, %522 : vector<8x8xf32>
    %c0_884 = arith.constant 0 : index
    %c0_885 = arith.constant 0 : index
    %524 = vector.load %arg6[%c0_884, %c0_885] : memref<8x8xf32, #tpu.memory_space<vmem>>, vector<8x8xf32>
    tpu.vector_store %arg6[%c0_884, %c0_885], %523 {strides = array<i32>} : memref<8x8xf32, #tpu.memory_space<vmem>>, vector<8x8xf32>,
    %c0_886 = arith.constant 0 : index
    %c0_887 = arith.constant 0 : index
    %525 = vector.load %arg6[%c0_886, %c0_887] : memref<8x8xf32, #tpu.memory_space<vmem>>, vector<8x8xf32>
    %cst_888 = arith.constant 0.000000e+00 : f32
    %526 = vector.broadcast %cst_888 : f32 to vector<8x8xf32>
    %527 = arith.cmpf oge, %525, %526 : vector<8x8xf32>
    %cst_889 = arith.constant 2.000000e-01 : f32
    %528 = vector.broadcast %cst_889 : f32 to vector<8x8xf32>
    %529 = arith.mulf %525, %528 : vector<8x8xf32>
    %530 = arith.select %527, %525, %529 : vector<8x8xi1>, vector<8x8xf32>
    %c0_890 = arith.constant 0 : index
    %c0_891 = arith.constant 0 : index
    %c8_892 = arith.constant 8 : index
    %c0_893 = arith.constant 0 : index
    %531 = vector.load %arg5[%c0_890, %c0_891, %c8_892, %c0_893] : memref<1x1x16x8xf32, #tpu.memory_space<vmem>>, vector<1x1x8x8xf32>
    %532 = vector.shape_cast %531 : vector<1x1x8x8xf32> to vector<8x8xf32>
    %533 = vector.shape_cast %530 : vector<8x8xf32> to vector<1x1x8x8xf32>
    tpu.vector_store %arg5[%c0_890, %c0_891, %c8_892, %c0_893], %533 {strides = array<i32>} : memref<1x1x16x8xf32, #tpu.memory_space<vmem>>, vector<1x1x8x8xf32>,
    return
  }
  func.func @transform_0(%arg0: i32, %arg1: i32, %arg2: i32) -> (i32, i32, i32, i32, i32) {
    %c0_i32 = arith.constant 0 : i32
    %c0_i32_0 = arith.constant 0 : i32
    %c0_i32_1 = arith.constant 0 : i32
    %c0_i32_2 = arith.constant 0 : i32
    return %arg0, %arg2, %c0_i32, %c0_i32_0, %c0_i32_1 : i32, i32, i32, i32, i32
  }
  func.func @transform_1(%arg0: i32, %arg1: i32, %arg2: i32) -> (i32, i32, i32, i32) {
    %c0_i32 = arith.constant 0 : i32
    %c0_i32_0 = arith.constant 0 : i32
    %c0_i32_1 = arith.constant 0 : i32
    %c0_i32_2 = arith.constant 0 : i32
    return %arg1, %c0_i32, %c0_i32_0, %c0_i32_1 : i32, i32, i32, i32
  }
  func.func @transform_2(%arg0: i32, %arg1: i32, %arg2: i32) -> (i32, i32, i32, i32) {
    %c0_i32 = arith.constant 0 : i32
    %c0_i32_0 = arith.constant 0 : i32
    return %arg0, %arg1, %arg2, %c0_i32 : i32, i32, i32, i32
  }
}

</mosaic_0001>

<bundles_post_ra>
// kernel: tpu_custom_call.1
= control target key start
LH: loop header
LB: loop body
LE: loop exit
PB: predicated region body
PF: predicated region fallthrough
CT: control target
= control target key end

     0   :  { %s5089_s9 = smov 0   ;;  %s5091_s10 = smov 0   ;;  %s5808_s0 = inlined_call_operand.vmem [shape: bf16[1,2,2,72,32], index: 0, kind: input, shape index: {}]   ;;  %s5809_s1 = inlined_call_operand.vmem [shape: bf16[2,16,32,8], index: 1, kind: input, shape index: {}]   ;;  %s5810_s2 = inlined_call_operand.vmem [shape: f32[1,2,32,8], index: 2, kind: output, shape index: {}]  }
   0x1   :  { %s5093_s11 = smov 0   ;;  %s5095_s12 = smov 0  }
   0x2   :  { %s5097_s13 = smov 0  }
   0x3 LB: > { %s24_s14 = sadd.s32 1, %s5061_s11  ;;  %s27_s15 = sadd.s32 1, %s5065_s12  ;;  %s5069_s13 = sphi %s5097_s13, %s12_s13   ;;  %s5065_s12 = sphi %s5095_s12, %s5814_s12   ;;  %s5061_s11 = sphi %s5093_s11, %s5813_s11   ;;  %s5057_s10 = sphi %s5091_s10, %s5812_s10   ;;  %s5053_s9 = sphi %s5089_s9, %s5811_s9  }
   0x4   : > { %p25_p0 = scmp.ge.s32.totalorder %s24_s14, 2  ;;  %p4057_p1 = scmp.ge.s32.totalorder %s5069_s13, 1 }
   0x5   : > { %p151_p2 = scmp.lt.s32.totalorder %s5069_s13, 5 }
   0x6   : > { %s5816_s14 = smov (%p25_p0, %s24_s14), 0  ;;  %s5818_s15 = smov (!%p25_p0, %s27_s15), %s5065_s12 }
   0x7   : > { %p152_p3 = pnand %p4057_p1, %p151_p2  ;;  %p29_p4 = scmp.ge.s32.totalorder %s5818_s15, 2 }
   0x8   : > { %p192_p5 = scmp.lt.s32.totalorder (!%p152_p3), %s5053_s9, 1  ;;  %v5071_v0 = vmov (!%p152_p3), 0.0   ;;  %p199_p6 = scmp.lt.s32.totalorder (!%p152_p3), %s5057_s10, 1  ;;  %vm5072_vm0 = vmmov (!%p152_p3), 0   ;;  %vm231_vm1 = vcmask (!%p152_p3), 130048   ;;  %vm219_vm2 = vcmask (!%p152_p3), 64512  }
   0x9   : > { %s5820_s15 = smov (%p29_p4, %s5818_s15), 0  ;;  %155 = sbr.rel (%p152_p3) target bundleno = 991 (0x3df), region = 28 }
   0xa   : > { %4507 = vmatprep.subr.bf16.mxu0 (!%p152_p3), %v5071_v0  ;;  %4509 = vmatprep.mubr.msk.bf16.mxu0 (!%p152_p3), %vm5072_vm0, %v5071_v0  ;;  %s5073_s25 = smov (!%p152_p3), 112   ;;  %220 = vst.msk [vmem:[#allocation2] sm:$0xff] (!%p152_p3), %vm219_vm2, %v5071_v0  ;;  %s4061_s26 = sshll.u32 (!%p152_p3), %s5053_s9, 1 }
   0xb   : > { %4513 = vmatprep.subr.bf16.mxu1 (!%p152_p3), %v5071_v0  ;;  %4515 = vmatprep.mubr.msk.bf16.mxu1 (!%p152_p3), %vm5072_vm0, %v5071_v0  ;;  %p209_p7 = scmp.lt.s32.totalorder (!%p152_p3), %s4061_s26, 3 }
  0x10   : > { %s193_s16 = scalar_select %p192_p5, %s5053_s9, 1 }
  0x11   : > { %s5822_s10 = smov (!%p199_p6, %s5057_s10), 1  ;;  %s5824_s26 = smov (!%p209_p7, %s4061_s26), 3 }
  0x12   : > { %s4891_s17 = smul.u32 72, %s193_s16  ;;  %s4378_s18 = sshll.u32 %s5822_s10, 8 }
  0x13   : > { %s5142_s24 = scalar_lea.vmem %s5809_s1, %s4378_s18  ;;  %s4062_s27 = sshll.u32 %s5822_s10, 2 }
  0x14   : > { %s5135_s21 = scalar_lea.vmem %s5808_s0, %s4891_s17  ;;  %v4941_v6 = vld [vmem:[%s5142_s24] sm:$0xff]   ;;  %v4942_v9 = vld [vmem:[%s5142_s24 + $0x8] sm:$0xff]   ;;  %v4944_v10 = vld [vmem:[%s5142_s24 + $0x10] sm:$0xff]   ;;  %s212_s28 = sadd.s32 %s4062_s27, %s5824_s26 }
  0x15   : > { %v4935_v1 = vld [vmem:[%s5135_s21] ss:$0 sps:$4 sm:$0xff]   ;;  %v4937_v2 = vld [vmem:[%s5135_s21 + $0x4] ss:$0 sps:$4 sm:$0xff]   ;;  %v4938_v4 = vld [vmem:[%s5135_s21 + $0x28] ss:$0 sps:$4 sm:$0xff]   ;;  %4508 = vmatpush3.bf16.msra.mxu0 %v4941_v6  ;;  %4514 = vmatpush3.bf16.msra.mxu1 %v4942_v9 }
  0x16   : > { %284 = vrot.lane.b32.xlu0 %v4935_v1, %s5073_s25  ;;  %v4936_v3 = vld [vmem:[%s5135_s21 + $0x24] ss:$0 sps:$4 sm:$0xff]   ;;  %517 = vrot.lane.b32.xlu1 %v4937_v2, %s5073_s25  ;;  %v4939_v5 = vld [vmem:[%s5135_s21 + $0x8] ss:$0 sps:$4 sm:$0xff]   ;;  %s4063_s29 = sshll.u32 %s212_s28, 3 }
  0x17   : > { %v4940_v7 = vld [vmem:[%s5135_s21 + $0x2c] ss:$0 sps:$4 sm:$0xff]   ;;  %v221_v8 = vld [vmem:[%s5135_s21] sm:$0xf]  ;;  %4519 = vmatprep.subr.bf16.mxu0 %v5071_v0  ;;  %4525 = vmatprep.subr.bf16.mxu1 %v5071_v0  ;;  %v4946_v12 = vld [vmem:[%s5135_s21 + $0x30] ss:$0 sps:$4 sm:$0xff]   ;;  %s5700_s4 = scalar_lea.vmem %s5810_s2, %s4063_s29 }
  0x18   : > { %4510 = vmatmul.mubr.msk.bf16.vlgmr.msra.gmra.mrb[0].mxu0 %vm231_vm1, %v221_v8  ;;  %v4943_v11 = vld [vmem:[%s5135_s21 + $0xc] ss:$0 sps:$4 sm:$0xff]   ;;  %v4069_v13 = vld [vmem:[%s5135_s21 + $0x24] sm:$0xf]  ;;  %v4949_v15 = vld [vmem:[%s5135_s21 + $0x10] ss:$0 sps:$4 sm:$0xff]  }
  0x19   : > { %4520 = vmatpush3.bf16.msra.mxu0 %v4944_v10  ;;  %4521 = vmatprep.mubr.msk.bf16.mxu0 %vm5072_vm0, %v5071_v0  ;;  %v4947_v14 = vld [vmem:[%s5142_s24 + $0x20] sm:$0xff]   ;;  %v4952_v16 = vld [vmem:[%s5135_s21 + $0x34] ss:$0 sps:$4 sm:$0xff]   ;;  %v4089_v20 = vld [vmem:[%s5135_s21 + $0x28] sm:$0xf] }
  0x1a   : > { %401 = vrot.lane.b32.xlu0 %v4936_v3, %s5073_s25  ;;  %633 = vrot.lane.b32.xlu1 %v4938_v4, %s5073_s25  ;;  %v454_v17 = vld [vmem:[%s5135_s21 + $0x4] sm:$0xf]  ;;  %v4955_v18 = vld [vmem:[%s5135_s21 + $0x14] ss:$0 sps:$4 sm:$0xff]  }
  0x1b   : > { %4531 = vmatprep.subr.bf16.mxu0 %v5071_v0  ;;  %v4950_v19 = vld [vmem:[%s5142_s24 + $0x30] sm:$0xff]   ;;  %v4958_v21 = vld [vmem:[%s5135_s21 + $0x38] ss:$0 sps:$4 sm:$0xff]   ;;  %v4953_v22 = vld [vmem:[%s5142_s24 + $0x40] sm:$0xff]  }
  0x1c   : > { %v686_v23 = vld [vmem:[%s5135_s21 + $0x8] sm:$0xf]  ;;  %v4961_v24 = vld [vmem:[%s5135_s21 + $0x18] ss:$0 sps:$4 sm:$0xff]   ;;  %v4956_v25 = vld [vmem:[%s5142_s24 + $0x50] sm:$0xff]  }
  0x1d   : > { %v4109_v26 = vld [vmem:[%s5135_s21 + $0x2c] sm:$0xf]  ;;  %v4964_v27 = vld [vmem:[%s5135_s21 + $0x3c] ss:$0 sps:$4 sm:$0xff]   ;;  %v4959_v28 = vld [vmem:[%s5142_s24 + $0x60] sm:$0xff]  }
  0x1e   : > { %749 = vrot.lane.b32.xlu0 %v4939_v5, %s5073_s25  ;;  %865 = vrot.lane.b32.xlu1 %v4940_v7, %s5073_s25  ;;  %v918_v29 = vld [vmem:[%s5135_s21 + $0xc] sm:$0xf]  ;;  %v4967_v30 = vld [vmem:[%s5135_s21 + $0x1c] ss:$0 sps:$4 sm:$0xff]   ;;  %v224_v6 = vld [vmem:[#allocation2] sm:$0xff] }
  0x1f   : > { %v4962_v31 = vld [vmem:[%s5142_s24 + $0x70] sm:$0xff]   ;;  %v4970_v33 = vld [vmem:[%s5135_s21 + $0x40] ss:$0 sps:$4 sm:$0xff]   ;;  %v4974_v41 = vld [vmem:[%s5135_s21 + $0x4] ss:$0 sps:$4 sm:$0xff]  }
  0x20   : > { %4522 = vmatmul.mubr.msk.bf16.vlgmr.msra.gmra.mrb[4].mxu0 %vm231_vm1, %v4069_v13  ;;  %v4129_v32 = vld [vmem:[%s5135_s21 + $0x30] sm:$0xf]  ;;  %v4965_v34 = vld [vmem:[%s5142_s24 + $0x80] sm:$0xff]   ;;  %v4149_v37 = vld [vmem:[%s5135_s21 + $0x34] sm:$0xf] }
  0x21   : > { %4532 = vmatpush3.bf16.msra.mxu0 %v4947_v14  ;;  %4533 = vmatprep.mubr.msk.bf16.mxu0 %vm5072_vm0, %v5071_v0  ;;  %v1150_v35 = vld [vmem:[%s5135_s21 + $0x10] sm:$0xf]  ;;  %v4971_v38 = vld [vmem:[%s5142_s24 + $0xa0] sm:$0xff]   ;;  %v1382_v39 = vld [vmem:[%s5135_s21 + $0x14] sm:$0xf] }
  0x22   : > { %981 = vrot.lane.b32.xlu0 %v4943_v11, %s5073_s25  ;;  %1097 = vrot.lane.b32.xlu1 %v4946_v12, %s5073_s25  ;;  %v4968_v36 = vld [vmem:[%s5142_s24 + $0x90] sm:$0xff]   ;;  %v4169_v42 = vld [vmem:[%s5135_s21 + $0x38] sm:$0xf] }
  0x23   : > { %4543 = vmatprep.subr.bf16.mxu0 %v5071_v0  ;;  %v4973_v40 = vld [vmem:[%s5142_s24 + $0xb0] sm:$0xff]   ;;  %v4945_v43 = vld [vmem:[%s5142_s24 + $0x18] sm:$0xff]   ;;  %v4948_v46 = vld [vmem:[%s5142_s24 + $0x28] sm:$0xff]  }
  0x24   : > { %v4951_v48 = vld [vmem:[%s5142_s24 + $0x38] sm:$0xff]   ;;  %v4954_v50 = vld [vmem:[%s5142_s24 + $0x48] sm:$0xff]   ;;  %v4976_v3 = vld [vmem:[%s5142_s24 + $0xc0] sm:$0xff]  }
  0x25   : > { %v4957_v52 = vld [vmem:[%s5142_s24 + $0x58] sm:$0xff]   ;;  %v4960_v54 = vld [vmem:[%s5142_s24 + $0x68] sm:$0xff]  }
  0x26   : > { %1213 = vrot.lane.b32.xlu0 %v4949_v15, %s5073_s25  ;;  %1329 = vrot.lane.b32.xlu1 %v4952_v16, %s5073_s25  ;;  %v4963_v56 = vld [vmem:[%s5142_s24 + $0x78] sm:$0xff]   ;;  %v4966_v58 = vld [vmem:[%s5142_s24 + $0x88] sm:$0xff]  }
  0x27   : > { %v4969_v60 = vld [vmem:[%s5142_s24 + $0x98] sm:$0xff]   ;;  %v4972_v62 = vld [vmem:[%s5142_s24 + $0xa8] sm:$0xff]  }
  0x28   : > { %4534 = vmatmul.mubr.msk.bf16.vlgmr.msra.gmra.mrb[8].mxu0 %vm231_vm1, %v454_v17  ;;  %v4975_v1 = vld [vmem:[%s5142_s24 + $0xb8] sm:$0xff]   ;;  %v4977_v5 = vld [vmem:[%s5135_s21 + $0x28] ss:$0 sps:$4 sm:$0xff]  }
  0x29   : > { %4544 = vmatpush3.bf16.msra.mxu0 %v4950_v19  ;;  %4545 = vmatprep.mubr.msk.bf16.mxu0 %vm5072_vm0, %v5071_v0  ;;  %v1614_v4 = vld [vmem:[%s5135_s21 + $0x18] sm:$0xf]  ;;  %v4978_v10 = vld [vmem:[%s5142_s24 + $0xc8] sm:$0xff]   ;;  %v4189_v19 = vld [vmem:[%s5135_s21 + $0x3c] sm:$0xf] }
  0x2a   : > { %1445 = vrot.lane.b32.xlu0 %v4955_v18, %s5073_s25  ;;  %4555 = vmatprep.subr.bf16.mxu0 %v5071_v0  ;;  %v4979_v18 = vld [vmem:[%s5142_s24 + $0xd0] sm:$0xff]  }
  0x2b   : > { %1561 = vrot.lane.b32.xlu1 %v4958_v21, %s5073_s25 }
  0x2e   : > { %1677 = vrot.lane.b32.xlu0 %v4961_v24, %s5073_s25 }
  0x2f   : > { %1793 = vrot.lane.b32.xlu1 %v4964_v27, %s5073_s25 }
  0x30   : > { %4546 = vmatmul.mubr.msk.bf16.vlgmr.msra.gmra.mrb[12].mxu0 %vm231_vm1, %v4089_v20 }
  0x31   : > { %4556 = vmatpush3.bf16.msra.mxu0 %v4953_v22  ;;  %4557 = vmatprep.mubr.msk.bf16.mxu0 %vm5072_vm0, %v5071_v0  ;;  %v4980_v22 = vld [vmem:[%s5135_s21 + $0x8] ss:$0 sps:$4 sm:$0xff]  }
  0x32   : > { %4567 = vmatprep.subr.bf16.mxu0 %v5071_v0  ;;  %1909 = vrot.lane.b32.xlu0 %v4967_v30, %s5073_s25 }
  0x33   : > { %2025 = vrot.lane.b32.xlu1 %v4970_v33, %s5073_s25  ;;  %v4983_v33 = vld [vmem:[%s5135_s21 + $0x2c] ss:$0 sps:$4 sm:$0xff]  }
  0x36   : > { %2146 = vrot.lane.b32.xlu0 %v4974_v41, %s5073_s25  ;;  %v4209_v41 = vld [vmem:[%s5135_s21 + $0x40] sm:$0xf] }
  0x37   : > { %2261 = vrot.lane.b32.xlu1 %v4977_v5, %s5073_s25  ;;  %v4993_v5 = vld [vmem:[%s5142_s24 + $0x18] sm:$0xff]  }
  0x38   : > { %4558 = vmatmul.mubr.msk.bf16.vlgmr.msra.gmra.mrb[16].mxu0 %vm231_vm1, %v686_v23 }
  0x39   : > { %4568 = vmatpush3.bf16.msra.mxu0 %v4956_v25  ;;  %4569 = vmatprep.mubr.msk.bf16.mxu0 %vm5072_vm0, %v5071_v0  ;;  %v4981_v25 = vld [vmem:[%s5142_s24 + $0xd8] sm:$0xff]  }
  0x3a   : > { %4579 = vmatprep.subr.bf16.mxu0 %v5071_v0  ;;  %2376 = vrot.lane.b32.xlu0 %v4980_v22, %s5073_s25 }
  0x3b   : > { %2491 = vrot.lane.b32.xlu1 %v4983_v33, %s5073_s25 }
  0x40   : > { %4570 = vmatmul.mubr.msk.bf16.vlgmr.msra.gmra.mrb[20].mxu0 %vm231_vm1, %v4109_v26 }
  0x41   : > { %4580 = vmatpush3.bf16.msra.mxu0 %v4959_v28  ;;  %4581 = vmatprep.mubr.msk.bf16.mxu0 %vm5072_vm0, %v5071_v0 }
  0x42   : > { %4591 = vmatprep.subr.bf16.mxu0 %v5071_v0 }
  0x48   : > { %4582 = vmatmul.mubr.msk.bf16.vlgmr.msra.gmra.mrb[24].mxu0 %vm231_vm1, %v918_v29 }
  0x49   : > { %4592 = vmatpush3.bf16.msra.mxu0 %v4962_v31  ;;  %4593 = vmatprep.mubr.msk.bf16.mxu0 %vm5072_vm0, %v5071_v0  ;;  %v4982_v31 = vld [vmem:[%s5142_s24 + $0xe0] sm:$0xff]  }
  0x4a   : > { %4603 = vmatprep.subr.bf16.mxu0 %v5071_v0 }
  0x50   : > { %4594 = vmatmul.mubr.msk.bf16.vlgmr.msra.gmra.mrb[28].mxu0 %vm231_vm1, %v4129_v32  ;;  %v1846_v32 = vld [vmem:[%s5135_s21 + $0x1c] sm:$0xf] }
  0x51   : > { %4604 = vmatpush3.bf16.msra.mxu0 %v4965_v34  ;;  %4605 = vmatprep.mubr.msk.bf16.mxu0 %vm5072_vm0, %v5071_v0  ;;  %v4984_v34 = vld [vmem:[%s5142_s24 + $0xe8] sm:$0xff]  }
  0x52   : > { %4615 = vmatprep.subr.bf16.mxu0 %v5071_v0 }
  0x58   : > { %4606 = vmatmul.mubr.msk.bf16.vlgmr.msra.gmra.mrb[32].mxu0 %vm231_vm1, %v1150_v35 }
  0x59   : > { %4616 = vmatpush3.bf16.msra.mxu0 %v4968_v36  ;;  %4617 = vmatprep.mubr.msk.bf16.mxu0 %vm5072_vm0, %v5071_v0 }
  0x5a   : > { %4627 = vmatprep.subr.bf16.mxu0 %v5071_v0 }
  0x60   : > { %4618 = vmatmul.mubr.msk.bf16.vlgmr.msra.gmra.mrb[36].mxu0 %vm231_vm1, %v4149_v37 }
  0x61   : > { %4628 = vmatpush3.bf16.msra.mxu0 %v4971_v38  ;;  %4629 = vmatprep.mubr.msk.bf16.mxu0 %vm5072_vm0, %v5071_v0 }
  0x62   : > { %4639 = vmatprep.subr.bf16.mxu0 %v5071_v0 }
  0x68   : > { %4630 = vmatmul.mubr.msk.bf16.vlgmr.msra.gmra.mrb[40].mxu0 %vm231_vm1, %v1382_v39 }
  0x69   : > { %4641 = vmatprep.mubr.msk.bf16.mxu0 %vm5072_vm0, %v5071_v0  ;;  %4640 = vmatpush3.bf16.msra.mxu0 %v4973_v40  ;;  %v4985_v40 = vld [vmem:[%s5142_s24 + $0xf0] sm:$0xff]  }
  0x6a   : > { %4651 = vmatprep.subr.bf16.mxu0 %v5071_v0 }
  0x70   : > { %4642 = vmatmul.mubr.msk.bf16.vlgmr.msra.gmra.mrb[44].mxu0 %vm231_vm1, %v4169_v42  ;;  %v4986_v42 = vld [vmem:[%s5135_s21 + $0xc] ss:$0 sps:$4 sm:$0xff]  }
  0x71   : > { %4653 = vmatprep.mubr.msk.bf16.mxu0 %vm5072_vm0, %v5071_v0  ;;  %4652 = vmatpush3.bf16.msra.mxu0 %v4976_v3 }
  0x72   : > { %4663 = vmatprep.subr.bf16.mxu0 %v5071_v0  ;;  %2606 = vrot.lane.b32.xlu0 %v4986_v42, %s5073_s25 }
  0x78   : > { %4654 = vmatmul.mubr.msk.bf16.vlgmr.msra.gmra.mrb[48].mxu0 %vm231_vm1, %v1614_v4 }
  0x79   : > { %4665 = vmatprep.mubr.msk.bf16.mxu0 %vm5072_vm0, %v5071_v0  ;;  %4664 = vmatpush3.bf16.msra.mxu0 %v4979_v18  ;;  %v4995_v18 = vld [vmem:[%s5142_s24 + $0x20] sm:$0xff]  }
  0x7a   : > { %4675 = vmatprep.subr.bf16.mxu0 %v5071_v0 }
  0x80   : > { %4666 = vmatmul.mubr.msk.bf16.vlgmr.msra.gmra.mrb[52].mxu0 %vm231_vm1, %v4189_v19  ;;  %v2314_v19 = vld [vmem:[%s5135_s21 + $0x8] sm:$0xf] }
  0x81   : > { %4677 = vmatprep.mubr.msk.bf16.mxu0 %vm5072_vm0, %v5071_v0  ;;  %4676 = vmatpush3.bf16.msra.mxu0 %v4982_v31 }
  0x82   : > { %4687 = vmatprep.subr.bf16.mxu0 %v5071_v0 }
  0x88   : > { %v285_v44 = vpop.permute.xlu0 %284  ;;  %v518_v47 = vpop.permute.xlu1 %517  ;;  %4678 = vmatmul.mubr.msk.bf16.vlgmr.msra.gmra.mrb[56].mxu0 %vm231_vm1, %v1846_v32 }
  0x89   : > { %4516 = vmatmul.mubr.msk.bf16.vlgmr.msra.gmra.mrb[0].mxu1 %vm231_vm1, %v285_v44  ;;  %4689 = vmatprep.mubr.msk.bf16.mxu0 %vm5072_vm0, %v5071_v0 }
  0x8a   : > { %4526 = vmatpush3.bf16.msra.mxu1 %v4945_v43  ;;  %4527 = vmatprep.mubr.msk.bf16.mxu1 %vm5072_vm0, %v5071_v0  ;;  %v4987_v43 = vld [vmem:[%s5142_s24 + $0xf8] sm:$0xff]  }
  0x8b   : > { %4537 = vmatprep.subr.bf16.mxu1 %v5071_v0  ;;  %4688 = vmatpush3.bf16.msra.mxu0 %v4985_v40 }
  0x8c   : > { %v402_v45 = vpop.permute.xlu0 %401  ;;  %v634_v49 = vpop.permute.xlu1 %633  ;;  %4699 = vmatprep.subr.bf16.mxu0 %v5071_v0 }
  0x90   : > { %v750_v51 = vpop.permute.xlu0 %749  ;;  %v866_v53 = vpop.permute.xlu1 %865  ;;  %4690 = vmatmul.mubr.msk.bf16.vlgmr.msra.gmra.mrb[60].mxu0 %vm231_vm1, %v4209_v41  ;;  %v4998_v41 = vld [vmem:[%s5142_s24 + $0x30] sm:$0xff]  }
  0x91   : > { %4528 = vmatmul.mubr.msk.bf16.vlgmr.msra.gmra.mrb[4].mxu1 %vm231_vm1, %v402_v45  ;;  %4701 = vmatprep.mubr.msk.bf16.mxu0 %vm5072_vm0, %v5071_v0 }
  0x92   : > { %4538 = vmatpush3.bf16.msra.mxu1 %v4948_v46  ;;  %4539 = vmatprep.mubr.msk.bf16.mxu1 %vm5072_vm0, %v5071_v0 }
  0x93   : > { %4549 = vmatprep.subr.bf16.mxu1 %v5071_v0 }
  0x94   : > { %v982_v55 = vpop.permute.xlu0 %981  ;;  %v1098_v57 = vpop.permute.xlu1 %1097 }
  0x98   : > { %v1214_v59 = vpop.permute.xlu0 %1213  ;;  %v1330_v61 = vpop.permute.xlu1 %1329 }
  0x99   : > { %4540 = vmatmul.mubr.msk.bf16.vlgmr.msra.gmra.mrb[8].mxu1 %vm231_vm1, %v518_v47 }
  0x9a   : > { %4550 = vmatpush3.bf16.msra.mxu1 %v4951_v48  ;;  %4551 = vmatprep.mubr.msk.bf16.mxu1 %vm5072_vm0, %v5071_v0 }
  0x9b   : > { %4561 = vmatprep.subr.bf16.mxu1 %v5071_v0 }
  0x9c   : > { %v1446_v63 = vpop.permute.xlu0 %1445 }
  0x9d   : > { %v1562_v2 = vpop.permute.xlu1 %1561 }
  0xa0   : > { %v1678_v13 = vpop.permute.xlu0 %1677 }
  0xa1   : > { %4552 = vmatmul.mubr.msk.bf16.vlgmr.msra.gmra.mrb[12].mxu1 %vm231_vm1, %v634_v49  ;;  %v1794_v26 = vpop.permute.xlu1 %1793  ;;  %v4988_v49 = vld [vmem:[%s5135_s21 + $0x30] ss:$0 sps:$4 sm:$0xff]  }
  0xa2   : > { %4562 = vmatpush3.bf16.msra.mxu1 %v4954_v50  ;;  %4563 = vmatprep.mubr.msk.bf16.mxu1 %vm5072_vm0, %v5071_v0  ;;  %v4989_v50 = vld [vmem:[%s5142_s24] sm:$0xff]  }
  0xa3   : > { %4573 = vmatprep.subr.bf16.mxu1 %v5071_v0  ;;  %2721 = vrot.lane.b32.xlu1 %v4988_v49, %s5073_s25 }
  0xa4   : > { %v1910_v35 = vpop.permute.xlu0 %1909  ;;  %4700 = vmatpush3.bf16.msra.mxu0 %v4989_v50 }
  0xa5   : > { %v2026_v44 = vpop.permute.xlu1 %2025  ;;  %4711 = vmatprep.subr.bf16.mxu0 %v5071_v0 }
  0xa9   : > { %4564 = vmatmul.mubr.msk.bf16.vlgmr.msra.gmra.mrb[16].mxu1 %vm231_vm1, %v750_v51  ;;  %v2084_v51 = vld [vmem:[%s5135_s21 + $0x4] sm:$0xf] }
  0xaa   : > { %4574 = vmatpush3.bf16.msra.mxu1 %v4957_v52  ;;  %4575 = vmatprep.mubr.msk.bf16.mxu1 %vm5072_vm0, %v5071_v0 }
  0xab   : > { %4585 = vmatprep.subr.bf16.mxu1 %v5071_v0  ;;  %4702 = vmatmul.mubr.msk.bf16.vlgmr.msra.gmra.mrb[64].mxu0 %vm231_vm1, %v2084_v51 }
  0xac   : > { %4713 = vmatprep.mubr.msk.bf16.mxu0 %vm5072_vm0, %v5071_v0 }
  0xb1   : > { %4576 = vmatmul.mubr.msk.bf16.vlgmr.msra.gmra.mrb[20].mxu1 %vm231_vm1, %v866_v53 }
  0xb2   : > { %4586 = vmatpush3.bf16.msra.mxu1 %v4960_v54  ;;  %4587 = vmatprep.mubr.msk.bf16.mxu1 %vm5072_vm0, %v5071_v0 }
  0xb3   : > { %4597 = vmatprep.subr.bf16.mxu1 %v5071_v0 }
  0xb9   : > { %4588 = vmatmul.mubr.msk.bf16.vlgmr.msra.gmra.mrb[24].mxu1 %vm231_vm1, %v982_v55  ;;  %v4990_v55 = vld [vmem:[%s5142_s24 + $0x8] sm:$0xff]  }
  0xba   : > { %4598 = vmatpush3.bf16.msra.mxu1 %v4963_v56  ;;  %4599 = vmatprep.mubr.msk.bf16.mxu1 %vm5072_vm0, %v5071_v0 }
  0xbb   : > { %4609 = vmatprep.subr.bf16.mxu1 %v5071_v0 }
  0xc1   : > { %4600 = vmatmul.mubr.msk.bf16.vlgmr.msra.gmra.mrb[28].mxu1 %vm231_vm1, %v1098_v57  ;;  %v2147_v57 = vpop.permute.xlu0 %2146 }
  0xc2   : > { %4610 = vmatpush3.bf16.msra.mxu1 %v4966_v58  ;;  %4611 = vmatprep.mubr.msk.bf16.mxu1 %vm5072_vm0, %v5071_v0  ;;  %v4991_v58 = vld [vmem:[%s5135_s21 + $0x10] ss:$0 sps:$4 sm:$0xff]  }
  0xc3   : > { %4621 = vmatprep.subr.bf16.mxu1 %v5071_v0  ;;  %2836 = vrot.lane.b32.xlu0 %v4991_v58, %s5073_s25 }
  0xc9   : > { %4612 = vmatmul.mubr.msk.bf16.vlgmr.msra.gmra.mrb[32].mxu1 %vm231_vm1, %v1214_v59  ;;  %v4992_v59 = vld [vmem:[%s5142_s24 + $0x10] sm:$0xff]  }
  0xca   : > { %4622 = vmatpush3.bf16.msra.mxu1 %v4969_v60  ;;  %4623 = vmatprep.mubr.msk.bf16.mxu1 %vm5072_vm0, %v5071_v0  ;;  %v4225_v60 = vld [vmem:[%s5135_s21 + $0x28] sm:$0xf] }
  0xcb   : > { %4633 = vmatprep.subr.bf16.mxu1 %v5071_v0  ;;  %4712 = vmatpush3.bf16.msra.mxu0 %v4992_v59 }
  0xcc   : > { %4723 = vmatprep.subr.bf16.mxu0 %v5071_v0 }
  0xce   : > { %4714 = vmatmul.mubr.msk.bf16.vlgmr.msra.gmra.mrb[68].mxu0 %vm231_vm1, %v4225_v60 }
  0xcf   : > { %4725 = vmatprep.mubr.msk.bf16.mxu0 %vm5072_vm0, %v5071_v0  ;;  %4724 = vmatpush3.bf16.msra.mxu0 %v4995_v18 }
  0xd0   : > { %4735 = vmatprep.subr.bf16.mxu0 %v5071_v0 }
  0xd1   : > { %4624 = vmatmul.mubr.msk.bf16.vlgmr.msra.gmra.mrb[36].mxu1 %vm231_vm1, %v1330_v61 }
  0xd2   : > { %4634 = vmatpush3.bf16.msra.mxu1 %v4972_v62  ;;  %4635 = vmatprep.mubr.msk.bf16.mxu1 %vm5072_vm0, %v5071_v0 }
  0xd3   : > { %4645 = vmatprep.subr.bf16.mxu1 %v5071_v0 }
  0xd6   : > { %4726 = vmatmul.mubr.msk.bf16.vlgmr.msra.gmra.mrb[72].mxu0 %vm231_vm1, %v2314_v19 }
  0xd7   : > { %4737 = vmatprep.mubr.msk.bf16.mxu0 %vm5072_vm0, %v5071_v0  ;;  %4736 = vmatpush3.bf16.msra.mxu0 %v4998_v41  ;;  %v5005_v41 = vld [vmem:[%s5142_s24 + $0x58] sm:$0xff]  }
  0xd8   : > { %4747 = vmatprep.subr.bf16.mxu0 %v5071_v0 }
  0xd9   : > { %4636 = vmatmul.mubr.msk.bf16.vlgmr.msra.gmra.mrb[40].mxu1 %vm231_vm1, %v1446_v63 }
  0xda   : > { %4647 = vmatprep.mubr.msk.bf16.mxu1 %vm5072_vm0, %v5071_v0  ;;  %4646 = vmatpush3.bf16.msra.mxu1 %v4975_v1 }
  0xdb   : > { %4657 = vmatprep.subr.bf16.mxu1 %v5071_v0 }
  0xe1   : > { %4648 = vmatmul.mubr.msk.bf16.vlgmr.msra.gmra.mrb[44].mxu1 %vm231_vm1, %v1562_v2 }
  0xe2   : > { %4659 = vmatprep.mubr.msk.bf16.mxu1 %vm5072_vm0, %v5071_v0  ;;  %4658 = vmatpush3.bf16.msra.mxu1 %v4978_v10 }
  0xe3   : > { %4669 = vmatprep.subr.bf16.mxu1 %v5071_v0 }
  0xe9   : > { %4660 = vmatmul.mubr.msk.bf16.vlgmr.msra.gmra.mrb[48].mxu1 %vm231_vm1, %v1678_v13 }
  0xea   : > { %4671 = vmatprep.mubr.msk.bf16.mxu1 %vm5072_vm0, %v5071_v0  ;;  %4670 = vmatpush3.bf16.msra.mxu1 %v4981_v25 }
  0xeb   : > { %v269_v7 = vpop.f32.mrb[0].mxu0  ;;  %4681 = vmatprep.subr.bf16.mxu1 %v5071_v0 }
  0xec   : > { %v275_v8 = vadd.f32 %v269_v7, %v224_v6  ;;  %v4511_v9 = vpop.f32.mrb[1].mxu0 }
  0xed   : > { %v272_v11 = vpop.f32.mrb[2].mxu0  ;;  %v2262_v9 = vpop.permute.xlu1 %2261 }
  0xee   : > { %276 = vst.msk [vmem:[#allocation2] sm:$0xff] %vm219_vm2, %v275_v8  ;;  %v4512_v12 = vpop.f32.mrb[3].mxu0 }
  0xef   : > { %v4994_v12 = vld [vmem:[%s5135_s21 + $0x34] ss:$0 sps:$4 sm:$0xff]  }
  0xf0   : > { %2951 = vrot.lane.b32.xlu1 %v4994_v12, %s5073_s25 }
  0xf1   : > { %4672 = vmatmul.mubr.msk.bf16.vlgmr.msra.gmra.mrb[52].mxu1 %vm231_vm1, %v1794_v26  ;;  %v2492_v59 = vpop.permute.xlu1 %2491 }
  0xf2   : > { %4683 = vmatprep.mubr.msk.bf16.mxu1 %vm5072_vm0, %v5071_v0  ;;  %4682 = vmatpush3.bf16.msra.mxu1 %v4984_v34  ;;  %v2377_v34 = vpop.permute.xlu0 %2376 }
  0xf3   : > { %v5324_v14 = vpop.f32.mrb[4].mxu0  ;;  %4693 = vmatprep.subr.bf16.mxu1 %v5071_v0 }
  0xf4   : > { %v4523_v15 = vpop.f32.mrb[5].mxu0 }
  0xf5   : > { %v389_v16 = vpop.f32.mrb[6].mxu0  ;;  %v280_v61 = vld [vmem:[#allocation2] sm:$0xff] }
  0xf6   : > { %v4524_v17 = vpop.f32.mrb[7].mxu0 }
  0xf9   : > { %4684 = vmatmul.mubr.msk.bf16.vlgmr.msra.gmra.mrb[56].mxu1 %vm231_vm1, %v1910_v35 }
  0xfa   : > { %4695 = vmatprep.mubr.msk.bf16.mxu1 %vm5072_vm0, %v5071_v0  ;;  %4694 = vmatpush3.bf16.msra.mxu1 %v4987_v43 }
  0xfb   : > { %v5329_v20 = vpop.f32.mrb[8].mxu0  ;;  %4705 = vmatprep.subr.bf16.mxu1 %v5071_v0 }
  0xfc   : > { %v4535_v21 = vpop.f32.mrb[9].mxu0 }
  0xfd   : > { %v505_v23 = vpop.f32.mrb[10].mxu0 }
  0xfe   : > { %v4536_v24 = vpop.f32.mrb[11].mxu0 }
 0x101   : > { %4696 = vmatmul.mubr.msk.bf16.vlgmr.msra.gmra.mrb[60].mxu1 %vm231_vm1, %v2026_v44 }
 0x102   : > { %4707 = vmatprep.mubr.msk.bf16.mxu1 %vm5072_vm0, %v5071_v0  ;;  %4706 = vmatpush3.bf16.msra.mxu1 %v4990_v55  ;;  %v4999_v55 = vld [vmem:[%s5142_s24 + $0x38] sm:$0xff]  }
 0x103   : > { %v5339_v27 = vpop.f32.mrb[12].mxu0  ;;  %4717 = vmatprep.subr.bf16.mxu1 %v5071_v0 }
 0x104   : > { %v4547_v28 = vpop.f32.mrb[13].mxu0 }
 0x105   : > { %v621_v29 = vpop.f32.mrb[14].mxu0 }
 0x106   : > { %v4548_v30 = vpop.f32.mrb[15].mxu0 }
 0x107   : > { %v4996_v30 = vld [vmem:[%s5142_s24 + $0x28] sm:$0xff]  }
 0x109   : > { %4708 = vmatmul.mubr.msk.bf16.vlgmr.msra.gmra.mrb[64].mxu1 %vm231_vm1, %v2147_v57 }
 0x10a   : > { %4719 = vmatprep.mubr.msk.bf16.mxu1 %vm5072_vm0, %v5071_v0  ;;  %4718 = vmatpush3.bf16.msra.mxu1 %v4993_v5  ;;  %v5001_v5 = vld [vmem:[%s5142_s24 + $0x40] sm:$0xff]  }
 0x10b   : > { %v5354_v36 = vpop.f32.mrb[16].mxu0  ;;  %4729 = vmatprep.subr.bf16.mxu1 %v5071_v0 }
 0x10c   : > { %v4559_v37 = vpop.f32.mrb[17].mxu0 }
 0x10d   : > { %v737_v38 = vpop.f32.mrb[18].mxu0 }
 0x10e   : > { %v4560_v39 = vpop.f32.mrb[19].mxu0  ;;  %v4997_v38 = vld [vmem:[%s5135_s21 + $0x14] ss:$0 sps:$4 sm:$0xff]  }
 0x10f   : > { %3066 = vrot.lane.b32.xlu0 %v4997_v38, %s5073_s25 }
 0x111   : > { %4720 = vmatmul.mubr.msk.bf16.vlgmr.msra.gmra.mrb[68].mxu1 %vm231_vm1, %v2262_v9 }
 0x112   : > { %4731 = vmatprep.mubr.msk.bf16.mxu1 %vm5072_vm0, %v5071_v0  ;;  %4730 = vmatpush3.bf16.msra.mxu1 %v4996_v30 }
 0x113   : > { %v5369_v45 = vpop.f32.mrb[20].mxu0  ;;  %4741 = vmatprep.subr.bf16.mxu1 %v5071_v0 }
 0x114   : > { %v4571_v46 = vpop.f32.mrb[21].mxu0 }
 0x115   : > { %v853_v47 = vpop.f32.mrb[22].mxu0 }
 0x116   : > { %v4572_v48 = vpop.f32.mrb[23].mxu0  ;;  %v4245_v47 = vld [vmem:[%s5135_s21 + $0x2c] sm:$0xf] }
 0x117   : > { %4738 = vmatmul.mubr.msk.bf16.vlgmr.msra.gmra.mrb[76].mxu0 %vm231_vm1, %v4245_v47  ;;  %v2722_v47 = vpop.permute.xlu1 %2721 }
 0x118   : > { %4749 = vmatprep.mubr.msk.bf16.mxu0 %vm5072_vm0, %v5071_v0  ;;  %4748 = vmatpush3.bf16.msra.mxu0 %v5001_v5  ;;  %v5009_v5 = vld [vmem:[%s5135_s21 + $0x1c] ss:$0 sps:$4 sm:$0xff]  }
 0x119   : > { %4732 = vmatmul.mubr.msk.bf16.vlgmr.msra.gmra.mrb[72].mxu1 %vm231_vm1, %v2377_v34  ;;  %4759 = vmatprep.subr.bf16.mxu0 %v5071_v0 }
 0x11a   : > { %4743 = vmatprep.mubr.msk.bf16.mxu1 %vm5072_vm0, %v5071_v0  ;;  %4742 = vmatpush3.bf16.msra.mxu1 %v4999_v55  ;;  %v5007_v55 = vld [vmem:[%s5142_s24 + $0x60] sm:$0xff]  }
 0x11b   : > { %v5381_v52 = vpop.f32.mrb[24].mxu0  ;;  %4753 = vmatprep.subr.bf16.mxu1 %v5071_v0 }
 0x11c   : > { %v4583_v53 = vpop.f32.mrb[25].mxu0 }
 0x11d   : > { %v969_v54 = vpop.f32.mrb[26].mxu0 }
 0x11e   : > { %v4584_v56 = vpop.f32.mrb[27].mxu0 }
 0x121   : > { %4744 = vmatmul.mubr.msk.bf16.vlgmr.msra.gmra.mrb[76].mxu1 %vm231_vm1, %v2492_v59 }
 0x122   : > { %4755 = vmatprep.mubr.msk.bf16.mxu1 %vm5072_vm0, %v5071_v0 }
 0x123   : > { %v5396_v62 = vpop.f32.mrb[28].mxu0 }
 0x124   : > { %v4595_v1 = vpop.f32.mrb[29].mxu0 }
 0x125   : > { %v1085_v4 = vpop.f32.mrb[30].mxu0 }
 0x126   : > { %v4596_v7 = vpop.f32.mrb[31].mxu0 }
 0x12b   : > { %v5414_v24 = vpop.f32.mrb[32].mxu0 }
 0x12c   : > { %v4607_v26 = vpop.f32.mrb[33].mxu0 }
 0x12d   : > { %v1201_v29 = vpop.f32.mrb[34].mxu0 }
 0x12e   : > { %v4608_v31 = vpop.f32.mrb[35].mxu0 }
 0x15c   : > { %v329_v63 = vpop.f32.mrb[0].mxu1 }
 0x15d   : > { %v335_v2 = vadd.f32 %v329_v63, %v280_v61  ;;  %v4517_v3 = vpop.f32.mrb[1].mxu1  ;;  %v5000_v63 = vld [vmem:[%s5135_s21 + $0x38] ss:$0 sps:$4 sm:$0xff]  }
 0x15e   : > { %v332_v6 = vpop.f32.mrb[2].mxu1  ;;  %3181 = vrot.lane.b32.xlu1 %v5000_v63, %s5073_s25 }
 0x15f   : > { %336 = vst.msk [vmem:[#allocation2] sm:$0xff] %vm219_vm2, %v335_v2  ;;  %v4518_v8 = vpop.f32.mrb[3].mxu1  ;;  %v2544_v6 = vld [vmem:[%s5135_s21 + $0xc] sm:$0xf] }
 0x160   : > { %4750 = vmatmul.mubr.msk.bf16.vlgmr.msra.gmra.mrb[80].mxu0 %vm231_vm1, %v2544_v6 }
 0x161   : > { %4761 = vmatprep.mubr.msk.bf16.mxu0 %vm5072_vm0, %v5071_v0 }
 0x164   : > { %v446_v10 = vpop.f32.mrb[4].mxu1 }
 0x165   : > { %v4529_v11 = vpop.f32.mrb[5].mxu1 }
 0x166   : > { %v342_v13 = vld [vmem:[#allocation2] sm:$0xff]  ;;  %v449_v15 = vpop.f32.mrb[6].mxu1 }
 0x167   : > { %v392_v16 = vadd.f32 %v5324_v14, %v342_v13  ;;  %v4530_v17 = vpop.f32.mrb[7].mxu1 }
 0x169   : > { %393 = vst.msk [vmem:[#allocation2] sm:$0xff] %vm219_vm2, %v392_v16  ;;  %v5002_v16 = vld [vmem:[%s5142_s24 + $0x48] sm:$0xff]  }
 0x16a   : > { %4754 = vmatpush3.bf16.msra.mxu1 %v5002_v16 }
 0x16b   : > { %4765 = vmatprep.subr.bf16.mxu1 %v5071_v0 }
 0x16c   : > { %v562_v21 = vpop.f32.mrb[8].mxu1 }
 0x16d   : > { %v4541_v22 = vpop.f32.mrb[9].mxu1 }
 0x16e   : > { %v565_v23 = vpop.f32.mrb[10].mxu1 }
 0x16f   : > { %v4542_v14 = vpop.f32.mrb[11].mxu1 }
 0x170   : > { %v397_v25 = vld [vmem:[#allocation2] sm:$0xff]  ;;  %v5003_v14 = vld [vmem:[%s5135_s21 + $0x18] ss:$0 sps:$4 sm:$0xff]  }
 0x171   : > { %v452_v28 = vadd.f32 %v446_v10, %v397_v25  ;;  %3296 = vrot.lane.b32.xlu0 %v5003_v14, %s5073_s25  ;;  %v5012_v14 = vld [vmem:[%s5135_s21 + $0x40] ss:$0 sps:$4 sm:$0xff]  }
 0x173   : > { %453 = vst.msk [vmem:[#allocation2] sm:$0xff] %vm219_vm2, %v452_v28  ;;  %v5004_v28 = vld [vmem:[%s5142_s24 + $0x50] sm:$0xff]  }
 0x174   : > { %v678_v32 = vpop.f32.mrb[12].mxu1  ;;  %4760 = vmatpush3.bf16.msra.mxu0 %v5004_v28 }
 0x175   : > { %v4553_v33 = vpop.f32.mrb[13].mxu1  ;;  %4771 = vmatprep.subr.bf16.mxu0 %v5071_v0  ;;  %3526 = vrot.lane.b32.xlu0 %v5009_v5, %s5073_s25 }
 0x176   : > { %v681_v35 = vpop.f32.mrb[14].mxu1  ;;  %v4265_v33 = vld [vmem:[%s5135_s21 + $0x30] sm:$0xf] }
 0x177   : > { %v4554_v37 = vpop.f32.mrb[15].mxu1  ;;  %4762 = vmatmul.mubr.msk.bf16.vlgmr.msra.gmra.mrb[84].mxu0 %vm231_vm1, %v4265_v33 }
 0x178   : > { %4773 = vmatprep.mubr.msk.bf16.mxu0 %vm5072_vm0, %v5071_v0  ;;  %4772 = vmatpush3.bf16.msra.mxu0 %v5007_v55 }
 0x179   : > { %4783 = vmatprep.subr.bf16.mxu0 %v5071_v0 }
 0x17a   : > { %v458_v39 = vld [vmem:[#allocation2] sm:$0xff] }
 0x17b   : > { %v508_v40 = vadd.f32 %v5329_v20, %v458_v39  ;;  %v5434_v20 = vpop.f32.mrb[36].mxu0 }
 0x17c   : > { %v5426_v42 = vpop.f32.mrb[16].mxu1  ;;  %v4619_v50 = vpop.f32.mrb[37].mxu0 }
 0x17d   : > { %509 = vst.msk [vmem:[#allocation2] sm:$0xff] %vm219_vm2, %v508_v40  ;;  %v4565_v43 = vpop.f32.mrb[17].mxu1  ;;  %v1317_v54 = vpop.f32.mrb[38].mxu0 }
 0x17e   : > { %v797_v44 = vpop.f32.mrb[18].mxu1  ;;  %v4620_v57 = vpop.f32.mrb[39].mxu0 }
 0x17f   : > { %v4566_v46 = vpop.f32.mrb[19].mxu1  ;;  %v5458_v10 = vpop.f32.mrb[40].mxu0  ;;  %v2774_v57 = vld [vmem:[%s5135_s21 + $0x10] sm:$0xf] }
 0x180   : > { %v4631_v12 = vpop.f32.mrb[41].mxu0  ;;  %4774 = vmatmul.mubr.msk.bf16.vlgmr.msra.gmra.mrb[88].mxu0 %vm231_vm1, %v2774_v57 }
 0x181   : > { %v1433_v15 = vpop.f32.mrb[42].mxu0  ;;  %4785 = vmatprep.mubr.msk.bf16.mxu0 %vm5072_vm0, %v5071_v0  ;;  %v4285_v12 = vld [vmem:[%s5135_s21 + $0x34] sm:$0xf] }
 0x182   : > { %v4632_v17 = vpop.f32.mrb[43].mxu0 }
 0x184   : > { %v513_v48 = vld [vmem:[#allocation2] sm:$0xff]  ;;  %v5436_v49 = vpop.f32.mrb[20].mxu1 }
 0x185   : > { %v568_v51 = vadd.f32 %v562_v21, %v513_v48  ;;  %v4577_v53 = vpop.f32.mrb[21].mxu1  ;;  %v2607_v21 = vpop.permute.xlu0 %2606  ;;  %v5006_v48 = vld [vmem:[%s5135_s21 + $0x3c] ss:$0 sps:$4 sm:$0xff]  }
 0x186   : > { %v913_v56 = vpop.f32.mrb[22].mxu1  ;;  %4756 = vmatmul.mubr.msk.bf16.vlgmr.msra.gmra.mrb[80].mxu1 %vm231_vm1, %v2607_v21  ;;  %3411 = vrot.lane.b32.xlu1 %v5006_v48, %s5073_s25 }
 0x187   : > { %569 = vst.msk [vmem:[#allocation2] sm:$0xff] %vm219_vm2, %v568_v51  ;;  %v4578_v58 = vpop.f32.mrb[23].mxu1  ;;  %4767 = vmatprep.mubr.msk.bf16.mxu1 %vm5072_vm0, %v5071_v0  ;;  %4766 = vmatpush3.bf16.msra.mxu1 %v5005_v41 }
 0x188   : > { %4777 = vmatprep.subr.bf16.mxu1 %v5071_v0 }
 0x18a   : > { %3641 = vrot.lane.b32.xlu1 %v5012_v14, %s5073_s25 }
 0x18c   : > { %v5444_v60 = vpop.f32.mrb[24].mxu1 }
 0x18d   : > { %v4589_v61 = vpop.f32.mrb[25].mxu1 }
 0x18e   : > { %v574_v1 = vld [vmem:[#allocation2] sm:$0xff]  ;;  %v1029_v2 = vpop.f32.mrb[26].mxu1  ;;  %4768 = vmatmul.mubr.msk.bf16.vlgmr.msra.gmra.mrb[84].mxu1 %vm231_vm1, %v2722_v47 }
 0x18f   : > { %v624_v3 = vadd.f32 %v5339_v27, %v574_v1  ;;  %v4590_v4 = vpop.f32.mrb[27].mxu1  ;;  %4779 = vmatprep.mubr.msk.bf16.mxu1 %vm5072_vm0, %v5071_v0  ;;  %v5008_v1 = vld [vmem:[%s5142_s24 + $0x68] sm:$0xff]  }
 0x190   : > { %4778 = vmatpush3.bf16.msra.mxu1 %v5008_v1  ;;  %v5018_v1 = vld [vmem:[%s5135_s21 + $0x44] ss:$0 sps:$4 sm:$0xff]  }
 0x191   : > { %625 = vst.msk [vmem:[#allocation2] sm:$0xff] %vm219_vm2, %v624_v3  ;;  %4789 = vmatprep.subr.bf16.mxu1 %v5071_v0  ;;  %v2837_v3 = vpop.permute.xlu0 %2836  ;;  %3871 = vrot.lane.b32.xlu1 %v5018_v1, %s5073_s25 }
 0x194   : > { %v5453_v7 = vpop.f32.mrb[28].mxu1 }
 0x195   : > { %v4601_v8 = vpop.f32.mrb[29].mxu1  ;;  %v3067_v41 = vpop.permute.xlu0 %3066 }
 0x196   : > { %v1145_v27 = vpop.f32.mrb[30].mxu1  ;;  %4780 = vmatmul.mubr.msk.bf16.vlgmr.msra.gmra.mrb[88].mxu1 %vm231_vm1, %v2837_v3 }
 0x197   : > { %v4602_v9 = vpop.f32.mrb[31].mxu1  ;;  %4791 = vmatprep.mubr.msk.bf16.mxu1 %vm5072_vm0, %v5071_v0 }
 0x198   : > { %v629_v11 = vld [vmem:[#allocation2] sm:$0xff]  ;;  %v5010_v9 = vld [vmem:[%s5142_s24 + $0x70] sm:$0xff]  }
 0x199   : > { %v684_v13 = vadd.f32 %v678_v32, %v629_v11  ;;  %4784 = vmatpush3.bf16.msra.mxu0 %v5010_v9  ;;  %v5020_v9 = vld [vmem:[%s5142_s24 + $0xa8] sm:$0xff]  }
 0x19a   : > { %4795 = vmatprep.subr.bf16.mxu0 %v5071_v0 }
 0x19b   : > { %685 = vst.msk [vmem:[#allocation2] sm:$0xff] %vm219_vm2, %v684_v13 }
 0x19c   : > { %v5462_v18 = vpop.f32.mrb[32].mxu1  ;;  %4786 = vmatmul.mubr.msk.bf16.vlgmr.msra.gmra.mrb[92].mxu0 %vm231_vm1, %v4285_v12 }
 0x19d   : > { %v4613_v19 = vpop.f32.mrb[33].mxu1  ;;  %4797 = vmatprep.mubr.msk.bf16.mxu0 %vm5072_vm0, %v5071_v0 }
 0x19e   : > { %v1261_v22 = vpop.f32.mrb[34].mxu1  ;;  %v5011_v19 = vld [vmem:[%s5142_s24 + $0x78] sm:$0xff]  }
 0x19f   : > { %v4614_v23 = vpop.f32.mrb[35].mxu1  ;;  %4790 = vmatpush3.bf16.msra.mxu1 %v5011_v19  ;;  %v2952_v22 = vpop.permute.xlu1 %2951  ;;  %v5021_v19 = vld [vmem:[%s5142_s24 + $0xb0] sm:$0xff]  }
 0x1a0   : > { %4801 = vmatprep.subr.bf16.mxu1 %v5071_v0 }
 0x1a2   : > { %v690_v25 = vld [vmem:[#allocation2] sm:$0xff]  ;;  %4792 = vmatmul.mubr.msk.bf16.vlgmr.msra.gmra.mrb[92].mxu1 %vm231_vm1, %v2952_v22 }
 0x1a3   : > { %v740_v26 = vadd.f32 %v5354_v36, %v690_v25  ;;  %v5480_v36 = vpop.f32.mrb[44].mxu0  ;;  %4803 = vmatprep.mubr.msk.bf16.mxu1 %vm5072_vm0, %v5071_v0 }
 0x1a4   : > { %v5472_v29 = vpop.f32.mrb[36].mxu1  ;;  %v4643_v37 = vpop.f32.mrb[45].mxu0 }
 0x1a5   : > { %741 = vst.msk [vmem:[#allocation2] sm:$0xff] %vm219_vm2, %v740_v26  ;;  %v4625_v30 = vpop.f32.mrb[37].mxu1  ;;  %v1549_v40 = vpop.f32.mrb[46].mxu0 }
 0x1a6   : > { %v1377_v31 = vpop.f32.mrb[38].mxu1  ;;  %v4644_v44 = vpop.f32.mrb[47].mxu0  ;;  %v5013_v30 = vld [vmem:[%s5142_s24 + $0x80] sm:$0xff]  }
 0x1a7   : > { %v4626_v32 = vpop.f32.mrb[39].mxu1  ;;  %v5503_v58 = vpop.f32.mrb[48].mxu0  ;;  %4796 = vmatpush3.bf16.msra.mxu0 %v5013_v30  ;;  %v5015_v44 = vld [vmem:[%s5135_s21 + $0x20] ss:$0 sps:$4 sm:$0xff]  }
 0x1a8   : > { %v4655_v59 = vpop.f32.mrb[49].mxu0  ;;  %4807 = vmatprep.subr.bf16.mxu0 %v5071_v0  ;;  %v3004_v32 = vld [vmem:[%s5135_s21 + $0x14] sm:$0xf]  ;;  %3756 = vrot.lane.b32.xlu0 %v5015_v44, %s5073_s25 }
 0x1a9   : > { %v1665_v63 = vpop.f32.mrb[50].mxu0 }
 0x1aa   : > { %v4656_v2 = vpop.f32.mrb[51].mxu0  ;;  %4798 = vmatmul.mubr.msk.bf16.vlgmr.msra.gmra.mrb[96].mxu0 %vm231_vm1, %v3004_v32 }
 0x1ab   : > { %v5524_v13 = vpop.f32.mrb[52].mxu0  ;;  %4809 = vmatprep.mubr.msk.bf16.mxu0 %vm5072_vm0, %v5071_v0 }
 0x1ac   : > { %v745_v34 = vld [vmem:[#allocation2] sm:$0xff]  ;;  %v5482_v35 = vpop.f32.mrb[40].mxu1  ;;  %v4667_v15 = vpop.f32.mrb[53].mxu0 }
 0x1ad   : > { %v800_v38 = vadd.f32 %v5426_v42, %v745_v34  ;;  %v4637_v39 = vpop.f32.mrb[41].mxu1  ;;  %v1781_v17 = vpop.f32.mrb[54].mxu0 }
 0x1ae   : > { %v1493_v43 = vpop.f32.mrb[42].mxu1  ;;  %v4668_v21 = vpop.f32.mrb[55].mxu0  ;;  %v5014_v39 = vld [vmem:[%s5142_s24 + $0x88] sm:$0xff]  }
 0x1af   : > { %801 = vst.msk [vmem:[#allocation2] sm:$0xff] %vm219_vm2, %v800_v38  ;;  %v4638_v46 = vpop.f32.mrb[43].mxu1  ;;  %v5545_v33 = vpop.f32.mrb[56].mxu0  ;;  %4802 = vmatpush3.bf16.msra.mxu1 %v5014_v39  ;;  %v4325_v21 = vld [vmem:[%s5135_s21 + $0x3c] sm:$0xf] }
 0x1b0   : > { %v4679_v34 = vpop.f32.mrb[57].mxu0  ;;  %4813 = vmatprep.subr.bf16.mxu1 %v5071_v0  ;;  %v3464_v39 = vld [vmem:[%s5135_s21 + $0x1c] sm:$0xf] }
 0x1b1   : > { %v1897_v38 = vpop.f32.mrb[58].mxu0 }
 0x1b2   : > { %v4680_v40 = vpop.f32.mrb[59].mxu0  ;;  %4804 = vmatmul.mubr.msk.bf16.vlgmr.msra.gmra.mrb[96].mxu1 %vm231_vm1, %v3067_v41  ;;  %v5023_v38 = vld [vmem:[%s5142_s24 + $0xc0] sm:$0xff]  }
 0x1b3   : > { %4815 = vmatprep.mubr.msk.bf16.mxu1 %vm5072_vm0, %v5071_v0 }
 0x1b4   : > { %v5491_v42 = vpop.f32.mrb[44].mxu1 }
 0x1b5   : > { %v4649_v51 = vpop.f32.mrb[45].mxu1 }
 0x1b6   : > { %v806_v50 = vld [vmem:[#allocation2] sm:$0xff]  ;;  %v1609_v54 = vpop.f32.mrb[46].mxu1 }
 0x1b7   : > { %v856_v53 = vadd.f32 %v5369_v45, %v806_v50  ;;  %v4650_v56 = vpop.f32.mrb[47].mxu1  ;;  %v5016_v50 = vld [vmem:[%s5142_s24 + $0x90] sm:$0xff]   ;;  %v5566_v54 = vpop.f32.mrb[60].mxu0 }
 0x1b8   : > { %4808 = vmatpush3.bf16.msra.mxu0 %v5016_v50  ;;  %v4691_v55 = vpop.f32.mrb[61].mxu0 }
 0x1b9   : > { %857 = vst.msk [vmem:[#allocation2] sm:$0xff] %vm219_vm2, %v856_v53  ;;  %4819 = vmatprep.subr.bf16.mxu0 %v5071_v0  ;;  %v4305_v53 = vld [vmem:[%s5135_s21 + $0x38] sm:$0xf]  ;;  %v2013_v57 = vpop.f32.mrb[62].mxu0 }
 0x1ba   : > { %v4692_v59 = vpop.f32.mrb[63].mxu0  ;;  %v4345_v57 = vld [vmem:[%s5135_s21 + $0x40] sm:$0xf] }
 0x1bb   : > { %4810 = vmatmul.mubr.msk.bf16.vlgmr.msra.gmra.mrb[100].mxu0 %vm231_vm1, %v4305_v53  ;;  %v5592_v12 = vpop.f32.mrb[64].mxu0 }
 0x1bc   : > { %v5512_v4 = vpop.f32.mrb[48].mxu1  ;;  %4821 = vmatprep.mubr.msk.bf16.mxu0 %vm5072_vm0, %v5071_v0 }
 0x1bd   : > { %v4661_v6 = vpop.f32.mrb[49].mxu1 }
 0x1be   : > { %v1725_v27 = vpop.f32.mrb[50].mxu1 }
 0x1bf   : > { %v4662_v11 = vpop.f32.mrb[51].mxu1 }
 0x1c0   : > { %v861_v45 = vld [vmem:[#allocation2] sm:$0xff] }
 0x1c1   : > { %v916_v61 = vadd.f32 %v5436_v49, %v861_v45  ;;  %v5017_v45 = vld [vmem:[%s5142_s24 + $0x98] sm:$0xff]  }
 0x1c2   : > { %4814 = vmatpush3.bf16.msra.mxu1 %v5017_v45 }
 0x1c3   : > { %917 = vst.msk [vmem:[#allocation2] sm:$0xff] %vm219_vm2, %v916_v61  ;;  %4825 = vmatprep.subr.bf16.mxu1 %v5071_v0 }
 0x1c4   : > { %v5533_v23 = vpop.f32.mrb[52].mxu1 }
 0x1c5   : > { %v4673_v25 = vpop.f32.mrb[53].mxu1 }
 0x1c6   : > { %v1841_v28 = vpop.f32.mrb[54].mxu1 }
 0x1c7   : > { %v4674_v31 = vpop.f32.mrb[55].mxu1  ;;  %v5022_v28 = vld [vmem:[%s5142_s24 + $0xb8] sm:$0xff]  }
 0x1ca   : > { %v922_v49 = vld [vmem:[#allocation2] sm:$0xff] }
 0x1cb   : > { %v972_v8 = vadd.f32 %v5381_v52, %v922_v49  ;;  %v5019_v49 = vld [vmem:[%s5142_s24 + $0xa0] sm:$0xff]  }
 0x1cc   : > { %v5554_v43 = vpop.f32.mrb[56].mxu1  ;;  %4820 = vmatpush3.bf16.msra.mxu0 %v5019_v49 }
 0x1cd   : > { %973 = vst.msk [vmem:[#allocation2] sm:$0xff] %vm219_vm2, %v972_v8  ;;  %v4685_v46 = vpop.f32.mrb[57].mxu1  ;;  %4831 = vmatprep.subr.bf16.mxu0 %v5071_v0  ;;  %v3234_v8 = vld [vmem:[%s5135_s21 + $0x18] sm:$0xf] }
 0x1ce   : > { %v1957_v48 = vpop.f32.mrb[58].mxu1 }
 0x1cf   : > { %v4686_v51 = vpop.f32.mrb[59].mxu1  ;;  %4822 = vmatmul.mubr.msk.bf16.vlgmr.msra.gmra.mrb[104].mxu0 %vm231_vm1, %v3234_v8 }
 0x1d0   : > { %v3182_v61 = vpop.permute.xlu1 %3181  ;;  %4833 = vmatprep.mubr.msk.bf16.mxu0 %vm5072_vm0, %v5071_v0  ;;  %4832 = vmatpush3.bf16.msra.mxu0 %v5021_v19 }
 0x1d1   : > { %4816 = vmatmul.mubr.msk.bf16.vlgmr.msra.gmra.mrb[100].mxu1 %vm231_vm1, %v3182_v61  ;;  %4843 = vmatprep.subr.bf16.mxu0 %v5071_v0 }
 0x1d2   : > { %4827 = vmatprep.mubr.msk.bf16.mxu1 %vm5072_vm0, %v5071_v0  ;;  %4826 = vmatpush3.bf16.msra.mxu1 %v5020_v9  ;;  %v3694_v9 = vld [vmem:[%s5135_s21 + $0x20] sm:$0xf] }
 0x1d3   : > { %4837 = vmatprep.subr.bf16.mxu1 %v5071_v0 }
 0x1d4   : > { %v977_v52 = vld [vmem:[#allocation2] sm:$0xff]  ;;  %v5575_v63 = vpop.f32.mrb[60].mxu1 }
 0x1d5   : > { %v1032_v16 = vadd.f32 %v5444_v60, %v977_v52  ;;  %v4697_v2 = vpop.f32.mrb[61].mxu1  ;;  %v4703_v52 = vpop.f32.mrb[65].mxu0 }
 0x1d6   : > { %v2073_v5 = vpop.f32.mrb[62].mxu1  ;;  %v2134_v15 = vpop.f32.mrb[66].mxu0  ;;  %v5026_v2 = vld [vmem:[%s5142_s24 + $0xd8] sm:$0xff]  }
 0x1d7   : > { %1033 = vst.msk [vmem:[#allocation2] sm:$0xff] %vm219_vm2, %v1032_v16  ;;  %v4698_v6 = vpop.f32.mrb[63].mxu1  ;;  %4834 = vmatmul.mubr.msk.bf16.vlgmr.msra.gmra.mrb[108].mxu0 %vm231_vm1, %v4325_v21 }
 0x1d8   : > { %4845 = vmatprep.mubr.msk.bf16.mxu0 %vm5072_vm0, %v5071_v0  ;;  %4844 = vmatpush3.bf16.msra.mxu0 %v5023_v38  ;;  %v5030_v38 = vld [vmem:[%s5142_s24 + $0xf8] sm:$0xff]  }
 0x1d9   : > { %4855 = vmatprep.subr.bf16.mxu0 %v5071_v0 }
 0x1dc   : > { %v5602_v22 = vpop.f32.mrb[64].mxu1 }
 0x1dd   : > { %v4709_v14 = vpop.f32.mrb[65].mxu1 }
 0x1de   : > { %v1038_v60 = vld [vmem:[#allocation2] sm:$0xff] }
 0x1df   : > { %v1088_v26 = vadd.f32 %v5396_v62, %v1038_v60  ;;  %v2194_v60 = vpop.f32.mrb[66].mxu1  ;;  %4846 = vmatmul.mubr.msk.bf16.vlgmr.msra.gmra.mrb[112].mxu0 %vm231_vm1, %v3464_v39 }
 0x1e0   : > { %4857 = vmatprep.mubr.msk.bf16.mxu0 %vm5072_vm0, %v5071_v0 }
 0x1e1   : > { %1089 = vst.msk [vmem:[#allocation2] sm:$0xff] %vm219_vm2, %v1088_v26  ;;  %v4710_v26 = vpop.f32.mrb[67].mxu1 }
 0x1e3   : > { %v3297_v11 = vpop.permute.xlu0 %3296 }
 0x1e4   : > { %4828 = vmatmul.mubr.msk.bf16.vlgmr.msra.gmra.mrb[104].mxu1 %vm231_vm1, %v3297_v11  ;;  %v5621_v40 = vpop.f32.mrb[68].mxu1 }
 0x1e5   : > { %4839 = vmatprep.mubr.msk.bf16.mxu1 %vm5072_vm0, %v5071_v0  ;;  %4838 = vmatpush3.bf16.msra.mxu1 %v5022_v28  ;;  %v4721_v41 = vpop.f32.mrb[69].mxu1  ;;  %v4365_v28 = vld [vmem:[%s5135_s21 + $0x44] sm:$0xf] }
 0x1e6   : > { %4849 = vmatprep.subr.bf16.mxu1 %v5071_v0  ;;  %v2309_v44 = vpop.f32.mrb[70].mxu1 }
 0x1e7   : > { %v4722_v46 = vpop.f32.mrb[71].mxu1  ;;  %v3527_v48 = vpop.permute.xlu0 %3526 }
 0x1e8   : > { %v1093_v62 = vld [vmem:[#allocation2] sm:$0xff] }
 0x1e9   : > { %v1148_v37 = vadd.f32 %v5453_v7, %v1093_v62 }
 0x1eb   : > { %1149 = vst.msk [vmem:[#allocation2] sm:$0xff] %vm219_vm2, %v1148_v37 }
 0x1ec   : > { %v5640_v45 = vpop.f32.mrb[72].mxu1 }
 0x1ed   : > { %v4733_v59 = vpop.f32.mrb[73].mxu1 }
 0x1ee   : > { %v2424_v61 = vpop.f32.mrb[74].mxu1 }
 0x1f2   : > { %v1154_v7 = vld [vmem:[#allocation2] sm:$0xff] }
 0x1f3   : > { %v1204_v47 = vadd.f32 %v5414_v24, %v1154_v7 }
 0x1f5   : > { %1205 = vst.msk [vmem:[#allocation2] sm:$0xff] %vm219_vm2, %v1204_v47  ;;  %v5024_v47 = vld [vmem:[%s5142_s24 + $0xc8] sm:$0xff]  }
 0x1f8   : > { %v3412_v30 = vpop.permute.xlu1 %3411 }
 0x1f9   : > { %4840 = vmatmul.mubr.msk.bf16.vlgmr.msra.gmra.mrb[108].mxu1 %vm231_vm1, %v3412_v30 }
 0x1fa   : > { %4851 = vmatprep.mubr.msk.bf16.mxu1 %vm5072_vm0, %v5071_v0  ;;  %4850 = vmatpush3.bf16.msra.mxu1 %v5024_v47 }
 0x1fb   : > { %4861 = vmatprep.subr.bf16.mxu1 %v5071_v0 }
 0x1fc   : > { %v1209_v24 = vld [vmem:[#allocation2] sm:$0xff] }
 0x1fd   : > { %v1264_v56 = vadd.f32 %v5462_v18, %v1209_v24 }
 0x1ff   : > { %1265 = vst.msk [vmem:[#allocation2] sm:$0xff] %vm219_vm2, %v1264_v56  ;;  %v5025_v56 = vld [vmem:[%s5142_s24 + $0xd0] sm:$0xff]  }
 0x200   : > { %4856 = vmatpush3.bf16.msra.mxu0 %v5025_v56 }
 0x201   : > { %4852 = vmatmul.mubr.msk.bf16.vlgmr.msra.gmra.mrb[112].mxu1 %vm231_vm1, %v3527_v48  ;;  %4867 = vmatprep.subr.bf16.mxu0 %v5071_v0 }
 0x202   : > { %4863 = vmatprep.mubr.msk.bf16.mxu1 %vm5072_vm0, %v5071_v0  ;;  %4862 = vmatpush3.bf16.msra.mxu1 %v5026_v2 }
 0x203   : > { %4858 = vmatmul.mubr.msk.bf16.vlgmr.msra.gmra.mrb[116].mxu0 %vm231_vm1, %v4345_v57  ;;  %4873 = vmatprep.subr.bf16.mxu1 %v5071_v0 }
 0x204   : > { %4869 = vmatprep.mubr.msk.bf16.mxu0 %vm5072_vm0, %v5071_v0 }
 0x206   : > { %v1270_v18 = vld [vmem:[#allocation2] sm:$0xff] }
 0x207   : > { %v1320_v3 = vadd.f32 %v5434_v20, %v1270_v18  ;;  %v4734_v18 = vpop.f32.mrb[75].mxu1 }
 0x208   : > { %v5659_v11 = vpop.f32.mrb[76].mxu1 }
 0x209   : > { %1321 = vst.msk [vmem:[#allocation2] sm:$0xff] %vm219_vm2, %v1320_v3  ;;  %v3642_v3 = vpop.permute.xlu1 %3641  ;;  %v4745_v52 = vpop.f32.mrb[77].mxu1 }
 0x20a   : > { %4864 = vmatmul.mubr.msk.bf16.vlgmr.msra.gmra.mrb[116].mxu1 %vm231_vm1, %v3642_v3  ;;  %v2539_v15 = vpop.f32.mrb[78].mxu1 }
 0x20b   : > { %4875 = vmatprep.mubr.msk.bf16.mxu1 %vm5072_vm0, %v5071_v0 }
 0x210   : > { %v1325_v27 = vld [vmem:[#allocation2] sm:$0xff] }
 0x211   : > { %v1380_v20 = vadd.f32 %v5472_v29, %v1325_v27  ;;  %v4704_v29 = vpop.f32.mrb[67].mxu0 }
 0x212   : > { %v5611_v31 = vpop.f32.mrb[68].mxu0  ;;  %v4746_v29 = vpop.f32.mrb[79].mxu1 }
 0x213   : > { %1381 = vst.msk [vmem:[#allocation2] sm:$0xff] %vm219_vm2, %v1380_v20  ;;  %v4715_v32 = vpop.f32.mrb[69].mxu0  ;;  %v5027_v20 = vld [vmem:[%s5142_s24 + $0xe0] sm:$0xff]  }
 0x214   : > { %v2249_v62 = vpop.f32.mrb[70].mxu0  ;;  %4868 = vmatpush3.bf16.msra.mxu0 %v5027_v20 }
 0x215   : > { %4879 = vmatprep.subr.bf16.mxu0 %v5071_v0 }
 0x217   : > { %4870 = vmatmul.mubr.msk.bf16.vlgmr.msra.gmra.mrb[120].mxu0 %vm231_vm1, %v3694_v9 }
 0x218   : > { %4881 = vmatprep.mubr.msk.bf16.mxu0 %vm5072_vm0, %v5071_v0 }
 0x21a   : > { %v1386_v16 = vld [vmem:[#allocation2] sm:$0xff]  ;;  %v3757_v19 = vpop.permute.xlu0 %3756 }
 0x21b   : > { %v1436_v17 = vadd.f32 %v5458_v10, %v1386_v16 }
 0x21d   : > { %1437 = vst.msk [vmem:[#allocation2] sm:$0xff] %vm219_vm2, %v1436_v17  ;;  %v5028_v17 = vld [vmem:[%s5142_s24 + $0xe8] sm:$0xff]  }
 0x21e   : > { %4874 = vmatpush3.bf16.msra.mxu1 %v5028_v17 }
 0x21f   : > { %4885 = vmatprep.subr.bf16.mxu1 %v5071_v0 }
 0x221   : > { %4876 = vmatmul.mubr.msk.bf16.vlgmr.msra.gmra.mrb[120].mxu1 %vm231_vm1, %v3757_v19 }
 0x222   : > { %4887 = vmatprep.mubr.msk.bf16.mxu1 %vm5072_vm0, %v5071_v0  ;;  %4886 = vmatpush3.bf16.msra.mxu1 %v5030_v38 }
 0x224   : > { %v1441_v25 = vld [vmem:[#allocation2] sm:$0xff] }
 0x225   : > { %v1496_v10 = vadd.f32 %v5482_v35, %v1441_v25  ;;  %v4716_v35 = vpop.f32.mrb[71].mxu0 }
 0x226   : > { %v5630_v50 = vpop.f32.mrb[72].mxu0 }
 0x227   : > { %1497 = vst.msk [vmem:[#allocation2] sm:$0xff] %vm219_vm2, %v1496_v10  ;;  %v4727_v51 = vpop.f32.mrb[73].mxu0  ;;  %v5029_v10 = vld [vmem:[%s5142_s24 + $0xf0] sm:$0xff]  }
 0x228   : > { %v2364_v53 = vpop.f32.mrb[74].mxu0  ;;  %4880 = vmatpush3.bf16.msra.mxu0 %v5029_v10 }
 0x22b   : > { %4882 = vmatmul.mubr.msk.bf16.vlgmr.msra.gmra.mrb[124].mxu0 %vm231_vm1, %v4365_v28 }
 0x22e   : > { %v1502_v34 = vld [vmem:[#allocation2] sm:$0xff] }
 0x22f   : > { %v1552_v37 = vadd.f32 %v5480_v36, %v1502_v34 }
 0x231   : > { %1553 = vst.msk [vmem:[#allocation2] sm:$0xff] %vm219_vm2, %v1552_v37 }
 0x238   : > { %v1557_v7 = vld [vmem:[#allocation2] sm:$0xff] }
 0x239   : > { %v1612_v36 = vadd.f32 %v5491_v42, %v1557_v7  ;;  %v4728_v42 = vpop.f32.mrb[75].mxu0 }
 0x23a   : > { %v5649_v5 = vpop.f32.mrb[76].mxu0 }
 0x23b   : > { %1613 = vst.msk [vmem:[#allocation2] sm:$0xff] %vm219_vm2, %v1612_v36  ;;  %v4739_v49 = vpop.f32.mrb[77].mxu0 }
 0x23c   : > { %v2479_v6 = vpop.f32.mrb[78].mxu0 }
 0x242   : > { %v1618_v24 = vld [vmem:[#allocation2] sm:$0xff] }
 0x243   : > { %v1668_v55 = vadd.f32 %v5503_v58, %v1618_v24 }
 0x245   : > { %1669 = vst.msk [vmem:[#allocation2] sm:$0xff] %vm219_vm2, %v1668_v55 }
 0x24c   : > { %v1673_v1 = vld [vmem:[#allocation2] sm:$0xff] }
 0x24d   : > { %v1728_v58 = vadd.f32 %v5512_v4, %v1673_v1  ;;  %v4740_v4 = vpop.f32.mrb[79].mxu0 }
 0x24e   : > { %v5668_v21 = vpop.f32.mrb[80].mxu0 }
 0x24f   : > { %1729 = vst.msk [vmem:[#allocation2] sm:$0xff] %vm219_vm2, %v1728_v58  ;;  %v4751_v14 = vpop.f32.mrb[81].mxu0 }
 0x250   : > { %v2594_v60 = vpop.f32.mrb[82].mxu0 }
 0x256   : > { %v1734_v8 = vld [vmem:[#allocation2] sm:$0xff] }
 0x257   : > { %v1784_v27 = vadd.f32 %v5524_v13, %v1734_v8 }
 0x259   : > { %1785 = vst.msk [vmem:[#allocation2] sm:$0xff] %vm219_vm2, %v1784_v27  ;;  %v5677_v30 = vpop.f32.mrb[80].mxu1 }
 0x25a   : > { %v4757_v32 = vpop.f32.mrb[81].mxu1 }
 0x25b   : > { %v2654_v62 = vpop.f32.mrb[82].mxu1 }
 0x25c   : > { %v4758_v35 = vpop.f32.mrb[83].mxu1 }
 0x260   : > { %v1789_v16 = vld [vmem:[#allocation2] sm:$0xff] }
 0x261   : > { %v1844_v13 = vadd.f32 %v5533_v23, %v1789_v16  ;;  %v4752_v23 = vpop.f32.mrb[83].mxu0 }
 0x262   : > { %v5683_v39 = vpop.f32.mrb[84].mxu0 }
 0x263   : > { %1845 = vst.msk [vmem:[#allocation2] sm:$0xff] %vm219_vm2, %v1844_v13  ;;  %v4763_v41 = vpop.f32.mrb[85].mxu0 }
 0x264   : > { %v2709_v44 = vpop.f32.mrb[86].mxu0 }
 0x265   : > { %v4764_v46 = vpop.f32.mrb[87].mxu0 }
 0x266   : > { %v5693_v42 = vpop.f32.mrb[88].mxu0 }
 0x26a   : > { %v1850_v25 = vld [vmem:[#allocation2] sm:$0xff] }
 0x26b   : > { %v1900_v26 = vadd.f32 %v5545_v33, %v1850_v25  ;;  %v3872_v33 = vpop.permute.xlu1 %3871 }
 0x26c   : > { %4888 = vmatmul.mubr.msk.bf16.vlgmr.msra.gmra.mrb[124].mxu1 %vm231_vm1, %v3872_v33 }
 0x26d   : > { %1901 = vst.msk [vmem:[#allocation2] sm:$0xff] %vm219_vm2, %v1900_v26 }
 0x274   : > { %v1905_v34 = vld [vmem:[#allocation2] sm:$0xff] }
 0x275   : > { %v1960_v37 = vadd.f32 %v5554_v43, %v1905_v34  ;;  %v5688_v43 = vpop.f32.mrb[84].mxu1 }
 0x276   : > { %v4769_v47 = vpop.f32.mrb[85].mxu1 }
 0x277   : > { %1961 = vst.msk [vmem:[#allocation2] sm:$0xff] %vm219_vm2, %v1960_v37  ;;  %v2769_v48 = vpop.f32.mrb[86].mxu1 }
 0x278   : > { %v4770_v53 = vpop.f32.mrb[87].mxu1 }
 0x279   : > { %v5704_v61 = vpop.f32.mrb[88].mxu1 }
 0x27a   : > { %v4781_v18 = vpop.f32.mrb[89].mxu1 }
 0x27b   : > { %v2884_v2 = vpop.f32.mrb[90].mxu1 }
 0x27c   : > { %v4782_v3 = vpop.f32.mrb[91].mxu1 }
 0x27d   : > { %v5712_v20 = vpop.f32.mrb[92].mxu1 }
 0x27e   : > { %v1966_v7 = vld [vmem:[#allocation2] sm:$0xff]  ;;  %v4793_v52 = vpop.f32.mrb[93].mxu1 }
 0x27f   : > { %v2016_v36 = vadd.f32 %v5566_v54, %v1966_v7  ;;  %v4775_v54 = vpop.f32.mrb[89].mxu0  ;;  %v2999_v15 = vpop.f32.mrb[94].mxu1 }
 0x280   : > { %v2824_v55 = vpop.f32.mrb[90].mxu0  ;;  %v4794_v16 = vpop.f32.mrb[95].mxu1 }
 0x281   : > { %2017 = vst.msk [vmem:[#allocation2] sm:$0xff] %vm219_vm2, %v2016_v36  ;;  %v4776_v57 = vpop.f32.mrb[91].mxu0 }
 0x285   : > { %v5720_v60 = vpop.f32.mrb[96].mxu1 }
 0x286   : > { %v4805_v23 = vpop.f32.mrb[97].mxu1 }
 0x287   : > { %v3114_v26 = vpop.f32.mrb[98].mxu1 }
 0x288   : > { %v2021_v51 = vld [vmem:[#allocation2] sm:$0xff]  ;;  %v4806_v10 = vpop.f32.mrb[99].mxu1 }
 0x289   : > { %v2076_v24 = vadd.f32 %v5575_v63, %v2021_v51 }
 0x28b   : > { %2077 = vst.msk [vmem:[#allocation2] sm:$0xff] %vm219_vm2, %v2076_v24 }
 0x292   : > { %v2078_v56 = vld [vmem:[#allocation2] sm:$0xff] }
 0x293   : > { %vm2079_vm3 = vcmp.ge.f32.partialorder %v2078_v56, 0.0  ;;  %v2080_v59 = vmul.f32 0.2, %v2078_v56  ;;  %2083 = vst.msk [vmem:[#allocation2] sm:$0xff] %vm219_vm2, %v5071_v0  ;;  %v5708_v0 = vpop.f32.mrb[92].mxu0 }
 0x294   : > { %v4787_v6 = vpop.f32.mrb[93].mxu0 }
 0x295   : > { %v2081_v63 = vsel %vm2079_vm3, %v2078_v56, %v2080_v59  ;;  %v2939_v4 = vpop.f32.mrb[94].mxu0 }
 0x296   : > { %2082 = vst.msk [vmem:[%s5700_s4] sm:$0xff] %vm219_vm2, %v2081_v63  ;;  %v4788_v27 = vpop.f32.mrb[95].mxu0 }
 0x297   : > { %v5716_v29 = vpop.f32.mrb[96].mxu0 }
 0x298   : > { %v4799_v17 = vpop.f32.mrb[97].mxu0 }
 0x299   : > { %v3054_v19 = vpop.f32.mrb[98].mxu0 }
 0x29a   : > { %v2087_v1 = vld [vmem:[#allocation2] sm:$0xff]  ;;  %v4800_v14 = vpop.f32.mrb[99].mxu0 }
 0x29b   : > { %v2137_v58 = vadd.f32 %v5592_v12, %v2087_v1  ;;  %v5724_v28 = vpop.f32.mrb[100].mxu0 }
 0x29c   : > { %v4811_v62 = vpop.f32.mrb[101].mxu0 }
 0x29d   : > { %2138 = vst.msk [vmem:[#allocation2] sm:$0xff] %vm219_vm2, %v2137_v58  ;;  %v3169_v34 = vpop.f32.mrb[102].mxu0 }
 0x29e   : > { %v4812_v35 = vpop.f32.mrb[103].mxu0 }
 0x2a2   : > { %v5732_v7 = vpop.f32.mrb[104].mxu0 }
 0x2a3   : > { %v4823_v36 = vpop.f32.mrb[105].mxu0 }
 0x2a4   : > { %v2142_v49 = vld [vmem:[#allocation2] sm:$0xff]  ;;  %v5728_v37 = vpop.f32.mrb[100].mxu1  ;;  %v3284_v47 = vpop.f32.mrb[106].mxu0 }
 0x2a5   : > { %v2197_v8 = vadd.f32 %v5602_v22, %v2142_v49  ;;  %v4817_v33 = vpop.f32.mrb[101].mxu1  ;;  %v4824_v48 = vpop.f32.mrb[107].mxu0 }
 0x2a6   : > { %v3229_v41 = vpop.f32.mrb[102].mxu1 }
 0x2a7   : > { %2198 = vst.msk [vmem:[#allocation2] sm:$0xff] %vm219_vm2, %v2197_v8  ;;  %v4818_v44 = vpop.f32.mrb[103].mxu1 }
 0x2aa   : > { %v5740_v56 = vpop.f32.mrb[108].mxu0 }
 0x2ab   : > { %v4835_v59 = vpop.f32.mrb[109].mxu0 }
 0x2ac   : > { %v3399_v63 = vpop.f32.mrb[110].mxu0 }
 0x2ad   : > { %v4836_v1 = vpop.f32.mrb[111].mxu0 }
 0x2ae   : > { %v2202_v9 = vld [vmem:[#allocation2] sm:$0xff] }
 0x2af   : > { %v2252_v12 = vadd.f32 %v5611_v31, %v2202_v9 }
 0x2b1   : > { %2253 = vst.msk [vmem:[#allocation2] sm:$0xff] %vm219_vm2, %v2252_v12 }
 0x2b2   : > { %v5748_v6 = vpop.f32.mrb[112].mxu0 }
 0x2b3   : > { %v4847_v4 = vpop.f32.mrb[113].mxu0 }
 0x2b4   : > { %v3514_v27 = vpop.f32.mrb[114].mxu0 }
 0x2b5   : > { %v4848_v9 = vpop.f32.mrb[115].mxu0 }
 0x2b7   : > { %v5736_v51 = vpop.f32.mrb[104].mxu1 }
 0x2b8   : > { %v2257_v13 = vld [vmem:[#allocation2] sm:$0xff]  ;;  %v4829_v24 = vpop.f32.mrb[105].mxu1 }
 0x2b9   : > { %v2312_v22 = vadd.f32 %v5621_v40, %v2257_v13  ;;  %v3344_v54 = vpop.f32.mrb[106].mxu1 }
 0x2ba   : > { %v4830_v55 = vpop.f32.mrb[107].mxu1 }
 0x2bb   : > { %2313 = vst.msk [vmem:[#allocation2] sm:$0xff] %vm219_vm2, %v2312_v22 }
 0x2c2   : > { %v2317_v25 = vld [vmem:[#allocation2] sm:$0xff] }
 0x2c3   : > { %v2367_v31 = vadd.f32 %v5630_v50, %v2317_v25 }
 0x2c5   : > { %2368 = vst.msk [vmem:[#allocation2] sm:$0xff] %vm219_vm2, %v2367_v31 }
 0x2cc   : > { %v2372_v32 = vld [vmem:[#allocation2] sm:$0xff]  ;;  %v5744_v18 = vpop.f32.mrb[108].mxu1 }
 0x2cd   : > { %v2427_v40 = vadd.f32 %v5640_v45, %v2372_v32  ;;  %v4841_v2 = vpop.f32.mrb[109].mxu1 }
 0x2ce   : > { %v3459_v3 = vpop.f32.mrb[110].mxu1 }
 0x2cf   : > { %2428 = vst.msk [vmem:[#allocation2] sm:$0xff] %vm219_vm2, %v2427_v40  ;;  %v4842_v49 = vpop.f32.mrb[111].mxu1 }
 0x2d4   : > { %v5752_v52 = vpop.f32.mrb[112].mxu1 }
 0x2d5   : > { %v4853_v15 = vpop.f32.mrb[113].mxu1 }
 0x2d6   : > { %v2432_v38 = vld [vmem:[#allocation2] sm:$0xff]  ;;  %v3574_v16 = vpop.f32.mrb[114].mxu1  ;;  %v5756_v17 = vpop.f32.mrb[116].mxu0 }
 0x2d7   : > { %v2482_v50 = vadd.f32 %v5649_v5, %v2432_v38  ;;  %v4854_v13 = vpop.f32.mrb[115].mxu1  ;;  %v4859_v19 = vpop.f32.mrb[117].mxu0 }
 0x2d8   : > { %v3629_v14 = vpop.f32.mrb[118].mxu0 }
 0x2d9   : > { %2483 = vst.msk [vmem:[#allocation2] sm:$0xff] %vm219_vm2, %v2482_v50  ;;  %v4860_v25 = vpop.f32.mrb[119].mxu0 }
 0x2dd   : > { %v3686_v23 = vpop.f32.mrb[116].mxu1 }
 0x2de   : > { %v4865_v26 = vpop.f32.mrb[117].mxu1 }
 0x2e0   : > { %v2487_v46 = vld [vmem:[#allocation2] sm:$0xff] }
 0x2e1   : > { %v2542_v45 = vadd.f32 %v5659_v11, %v2487_v46 }
 0x2e3   : > { %2543 = vst.msk [vmem:[#allocation2] sm:$0xff] %vm219_vm2, %v2542_v45 }
 0x2ea   : > { %v2547_v53 = vld [vmem:[#allocation2] sm:$0xff]  ;;  %v3741_v62 = vpop.f32.mrb[120].mxu0 }
 0x2eb   : > { %v2597_v5 = vadd.f32 %v5668_v21, %v2547_v53  ;;  %v4871_v34 = vpop.f32.mrb[121].mxu0 }
 0x2ec   : > { %v3744_v38 = vpop.f32.mrb[122].mxu0 }
 0x2ed   : > { %2598 = vst.msk [vmem:[#allocation2] sm:$0xff] %vm219_vm2, %v2597_v5 }
 0x2f4   : > { %v2602_v57 = vld [vmem:[#allocation2] sm:$0xff] }
 0x2f5   : > { %v2657_v11 = vadd.f32 %v5677_v30, %v2602_v57 }
 0x2f7   : > { %2658 = vst.msk [vmem:[#allocation2] sm:$0xff] %vm219_vm2, %v2657_v11 }
 0x2fe   : > { %v2662_v58 = vld [vmem:[#allocation2] sm:$0xff] }
 0x2ff   : > { %v2712_v21 = vadd.f32 %v5683_v39, %v2662_v58 }
 0x301   : > { %2713 = vst.msk [vmem:[#allocation2] sm:$0xff] %vm219_vm2, %v2712_v21 }
 0x308   : > { %v2717_v8 = vld [vmem:[#allocation2] sm:$0xff] }
 0x309   : > { %v2772_v30 = vadd.f32 %v5688_v43, %v2717_v8 }
 0x30b   : > { %2773 = vst.msk [vmem:[#allocation2] sm:$0xff] %vm219_vm2, %v2772_v30 }
 0x312   : > { %v2777_v12 = vld [vmem:[#allocation2] sm:$0xff] }
 0x313   : > { %v2827_v39 = vadd.f32 %v5693_v42, %v2777_v12  ;;  %v3689_v42 = vpop.f32.mrb[118].mxu1 }
 0x314   : > { %v4866_v32 = vpop.f32.mrb[119].mxu1 }
 0x315   : > { %2828 = vst.msk [vmem:[#allocation2] sm:$0xff] %vm219_vm2, %v2827_v39  ;;  %v3801_v33 = vpop.f32.mrb[120].mxu1 }
 0x316   : > { %v4877_v41 = vpop.f32.mrb[121].mxu1 }
 0x317   : > { %v3804_v46 = vpop.f32.mrb[122].mxu1 }
 0x31c   : > { %v2832_v22 = vld [vmem:[#allocation2] sm:$0xff] }
 0x31d   : > { %v2887_v43 = vadd.f32 %v5704_v61, %v2832_v22  ;;  %v4872_v61 = vpop.f32.mrb[123].mxu0 }
 0x31e   : > { %v3856_v36 = vpop.f32.mrb[124].mxu0 }
 0x31f   : > { %2888 = vst.msk [vmem:[#allocation2] sm:$0xff] %vm219_vm2, %v2887_v43  ;;  %v4883_v47 = vpop.f32.mrb[125].mxu0 }
 0x320   : > { %v3859_v53 = vpop.f32.mrb[126].mxu0 }
 0x326   : > { %v2892_v31 = vld [vmem:[#allocation2] sm:$0xff] }
 0x327   : > { %v2942_v10 = vadd.f32 %v5708_v0, %v2892_v31  ;;  %v4878_v0 = vpop.f32.mrb[123].mxu1 }
 0x329   : > { %2943 = vst.msk [vmem:[#allocation2] sm:$0xff] %vm219_vm2, %v2942_v10 }
 0x330   : > { %v2947_v40 = vld [vmem:[#allocation2] sm:$0xff] }
 0x331   : > { %v3002_v35 = vadd.f32 %v5712_v20, %v2947_v40  ;;  %v4884_v20 = vpop.f32.mrb[127].mxu0 }
 0x333   : > { %3003 = vst.msk [vmem:[#allocation2] sm:$0xff] %vm219_vm2, %v3002_v35 }
 0x33a   : > { %v3007_v50 = vld [vmem:[#allocation2] sm:$0xff] }
 0x33b   : > { %v3057_v44 = vadd.f32 %v5716_v29, %v3007_v50 }
 0x33d   : > { %3058 = vst.msk [vmem:[#allocation2] sm:$0xff] %vm219_vm2, %v3057_v44 }
 0x33f   : > { %v3916_v24 = vpop.f32.mrb[124].mxu1 }
 0x340   : > { %v4889_v54 = vpop.f32.mrb[125].mxu1 }
 0x341   : > { %v3919_v57 = vpop.f32.mrb[126].mxu1 }
 0x342   : > { %v4890_v29 = vpop.f32.mrb[127].mxu1 }
 0x344   : > { %v3062_v45 = vld [vmem:[#allocation2] sm:$0xff] }
 0x345   : > { %v3117_v48 = vadd.f32 %v5720_v60, %v3062_v45 }
 0x347   : > { %3118 = vst.msk [vmem:[#allocation2] sm:$0xff] %vm219_vm2, %v3117_v48 }
 0x34e   : > { %v3122_v5 = vld [vmem:[#allocation2] sm:$0xff] }
 0x34f   : > { %v3172_v55 = vadd.f32 %v5724_v28, %v3122_v5 }
 0x351   : > { %3173 = vst.msk [vmem:[#allocation2] sm:$0xff] %vm219_vm2, %v3172_v55 }
 0x358   : > { %v3177_v59 = vld [vmem:[#allocation2] sm:$0xff] }
 0x359   : > { %v3232_v11 = vadd.f32 %v5728_v37, %v3177_v59 }
 0x35b   : > { %3233 = vst.msk [vmem:[#allocation2] sm:$0xff] %vm219_vm2, %v3232_v11 }
 0x362   : > { %v3237_v63 = vld [vmem:[#allocation2] sm:$0xff] }
 0x363   : > { %v3287_v60 = vadd.f32 %v5732_v7, %v3237_v63 }
 0x365   : > { %3288 = vst.msk [vmem:[#allocation2] sm:$0xff] %vm219_vm2, %v3287_v60 }
 0x36c   : > { %v3292_v1 = vld [vmem:[#allocation2] sm:$0xff] }
 0x36d   : > { %v3347_v58 = vadd.f32 %v5736_v51, %v3292_v1 }
 0x36f   : > { %3348 = vst.msk [vmem:[#allocation2] sm:$0xff] %vm219_vm2, %v3347_v58 }
 0x376   : > { %v3352_v28 = vld [vmem:[#allocation2] sm:$0xff] }
 0x377   : > { %v3402_v2 = vadd.f32 %v5740_v56, %v3352_v28 }
 0x379   : > { %3403 = vst.msk [vmem:[#allocation2] sm:$0xff] %vm219_vm2, %v3402_v2 }
 0x380   : > { %v3407_v21 = vld [vmem:[#allocation2] sm:$0xff] }
 0x381   : > { %v3462_v37 = vadd.f32 %v5744_v18, %v3407_v21 }
 0x383   : > { %3463 = vst.msk [vmem:[#allocation2] sm:$0xff] %vm219_vm2, %v3462_v37 }
 0x38a   : > { %v3467_v3 = vld [vmem:[#allocation2] sm:$0xff] }
 0x38b   : > { %v3517_v7 = vadd.f32 %v5748_v6, %v3467_v3 }
 0x38d   : > { %3518 = vst.msk [vmem:[#allocation2] sm:$0xff] %vm219_vm2, %v3517_v7 }
 0x394   : > { %v3522_v49 = vld [vmem:[#allocation2] sm:$0xff] }
 0x395   : > { %v3577_v51 = vadd.f32 %v5752_v52, %v3522_v49 }
 0x397   : > { %3578 = vst.msk [vmem:[#allocation2] sm:$0xff] %vm219_vm2, %v3577_v51 }
 0x39e   : > { %v3582_v8 = vld [vmem:[#allocation2] sm:$0xff] }
 0x39f   : > { %v3632_v56 = vadd.f32 %v5756_v17, %v3582_v8 }
 0x3a1   : > { %3633 = vst.msk [vmem:[#allocation2] sm:$0xff] %vm219_vm2, %v3632_v56 }
 0x3a8   : > { %v3637_v4 = vld [vmem:[#allocation2] sm:$0xff] }
 0x3a9   : > { %v3692_v30 = vadd.f32 %v3686_v23, %v3637_v4 }
 0x3ab   : > { %3693 = vst.msk [vmem:[#allocation2] sm:$0xff] %vm219_vm2, %v3692_v30 }
 0x3b2   : > { %v3697_v18 = vld [vmem:[#allocation2] sm:$0xff] }
 0x3b3   : > { %v3747_v27 = vadd.f32 %v3741_v62, %v3697_v18 }
 0x3b5   : > { %3748 = vst.msk [vmem:[#allocation2] sm:$0xff] %vm219_vm2, %v3747_v27 }
 0x3bc   : > { %v3752_v6 = vld [vmem:[#allocation2] sm:$0xff] }
 0x3bd   : > { %v3807_v9 = vadd.f32 %v3801_v33, %v3752_v6 }
 0x3bf   : > { %3808 = vst.msk [vmem:[#allocation2] sm:$0xff] %vm219_vm2, %v3807_v9 }
 0x3c6   : > { %v3812_v52 = vld [vmem:[#allocation2] sm:$0xff] }
 0x3c7   : > { %v3862_v12 = vadd.f32 %v3856_v36, %v3812_v52 }
 0x3c9   : > { %3863 = vst.msk [vmem:[#allocation2] sm:$0xff] %vm219_vm2, %v3862_v12 }
 0x3d0   : > { %v3867_v15 = vld [vmem:[#allocation2] sm:$0xff] }
 0x3d1   : > { %v3922_v39 = vadd.f32 %v3916_v24, %v3867_v15 }
 0x3d3   : > { %3923 = vst.msk [vmem:[#allocation2] sm:$0xff] %vm219_vm2, %v3922_v39 }
 0x3da   : > { %v3924_v16 = vld [vmem:[#allocation2] sm:$0xff] }
 0x3db   : > { %vm3925_vm4 = vcmp.ge.f32.partialorder %v3924_v16, 0.0  ;;  %v3926_v13 = vmul.f32 0.2, %v3924_v16 }
 0x3dd   : > { %v3927_v17 = vsel %vm3925_vm4, %v3924_v16, %v3926_v13 }
 0x3de   : > { %3928 = vst.msk [vmem:[%s5700_s4 + $0x8] sm:$0xff] %vm219_vm2, %v3927_v17 }
 0x3df PF: > { %s12_s13 = sadd.s32 1, %s5069_s13   ;;  %s5811_s9 = smov %s5061_s11 }
 0x3e0   : > { %p9_p8 = scmp.ge.s32.totalorder %s12_s13, 6   ;;  %s5812_s10 = smov %s5065_s12 }
 0x3e1   : > { %s5813_s11 = smov %s5816_s14  ;;  %s5814_s12 = smov %s5820_s15 }
 0x3e2   :  { %11 = sbr.rel (!%p9_p8) target bundleno = 3 (0x3), region = 77 }

</bundles_post_ra>
